<compile_context>
chip_gen: v7x
topology: tpu7x:2x2x1
jax: 0.10.0
libtpu: 0.0.40
codegen_flags: <defaults>
</compile_context>

<pallas_src>
import functools
import numpy as np
import jax
import jax.numpy as jnp
from jax.experimental import pallas as pl
from jax.experimental.pallas import tpu as pltpu


# ---------------------------------------------------------------------------
# Pallas kernel: BW windows per grid step.
# ---------------------------------------------------------------------------
def _window_attn_kernel(x_ref, wqkv_ref, bqkv_ref, scale_ref, bias_ref,
                        wproj_ref, bproj_ref, o_ref, ctx_ref,
                        *, block_windows, seq_len, num_heads, head_dim):
    BW, N, H, hd = block_windows, seq_len, num_heads, head_dim
    C = H * hd

    # qkv projection for all BW*N tokens in one matmul (weights pre-transposed in wrapper).
    x = x_ref[...]                                                       # (BW*N, C)
    qkv = jnp.dot(x, wqkv_ref[...],
                  preferred_element_type=jnp.float32) + bqkv_ref[...]    # (BW*N, 3C)

    bias_all = bias_ref[...]                                             # (1 or BW, H, N, N)

    for h in range(H):                                                   # static, small H
        lo = h * hd
        q = qkv[:, lo:lo + hd].reshape(BW, N, hd)
        k = qkv[:, C + lo:C + lo + hd].reshape(BW, N, hd)
        v = qkv[:, 2 * C + lo:2 * C + lo + hd].reshape(BW, N, hd)

        # cosine attention: F.normalize(q/k, dim=-1); per-head logit scale from SMEM.
        qn = q * jax.lax.rsqrt(jnp.maximum(jnp.sum(q * q, axis=-1, keepdims=True), 1e-24))
        kn = k * jax.lax.rsqrt(jnp.maximum(jnp.sum(k * k, axis=-1, keepdims=True), 1e-24))
        qn = qn * scale_ref[h]

        attn = jnp.einsum('bnd,bmd->bnm', qn, kn,
                          preferred_element_type=jnp.float32)            # (BW, N, N)
        # precomputed 16*sigmoid(cpb) (+ additive mask already folded in); broadcasts over BW.
        attn = attn + bias_all[:, h]

        # softmax over keys
        attn = attn - jnp.max(attn, axis=-1, keepdims=True)
        p = jnp.exp(attn)
        p = p * pl.reciprocal(jnp.sum(p, axis=-1, keepdims=True), approx=True)

        ctx_ref[:, :, lo:lo + hd] = jnp.einsum('bnm,bmd->bnd', p, v,
                                               preferred_element_type=jnp.float32)

    # single output projection over the concatenated heads.
    ctx = ctx_ref[...].reshape(BW * N, C)
    o_ref[...] = jnp.dot(ctx, wproj_ref[...],
                         preferred_element_type=jnp.float32) + bproj_ref[...]


# ---------------------------------------------------------------------------
# Parameters / buffers (deterministic, matching the PyTorch __init__ shapes).
# ---------------------------------------------------------------------------
def init_params(key, dim, window_size, num_heads):
    ks = jax.random.split(key, 8)
    p = {}
    p["wqkv"] = 0.05 * jax.random.normal(ks[0], (3 * dim, dim), jnp.float32)
    p["q_bias"] = 0.05 * jax.random.normal(ks[1], (dim,), jnp.float32)
    p["v_bias"] = 0.05 * jax.random.normal(ks[2], (dim,), jnp.float32)
    p["logit_scale"] = jnp.log(10.0 * jnp.ones((num_heads, 1, 1), jnp.float32)) \
        + 0.01 * jax.random.normal(ks[3], (num_heads, 1, 1), jnp.float32)
    p["cpb_w1"] = 0.05 * jax.random.normal(ks[4], (512, 2), jnp.float32)
    p["cpb_b1"] = 0.05 * jax.random.normal(ks[5], (512,), jnp.float32)
    p["cpb_w2"] = 0.05 * jax.random.normal(ks[6], (num_heads, 512), jnp.float32)
    p["wproj"] = 0.05 * jax.random.normal(ks[7], (dim, dim), jnp.float32)
    p["bproj"] = jnp.zeros((dim,), jnp.float32)
    return p


def make_buffers(window_size):
    """relative_coords_table and relative_position_index (as in __init__)."""
    Wh, Ww = window_size
    rch = jnp.arange(-(Wh - 1), Wh, dtype=jnp.float32)
    rcw = jnp.arange(-(Ww - 1), Ww, dtype=jnp.float32)
    table = jnp.stack(jnp.meshgrid(rch, rcw, indexing="ij"), axis=-1)     # (2Wh-1, 2Ww-1, 2)
    table = table / jnp.array([Wh - 1, Ww - 1], dtype=jnp.float32)
    table = table * 8.0
    table = jnp.sign(table) * jnp.log2(jnp.abs(table) + 1.0) / np.log2(8.0)

    coords = jnp.stack(jnp.meshgrid(jnp.arange(Wh), jnp.arange(Ww), indexing="ij"))
    coords_flat = coords.reshape(2, -1)                                   # (2, N)
    rel = coords_flat[:, :, None] - coords_flat[:, None, :]               # (2, N, N)
    rel = rel.transpose(1, 2, 0)
    rel = rel.at[:, :, 0].add(Wh - 1)
    rel = rel.at[:, :, 1].add(Ww - 1)
    rel = rel.at[:, :, 0].multiply(2 * Ww - 1)
    rpi = rel.sum(-1)                                                     # (N, N) int
    return table, rpi


def _relative_position_bias(params, window_size, num_heads):
    """cpb_mlp + gather + 16*sigmoid (grid-invariant glue). Returns (H, N, N)."""
    Wh, Ww = window_size
    N = Wh * Ww
    table, rpi = make_buffers(window_size)
    t = table.reshape(-1, 2)
    h1 = jax.nn.relu(t @ params["cpb_w1"].T + params["cpb_b1"])
    tab = h1 @ params["cpb_w2"].T                                         # (M, H)
    bias = tab[rpi.reshape(-1)].reshape(N, N, num_heads).transpose(2, 0, 1)
    return 16.0 * jax.nn.sigmoid(bias)


def _choose_block_windows(B_, N, nW=None):
    """Windows per grid step: aim for >=~256 matmul rows, keep >=2 grid steps (v7x 2-TC)."""
    target_rows = 256
    max_bw = max(1, target_rows // max(N, 1))
    base = nW if nW is not None else B_          # divisors of nW always divide B_
    cands = [d for d in range(1, base + 1)
             if base % d == 0 and d <= max_bw and (d * N) % 8 == 0]
    if not cands:
        cands = [1]
    multi_step = [d for d in cands if B_ // d >= 2]
    pool = multi_step if multi_step else cands
    return max(pool)


# ---------------------------------------------------------------------------
# Wrapper calling pallas_call.
# ---------------------------------------------------------------------------
def window_attention(x, params, window_size, num_heads, mask=None, block_windows=None):
    B_, N, C = x.shape
    head_dim = C // num_heads

    # ---- grid-invariant precompute (hoisted out of the kernel) ----
    bias16 = _relative_position_bias(params, window_size, num_heads)      # (H, N, N)
    if mask is None:
        nW = None
        bias_full = bias16[None]                                          # (1, H, N, N)
    else:
        nW = mask.shape[0]
        bias_full = bias16[None] + mask.astype(jnp.float32)[:, None]      # (nW, H, N, N)

    wqkv_t = params["wqkv"].T                                             # (C, 3C)
    wproj_t = params["wproj"].T                                           # (C, C)
    qkv_bias = jnp.concatenate(
        [params["q_bias"], jnp.zeros_like(params["v_bias"]), params["v_bias"]])[None, :]
    scale = jnp.exp(jnp.minimum(params["logit_scale"].reshape(num_heads),
                                jnp.log(jnp.float32(1.0 / 0.01))))        # (H,) per-head scale
    bproj = params["bproj"][None, :]

    BW = block_windows if block_windows is not None else _choose_block_windows(B_, N, nW)
    assert B_ % BW == 0
    if mask is not None:
        assert nW % BW == 0, "block_windows must divide num mask window-types"
    grid = (B_ // BW,)

    x2 = x.reshape(B_ * N, C)                                             # lane-contiguous slab

    if mask is None:
        bias_spec = pl.BlockSpec((1, num_heads, N, N), lambda b: (0, 0, 0, 0))
    else:
        n_bias_blocks = nW // BW
        bias_spec = pl.BlockSpec((BW, num_heads, N, N),
                                 lambda b: (b % n_bias_blocks, 0, 0, 0))

    kernel = functools.partial(_window_attn_kernel, block_windows=BW, seq_len=N,
                               num_heads=num_heads, head_dim=head_dim)

    out2 = pl.pallas_call(
        kernel,
        out_shape=jax.ShapeDtypeStruct((B_ * N, C), jnp.float32),
        grid_spec=pltpu.PrefetchScalarGridSpec(
            num_scalar_prefetch=0,
            grid=grid,
            in_specs=[
                pl.BlockSpec((BW * N, C), lambda b: (b, 0)),              # x tokens
                pl.BlockSpec((C, 3 * C), lambda b: (0, 0)),               # qkv weight (pre-T)
                pl.BlockSpec((1, 3 * C), lambda b: (0, 0)),               # qkv bias
                pl.BlockSpec(memory_space=pltpu.MemorySpace.SMEM),        # per-head logit scale
                bias_spec,                                                # 16*sigmoid(cpb)(+mask)
                pl.BlockSpec((C, C), lambda b: (0, 0)),                   # proj weight (pre-T)
                pl.BlockSpec((1, C), lambda b: (0, 0)),                   # proj bias
            ],
            out_specs=pl.BlockSpec((BW * N, C), lambda b: (b, 0)),
            scratch_shapes=[pltpu.VMEM((BW, N, C), jnp.float32)],         # per-head context
        ),
        compiler_params=pltpu.CompilerParams(dimension_semantics=("parallel",)),
    )(x2, wqkv_t, qkv_bias, scale, bias_full, wproj_t, bproj)

    return out2.reshape(B_, N, C)


# ---------------------------------------------------------------------------
# Pure-JAX reference (mirrors the PyTorch forward, f32 HIGHEST) for validation.
# ---------------------------------------------------------------------------
def window_attention_ref(x, params, window_size, num_heads, mask=None):
    B_, N, C = x.shape
    hd = C // num_heads
    HI = jax.lax.Precision.HIGHEST

    bias = _relative_position_bias(params, window_size, num_heads)        # (H, N, N)

    qkv_bias = jnp.concatenate(
        [params["q_bias"], jnp.zeros_like(params["v_bias"]), params["v_bias"]])
    qkv = jnp.einsum("bnc,dc->bnd", x, params["wqkv"], precision=HI) + qkv_bias
    qkv = qkv.reshape(B_, N, 3, num_heads, hd).transpose(2, 0, 3, 1, 4)
    q, k, v = qkv[0], qkv[1], qkv[2]                                      # (B_, H, N, hd)

    qn = q / jnp.maximum(jnp.linalg.norm(q, axis=-1, keepdims=True), 1e-12)
    kn = k / jnp.maximum(jnp.linalg.norm(k, axis=-1, keepdims=True), 1e-12)
    attn = jnp.einsum("bhnd,bhmd->bhnm", qn, kn, precision=HI)
    scale = jnp.exp(jnp.minimum(params["logit_scale"], jnp.log(1.0 / 0.01)))
    attn = attn * scale[None]
    attn = attn + bias[None]
    if mask is not None:
        nW = mask.shape[0]
        attn = attn.reshape(B_ // nW, nW, num_heads, N, N) + mask[None, :, None]
        attn = attn.reshape(B_, num_heads, N, N)
    attn = jax.nn.softmax(attn, axis=-1)
    out = jnp.einsum("bhnm,bhmd->bhnd", attn, v, precision=HI)
    out = out.transpose(0, 2, 1, 3).reshape(B_, N, C)
    out = jnp.einsum("bnc,dc->bnd", out, params["wproj"], precision=HI) + params["bproj"]
    return out


if __name__ == "__main__":
    dim = 32
    window_size = (4, 4)          # N = 16
    num_heads = 4                 # head_dim = 8
    B = 2
    nW = 4
    B_ = B * nW                   # 8 windows total
    N = window_size[0] * window_size[1]

    key = jax.random.PRNGKey(0)
    kp, kx = jax.random.split(key)
    params = init_params(kp, dim, window_size, num_heads)
    x = jax.random.normal(kx, (B_, N, dim), jnp.float32)

    # kernel uses default (bf16-pass) MXU precision + approx reciprocal -> tolerance 2e-2
    TOL = 2e-2

    # --- maskless (W-MSA) path ---
    out = jax.block_until_ready(window_attention(x, params, window_size, num_heads, mask=None))
    ref = window_attention_ref(x, params, window_size, num_heads, mask=None)
    assert out.shape == (B_, N, dim)
    err = float(jnp.max(jnp.abs(out - ref)))
    assert err < TOL, err

    # --- masked (shifted-window style) path: (nW, N, N) additive 0/-100 mask ---
    idx = jnp.arange(N)
    blockeq = (idx[:, None] // 8) == (idx[None, :] // 8)
    mask_list = []
    for w in range(nW):
        if w % 2 == 0:
            mask_list.append(jnp.zeros((N, N), jnp.float32))
        else:
            mask_list.append(jnp.where(blockeq, 0.0, -100.0).astype(jnp.float32))
    mask = jnp.stack(mask_list)                                           # (nW, N, N)

    out_m = jax.block_until_ready(window_attention(x, params, window_size, num_heads, mask=mask))
    ref_m = window_attention_ref(x, params, window_size, num_heads, mask=mask)
    err_m = float(jnp.max(jnp.abs(out_m - ref_m)))
    assert err_m < TOL, err_m

    # TODO(synk): attn_drop / proj_drop are identity at p=0.0 (eval semantics); dropout not implemented.
    print("KERNEL_OK")
</pallas_src>

<mosaic_0001>
module attributes {stable_mosaic.version = 11 : i64} {
  func.func @_window_attn_kernel(%arg0: i32, %arg1: memref<64x32xf32, #tpu.memory_space<vmem>>, %arg2: memref<32x96xf32, #tpu.memory_space<vmem>>, %arg3: memref<1x96xf32, #tpu.memory_space<vmem>>, %arg4: memref<4xf32, #tpu.memory_space<smem>>, %arg5: memref<1x4x16x16xf32, #tpu.memory_space<vmem>>, %arg6: memref<32x32xf32, #tpu.memory_space<vmem>>, %arg7: memref<1x32xf32, #tpu.memory_space<vmem>>, %arg8: memref<64x32xf32, #tpu.memory_space<vmem>>, %arg9: memref<4x16x32xf32, #tpu.memory_space<vmem>>) attributes {dimension_semantics = [#tpu.dimension_semantics<parallel>], iteration_bounds = array<i64: 2>, scalar_prefetch = 0 : i64, scratch_operands = 1 : i64, tpu.core_type = #tpu.core_type<tc>, window_params = [{transform_indices = @transform_0, window_bounds = array<i64: 64, 32>}, {pipeline_mode = #tpu.pipeline_mode<synchronous>, transform_indices = @transform_1, window_bounds = array<i64: 32, 96>}, {pipeline_mode = #tpu.pipeline_mode<synchronous>, transform_indices = @transform_2, window_bounds = array<i64: 1, 96>}, {transform_indices = @transform_3, window_bounds = array<i64: 4>}, {pipeline_mode = #tpu.pipeline_mode<synchronous>, transform_indices = @transform_4, window_bounds = array<i64: 1, 4, 16, 16>}, {pipeline_mode = #tpu.pipeline_mode<synchronous>, transform_indices = @transform_5, window_bounds = array<i64: 32, 32>}, {pipeline_mode = #tpu.pipeline_mode<synchronous>, transform_indices = @transform_6, window_bounds = array<i64: 1, 32>}, {transform_indices = @transform_7, window_bounds = array<i64: 64, 32>}]} {
    %c0 = arith.constant 0 : index
    %c0_0 = arith.constant 0 : index
    %0 = vector.load %arg1[%c0, %c0_0] : memref<64x32xf32, #tpu.memory_space<vmem>>, vector<64x32xf32>
    %c0_1 = arith.constant 0 : index
    %c0_2 = arith.constant 0 : index
    %1 = vector.load %arg2[%c0_1, %c0_2] : memref<32x96xf32, #tpu.memory_space<vmem>>, vector<32x96xf32>
    %cst = arith.constant dense<0.000000e+00> : vector<64x96xf32>
    %2 = tpu.matmul %0, %1, %cst {dimension_numbers = #tpu.dot_dimension_numbers<[1], [0], [0], [1], [0, 0, 1, 1], [], []>} : vector<64x32xf32>, vector<32x96xf32>, vector<64x96xf32> -> vector<64x96xf32>
    %c0_3 = arith.constant 0 : index
    %c0_4 = arith.constant 0 : index
    %3 = vector.load %arg3[%c0_3, %c0_4] : memref<1x96xf32, #tpu.memory_space<vmem>>, vector<1x96xf32>
    %4 = vector.broadcast %3 : vector<1x96xf32> to vector<64x96xf32>
    %5 = arith.addf %2, %4 : vector<64x96xf32>
    %c0_5 = arith.constant 0 : index
    %c0_6 = arith.constant 0 : index
    %c0_7 = arith.constant 0 : index
    %c0_8 = arith.constant 0 : index
    %6 = vector.load %arg5[%c0_5, %c0_6, %c0_7, %c0_8] : memref<1x4x16x16xf32, #tpu.memory_space<vmem>>, vector<1x4x16x16xf32>
    %7 = vector.extract_strided_slice %5 {offsets = [0, 0], sizes = [64, 8], strides = [1, 1]} : vector<64x96xf32> to vector<64x8xf32>
    %8 = vector.shape_cast %7 : vector<64x8xf32> to vector<4x16x8xf32>
    %9 = vector.extract_strided_slice %5 {offsets = [0, 32], sizes = [64, 8], strides = [1, 1]} : vector<64x96xf32> to vector<64x8xf32>
    %10 = vector.shape_cast %9 : vector<64x8xf32> to vector<4x16x8xf32>
    %11 = vector.extract_strided_slice %5 {offsets = [0, 64], sizes = [64, 8], strides = [1, 1]} : vector<64x96xf32> to vector<64x8xf32>
    %12 = vector.shape_cast %11 : vector<64x8xf32> to vector<4x16x8xf32>
    %13 = arith.mulf %8, %8 : vector<4x16x8xf32>
    %cst_9 = arith.constant dense<0.000000e+00> : vector<4x16xf32>
    %14 = vector.multi_reduction <add>, %13, %cst_9 [2] : vector<4x16x8xf32> to vector<4x16xf32>
    %15 = vector.shape_cast %14 : vector<4x16xf32> to vector<4x16x1xf32>
    %cst_10 = arith.constant 1.000000e-24 : f32
    %16 = vector.broadcast %cst_10 : f32 to vector<4x16x1xf32>
    %17 = arith.maximumf %15, %16 : vector<4x16x1xf32>
    %18 = math.rsqrt %17 : vector<4x16x1xf32>
    %19 = vector.broadcast %18 : vector<4x16x1xf32> to vector<4x16x8xf32>
    %20 = arith.mulf %8, %19 : vector<4x16x8xf32>
    %21 = arith.mulf %10, %10 : vector<4x16x8xf32>
    %cst_11 = arith.constant dense<0.000000e+00> : vector<4x16xf32>
    %22 = vector.multi_reduction <add>, %21, %cst_11 [2] : vector<4x16x8xf32> to vector<4x16xf32>
    %23 = vector.shape_cast %22 : vector<4x16xf32> to vector<4x16x1xf32>
    %cst_12 = arith.constant 1.000000e-24 : f32
    %24 = vector.broadcast %cst_12 : f32 to vector<4x16x1xf32>
    %25 = arith.maximumf %23, %24 : vector<4x16x1xf32>
    %26 = math.rsqrt %25 : vector<4x16x1xf32>
    %27 = vector.broadcast %26 : vector<4x16x1xf32> to vector<4x16x8xf32>
    %28 = arith.mulf %10, %27 : vector<4x16x8xf32>
    %c0_13 = arith.constant 0 : index
    %29 = memref.load %arg4[%c0_13] : memref<4xf32, #tpu.memory_space<smem>>
    %30 = vector.broadcast %29 : f32 to vector<4x16x8xf32>
    %31 = arith.mulf %20, %30 : vector<4x16x8xf32>
    "tpu.trace_start"() <{level = 10 : i32, message = "bnd,bmd->bnm"}> : () -> ()
    %cst_14 = arith.constant dense<0.000000e+00> : vector<4x16x16xf32>
    %32 = tpu.matmul %31, %28, %cst_14 {dimension_numbers = #tpu.dot_dimension_numbers<[2], [2], [1], [1], [0, 0, 0, 1, 1, 1], [0], [0]>} : vector<4x16x8xf32>, vector<4x16x8xf32>, vector<4x16x16xf32> -> vector<4x16x16xf32>
    "tpu.trace_stop"() : () -> ()
    %33 = vector.extract_strided_slice %6 {offsets = [0, 0, 0, 0], sizes = [1, 1, 16, 16], strides = [1, 1, 1, 1]} : vector<1x4x16x16xf32> to vector<1x1x16x16xf32>
    %34 = vector.shape_cast %33 : vector<1x1x16x16xf32> to vector<1x16x16xf32>
    %35 = vector.broadcast %34 : vector<1x16x16xf32> to vector<4x16x16xf32>
    %36 = arith.addf %32, %35 : vector<4x16x16xf32>
    %cst_15 = arith.constant dense<0xFF800000> : vector<4x16xf32>
    %37 = vector.multi_reduction <maximumf>, %36, %cst_15 [2] : vector<4x16x16xf32> to vector<4x16xf32>
    %38 = vector.shape_cast %37 : vector<4x16xf32> to vector<4x16x1xf32>
    %39 = vector.broadcast %38 : vector<4x16x1xf32> to vector<4x16x16xf32>
    %40 = arith.subf %36, %39 : vector<4x16x16xf32>
    %41 = math.exp %40 : vector<4x16x16xf32>
    %cst_16 = arith.constant dense<0.000000e+00> : vector<4x16xf32>
    %42 = vector.multi_reduction <add>, %41, %cst_16 [2] : vector<4x16x16xf32> to vector<4x16xf32>
    %43 = vector.shape_cast %42 : vector<4x16xf32> to vector<4x16x1xf32>
    %44 = tpu.reciprocal %43 {approx = true} : vector<4x16x1xf32> -> vector<4x16x1xf32>
    %45 = vector.broadcast %44 : vector<4x16x1xf32> to vector<4x16x16xf32>
    %46 = arith.mulf %41, %45 : vector<4x16x16xf32>
    "tpu.trace_start"() <{level = 10 : i32, message = "bnm,bmd->bnd"}> : () -> ()
    %cst_17 = arith.constant dense<0.000000e+00> : vector<4x16x8xf32>
    %47 = tpu.matmul %46, %12, %cst_17 {dimension_numbers = #tpu.dot_dimension_numbers<[2], [1], [1], [2], [0, 0, 0, 1, 1, 2], [0], [0]>} : vector<4x16x16xf32>, vector<4x16x8xf32>, vector<4x16x8xf32> -> vector<4x16x8xf32>
    "tpu.trace_stop"() : () -> ()
    %c0_18 = arith.constant 0 : index
    %c0_19 = arith.constant 0 : index
    %c0_20 = arith.constant 0 : index
    %48 = vector.load %arg9[%c0_18, %c0_19, %c0_20] : memref<4x16x32xf32, #tpu.memory_space<vmem>>, vector<4x16x8xf32>
    tpu.vector_store %arg9[%c0_18, %c0_19, %c0_20], %47 {strides = array<i32>} : memref<4x16x32xf32, #tpu.memory_space<vmem>>, vector<4x16x8xf32>,
    %49 = vector.extract_strided_slice %5 {offsets = [0, 8], sizes = [64, 8], strides = [1, 1]} : vector<64x96xf32> to vector<64x8xf32>
    %50 = vector.shape_cast %49 : vector<64x8xf32> to vector<4x16x8xf32>
    %51 = vector.extract_strided_slice %5 {offsets = [0, 40], sizes = [64, 8], strides = [1, 1]} : vector<64x96xf32> to vector<64x8xf32>
    %52 = vector.shape_cast %51 : vector<64x8xf32> to vector<4x16x8xf32>
    %53 = vector.extract_strided_slice %5 {offsets = [0, 72], sizes = [64, 8], strides = [1, 1]} : vector<64x96xf32> to vector<64x8xf32>
    %54 = vector.shape_cast %53 : vector<64x8xf32> to vector<4x16x8xf32>
    %55 = arith.mulf %50, %50 : vector<4x16x8xf32>
    %cst_21 = arith.constant dense<0.000000e+00> : vector<4x16xf32>
    %56 = vector.multi_reduction <add>, %55, %cst_21 [2] : vector<4x16x8xf32> to vector<4x16xf32>
    %57 = vector.shape_cast %56 : vector<4x16xf32> to vector<4x16x1xf32>
    %cst_22 = arith.constant 1.000000e-24 : f32
    %58 = vector.broadcast %cst_22 : f32 to vector<4x16x1xf32>
    %59 = arith.maximumf %57, %58 : vector<4x16x1xf32>
    %60 = math.rsqrt %59 : vector<4x16x1xf32>
    %61 = vector.broadcast %60 : vector<4x16x1xf32> to vector<4x16x8xf32>
    %62 = arith.mulf %50, %61 : vector<4x16x8xf32>
    %63 = arith.mulf %52, %52 : vector<4x16x8xf32>
    %cst_23 = arith.constant dense<0.000000e+00> : vector<4x16xf32>
    %64 = vector.multi_reduction <add>, %63, %cst_23 [2] : vector<4x16x8xf32> to vector<4x16xf32>
    %65 = vector.shape_cast %64 : vector<4x16xf32> to vector<4x16x1xf32>
    %cst_24 = arith.constant 1.000000e-24 : f32
    %66 = vector.broadcast %cst_24 : f32 to vector<4x16x1xf32>
    %67 = arith.maximumf %65, %66 : vector<4x16x1xf32>
    %68 = math.rsqrt %67 : vector<4x16x1xf32>
    %69 = vector.broadcast %68 : vector<4x16x1xf32> to vector<4x16x8xf32>
    %70 = arith.mulf %52, %69 : vector<4x16x8xf32>
    %c1 = arith.constant 1 : index
    %71 = memref.load %arg4[%c1] : memref<4xf32, #tpu.memory_space<smem>>
    %72 = vector.broadcast %71 : f32 to vector<4x16x8xf32>
    %73 = arith.mulf %62, %72 : vector<4x16x8xf32>
    "tpu.trace_start"() <{level = 10 : i32, message = "bnd,bmd->bnm"}> : () -> ()
    %cst_25 = arith.constant dense<0.000000e+00> : vector<4x16x16xf32>
    %74 = tpu.matmul %73, %70, %cst_25 {dimension_numbers = #tpu.dot_dimension_numbers<[2], [2], [1], [1], [0, 0, 0, 1, 1, 1], [0], [0]>} : vector<4x16x8xf32>, vector<4x16x8xf32>, vector<4x16x16xf32> -> vector<4x16x16xf32>
    "tpu.trace_stop"() : () -> ()
    %75 = vector.extract_strided_slice %6 {offsets = [0, 1, 0, 0], sizes = [1, 1, 16, 16], strides = [1, 1, 1, 1]} : vector<1x4x16x16xf32> to vector<1x1x16x16xf32>
    %76 = vector.shape_cast %75 : vector<1x1x16x16xf32> to vector<1x16x16xf32>
    %77 = vector.broadcast %76 : vector<1x16x16xf32> to vector<4x16x16xf32>
    %78 = arith.addf %74, %77 : vector<4x16x16xf32>
    %cst_26 = arith.constant dense<0xFF800000> : vector<4x16xf32>
    %79 = vector.multi_reduction <maximumf>, %78, %cst_26 [2] : vector<4x16x16xf32> to vector<4x16xf32>
    %80 = vector.shape_cast %79 : vector<4x16xf32> to vector<4x16x1xf32>
    %81 = vector.broadcast %80 : vector<4x16x1xf32> to vector<4x16x16xf32>
    %82 = arith.subf %78, %81 : vector<4x16x16xf32>
    %83 = math.exp %82 : vector<4x16x16xf32>
    %cst_27 = arith.constant dense<0.000000e+00> : vector<4x16xf32>
    %84 = vector.multi_reduction <add>, %83, %cst_27 [2] : vector<4x16x16xf32> to vector<4x16xf32>
    %85 = vector.shape_cast %84 : vector<4x16xf32> to vector<4x16x1xf32>
    %86 = tpu.reciprocal %85 {approx = true} : vector<4x16x1xf32> -> vector<4x16x1xf32>
    %87 = vector.broadcast %86 : vector<4x16x1xf32> to vector<4x16x16xf32>
    %88 = arith.mulf %83, %87 : vector<4x16x16xf32>
    "tpu.trace_start"() <{level = 10 : i32, message = "bnm,bmd->bnd"}> : () -> ()
    %cst_28 = arith.constant dense<0.000000e+00> : vector<4x16x8xf32>
    %89 = tpu.matmul %88, %54, %cst_28 {dimension_numbers = #tpu.dot_dimension_numbers<[2], [1], [1], [2], [0, 0, 0, 1, 1, 2], [0], [0]>} : vector<4x16x16xf32>, vector<4x16x8xf32>, vector<4x16x8xf32> -> vector<4x16x8xf32>
    "tpu.trace_stop"() : () -> ()
    %c0_29 = arith.constant 0 : index
    %c0_30 = arith.constant 0 : index
    %c8 = arith.constant 8 : index
    %90 = vector.load %arg9[%c0_29, %c0_30, %c8] : memref<4x16x32xf32, #tpu.memory_space<vmem>>, vector<4x16x8xf32>
    tpu.vector_store %arg9[%c0_29, %c0_30, %c8], %89 {strides = array<i32>} : memref<4x16x32xf32, #tpu.memory_space<vmem>>, vector<4x16x8xf32>,
    %91 = vector.extract_strided_slice %5 {offsets = [0, 16], sizes = [64, 8], strides = [1, 1]} : vector<64x96xf32> to vector<64x8xf32>
    %92 = vector.shape_cast %91 : vector<64x8xf32> to vector<4x16x8xf32>
    %93 = vector.extract_strided_slice %5 {offsets = [0, 48], sizes = [64, 8], strides = [1, 1]} : vector<64x96xf32> to vector<64x8xf32>
    %94 = vector.shape_cast %93 : vector<64x8xf32> to vector<4x16x8xf32>
    %95 = vector.extract_strided_slice %5 {offsets = [0, 80], sizes = [64, 8], strides = [1, 1]} : vector<64x96xf32> to vector<64x8xf32>
    %96 = vector.shape_cast %95 : vector<64x8xf32> to vector<4x16x8xf32>
    %97 = arith.mulf %92, %92 : vector<4x16x8xf32>
    %cst_31 = arith.constant dense<0.000000e+00> : vector<4x16xf32>
    %98 = vector.multi_reduction <add>, %97, %cst_31 [2] : vector<4x16x8xf32> to vector<4x16xf32>
    %99 = vector.shape_cast %98 : vector<4x16xf32> to vector<4x16x1xf32>
    %cst_32 = arith.constant 1.000000e-24 : f32
    %100 = vector.broadcast %cst_32 : f32 to vector<4x16x1xf32>
    %101 = arith.maximumf %99, %100 : vector<4x16x1xf32>
    %102 = math.rsqrt %101 : vector<4x16x1xf32>
    %103 = vector.broadcast %102 : vector<4x16x1xf32> to vector<4x16x8xf32>
    %104 = arith.mulf %92, %103 : vector<4x16x8xf32>
    %105 = arith.mulf %94, %94 : vector<4x16x8xf32>
    %cst_33 = arith.constant dense<0.000000e+00> : vector<4x16xf32>
    %106 = vector.multi_reduction <add>, %105, %cst_33 [2] : vector<4x16x8xf32> to vector<4x16xf32>
    %107 = vector.shape_cast %106 : vector<4x16xf32> to vector<4x16x1xf32>
    %cst_34 = arith.constant 1.000000e-24 : f32
    %108 = vector.broadcast %cst_34 : f32 to vector<4x16x1xf32>
    %109 = arith.maximumf %107, %108 : vector<4x16x1xf32>
    %110 = math.rsqrt %109 : vector<4x16x1xf32>
    %111 = vector.broadcast %110 : vector<4x16x1xf32> to vector<4x16x8xf32>
    %112 = arith.mulf %94, %111 : vector<4x16x8xf32>
    %c2 = arith.constant 2 : index
    %113 = memref.load %arg4[%c2] : memref<4xf32, #tpu.memory_space<smem>>
    %114 = vector.broadcast %113 : f32 to vector<4x16x8xf32>
    %115 = arith.mulf %104, %114 : vector<4x16x8xf32>
    "tpu.trace_start"() <{level = 10 : i32, message = "bnd,bmd->bnm"}> : () -> ()
    %cst_35 = arith.constant dense<0.000000e+00> : vector<4x16x16xf32>
    %116 = tpu.matmul %115, %112, %cst_35 {dimension_numbers = #tpu.dot_dimension_numbers<[2], [2], [1], [1], [0, 0, 0, 1, 1, 1], [0], [0]>} : vector<4x16x8xf32>, vector<4x16x8xf32>, vector<4x16x16xf32> -> vector<4x16x16xf32>
    "tpu.trace_stop"() : () -> ()
    %117 = vector.extract_strided_slice %6 {offsets = [0, 2, 0, 0], sizes = [1, 1, 16, 16], strides = [1, 1, 1, 1]} : vector<1x4x16x16xf32> to vector<1x1x16x16xf32>
    %118 = vector.shape_cast %117 : vector<1x1x16x16xf32> to vector<1x16x16xf32>
    %119 = vector.broadcast %118 : vector<1x16x16xf32> to vector<4x16x16xf32>
    %120 = arith.addf %116, %119 : vector<4x16x16xf32>
    %cst_36 = arith.constant dense<0xFF800000> : vector<4x16xf32>
    %121 = vector.multi_reduction <maximumf>, %120, %cst_36 [2] : vector<4x16x16xf32> to vector<4x16xf32>
    %122 = vector.shape_cast %121 : vector<4x16xf32> to vector<4x16x1xf32>
    %123 = vector.broadcast %122 : vector<4x16x1xf32> to vector<4x16x16xf32>
    %124 = arith.subf %120, %123 : vector<4x16x16xf32>
    %125 = math.exp %124 : vector<4x16x16xf32>
    %cst_37 = arith.constant dense<0.000000e+00> : vector<4x16xf32>
    %126 = vector.multi_reduction <add>, %125, %cst_37 [2] : vector<4x16x16xf32> to vector<4x16xf32>
    %127 = vector.shape_cast %126 : vector<4x16xf32> to vector<4x16x1xf32>
    %128 = tpu.reciprocal %127 {approx = true} : vector<4x16x1xf32> -> vector<4x16x1xf32>
    %129 = vector.broadcast %128 : vector<4x16x1xf32> to vector<4x16x16xf32>
    %130 = arith.mulf %125, %129 : vector<4x16x16xf32>
    "tpu.trace_start"() <{level = 10 : i32, message = "bnm,bmd->bnd"}> : () -> ()
    %cst_38 = arith.constant dense<0.000000e+00> : vector<4x16x8xf32>
    %131 = tpu.matmul %130, %96, %cst_38 {dimension_numbers = #tpu.dot_dimension_numbers<[2], [1], [1], [2], [0, 0, 0, 1, 1, 2], [0], [0]>} : vector<4x16x16xf32>, vector<4x16x8xf32>, vector<4x16x8xf32> -> vector<4x16x8xf32>
    "tpu.trace_stop"() : () -> ()
    %c0_39 = arith.constant 0 : index
    %c0_40 = arith.constant 0 : index
    %c16 = arith.constant 16 : index
    %132 = vector.load %arg9[%c0_39, %c0_40, %c16] : memref<4x16x32xf32, #tpu.memory_space<vmem>>, vector<4x16x8xf32>
    tpu.vector_store %arg9[%c0_39, %c0_40, %c16], %131 {strides = array<i32>} : memref<4x16x32xf32, #tpu.memory_space<vmem>>, vector<4x16x8xf32>,
    %133 = vector.extract_strided_slice %5 {offsets = [0, 24], sizes = [64, 8], strides = [1, 1]} : vector<64x96xf32> to vector<64x8xf32>
    %134 = vector.shape_cast %133 : vector<64x8xf32> to vector<4x16x8xf32>
    %135 = vector.extract_strided_slice %5 {offsets = [0, 56], sizes = [64, 8], strides = [1, 1]} : vector<64x96xf32> to vector<64x8xf32>
    %136 = vector.shape_cast %135 : vector<64x8xf32> to vector<4x16x8xf32>
    %137 = vector.extract_strided_slice %5 {offsets = [0, 88], sizes = [64, 8], strides = [1, 1]} : vector<64x96xf32> to vector<64x8xf32>
    %138 = vector.shape_cast %137 : vector<64x8xf32> to vector<4x16x8xf32>
    %139 = arith.mulf %134, %134 : vector<4x16x8xf32>
    %cst_41 = arith.constant dense<0.000000e+00> : vector<4x16xf32>
    %140 = vector.multi_reduction <add>, %139, %cst_41 [2] : vector<4x16x8xf32> to vector<4x16xf32>
    %141 = vector.shape_cast %140 : vector<4x16xf32> to vector<4x16x1xf32>
    %cst_42 = arith.constant 1.000000e-24 : f32
    %142 = vector.broadcast %cst_42 : f32 to vector<4x16x1xf32>
    %143 = arith.maximumf %141, %142 : vector<4x16x1xf32>
    %144 = math.rsqrt %143 : vector<4x16x1xf32>
    %145 = vector.broadcast %144 : vector<4x16x1xf32> to vector<4x16x8xf32>
    %146 = arith.mulf %134, %145 : vector<4x16x8xf32>
    %147 = arith.mulf %136, %136 : vector<4x16x8xf32>
    %cst_43 = arith.constant dense<0.000000e+00> : vector<4x16xf32>
    %148 = vector.multi_reduction <add>, %147, %cst_43 [2] : vector<4x16x8xf32> to vector<4x16xf32>
    %149 = vector.shape_cast %148 : vector<4x16xf32> to vector<4x16x1xf32>
    %cst_44 = arith.constant 1.000000e-24 : f32
    %150 = vector.broadcast %cst_44 : f32 to vector<4x16x1xf32>
    %151 = arith.maximumf %149, %150 : vector<4x16x1xf32>
    %152 = math.rsqrt %151 : vector<4x16x1xf32>
    %153 = vector.broadcast %152 : vector<4x16x1xf32> to vector<4x16x8xf32>
    %154 = arith.mulf %136, %153 : vector<4x16x8xf32>
    %c3 = arith.constant 3 : index
    %155 = memref.load %arg4[%c3] : memref<4xf32, #tpu.memory_space<smem>>
    %156 = vector.broadcast %155 : f32 to vector<4x16x8xf32>
    %157 = arith.mulf %146, %156 : vector<4x16x8xf32>
    "tpu.trace_start"() <{level = 10 : i32, message = "bnd,bmd->bnm"}> : () -> ()
    %cst_45 = arith.constant dense<0.000000e+00> : vector<4x16x16xf32>
    %158 = tpu.matmul %157, %154, %cst_45 {dimension_numbers = #tpu.dot_dimension_numbers<[2], [2], [1], [1], [0, 0, 0, 1, 1, 1], [0], [0]>} : vector<4x16x8xf32>, vector<4x16x8xf32>, vector<4x16x16xf32> -> vector<4x16x16xf32>
    "tpu.trace_stop"() : () -> ()
    %159 = vector.extract_strided_slice %6 {offsets = [0, 3, 0, 0], sizes = [1, 1, 16, 16], strides = [1, 1, 1, 1]} : vector<1x4x16x16xf32> to vector<1x1x16x16xf32>
    %160 = vector.shape_cast %159 : vector<1x1x16x16xf32> to vector<1x16x16xf32>
    %161 = vector.broadcast %160 : vector<1x16x16xf32> to vector<4x16x16xf32>
    %162 = arith.addf %158, %161 : vector<4x16x16xf32>
    %cst_46 = arith.constant dense<0xFF800000> : vector<4x16xf32>
    %163 = vector.multi_reduction <maximumf>, %162, %cst_46 [2] : vector<4x16x16xf32> to vector<4x16xf32>
    %164 = vector.shape_cast %163 : vector<4x16xf32> to vector<4x16x1xf32>
    %165 = vector.broadcast %164 : vector<4x16x1xf32> to vector<4x16x16xf32>
    %166 = arith.subf %162, %165 : vector<4x16x16xf32>
    %167 = math.exp %166 : vector<4x16x16xf32>
    %cst_47 = arith.constant dense<0.000000e+00> : vector<4x16xf32>
    %168 = vector.multi_reduction <add>, %167, %cst_47 [2] : vector<4x16x16xf32> to vector<4x16xf32>
    %169 = vector.shape_cast %168 : vector<4x16xf32> to vector<4x16x1xf32>
    %170 = tpu.reciprocal %169 {approx = true} : vector<4x16x1xf32> -> vector<4x16x1xf32>
    %171 = vector.broadcast %170 : vector<4x16x1xf32> to vector<4x16x16xf32>
    %172 = arith.mulf %167, %171 : vector<4x16x16xf32>
    "tpu.trace_start"() <{level = 10 : i32, message = "bnm,bmd->bnd"}> : () -> ()
    %cst_48 = arith.constant dense<0.000000e+00> : vector<4x16x8xf32>
    %173 = tpu.matmul %172, %138, %cst_48 {dimension_numbers = #tpu.dot_dimension_numbers<[2], [1], [1], [2], [0, 0, 0, 1, 1, 2], [0], [0]>} : vector<4x16x16xf32>, vector<4x16x8xf32>, vector<4x16x8xf32> -> vector<4x16x8xf32>
    "tpu.trace_stop"() : () -> ()
    %c0_49 = arith.constant 0 : index
    %c0_50 = arith.constant 0 : index
    %c24 = arith.constant 24 : index
    %174 = vector.load %arg9[%c0_49, %c0_50, %c24] : memref<4x16x32xf32, #tpu.memory_space<vmem>>, vector<4x16x8xf32>
    tpu.vector_store %arg9[%c0_49, %c0_50, %c24], %173 {strides = array<i32>} : memref<4x16x32xf32, #tpu.memory_space<vmem>>, vector<4x16x8xf32>,
    %c0_51 = arith.constant 0 : index
    %c0_52 = arith.constant 0 : index
    %c0_53 = arith.constant 0 : index
    %175 = vector.load %arg9[%c0_51, %c0_52, %c0_53] : memref<4x16x32xf32, #tpu.memory_space<vmem>>, vector<4x16x32xf32>
    %176 = vector.shape_cast %175 : vector<4x16x32xf32> to vector<64x32xf32>
    %c0_54 = arith.constant 0 : index
    %c0_55 = arith.constant 0 : index
    %177 = vector.load %arg6[%c0_54, %c0_55] : memref<32x32xf32, #tpu.memory_space<vmem>>, vector<32x32xf32>
    %cst_56 = arith.constant dense<0.000000e+00> : vector<64x32xf32>
    %178 = tpu.matmul %176, %177, %cst_56 {dimension_numbers = #tpu.dot_dimension_numbers<[1], [0], [0], [1], [0, 0, 1, 1], [], []>} : vector<64x32xf32>, vector<32x32xf32>, vector<64x32xf32> -> vector<64x32xf32>
    %c0_57 = arith.constant 0 : index
    %c0_58 = arith.constant 0 : index
    %179 = vector.load %arg7[%c0_57, %c0_58] : memref<1x32xf32, #tpu.memory_space<vmem>>, vector<1x32xf32>
    %180 = vector.broadcast %179 : vector<1x32xf32> to vector<64x32xf32>
    %181 = arith.addf %178, %180 : vector<64x32xf32>
    %c0_59 = arith.constant 0 : index
    %c0_60 = arith.constant 0 : index
    %182 = vector.load %arg8[%c0_59, %c0_60] : memref<64x32xf32, #tpu.memory_space<vmem>>, vector<64x32xf32>
    tpu.vector_store %arg8[%c0_59, %c0_60], %181 {strides = array<i32>} : memref<64x32xf32, #tpu.memory_space<vmem>>, vector<64x32xf32>,
    return
  }
  func.func @transform_0(%arg0: i32) -> (i32, i32) {
    %c0_i32 = arith.constant 0 : i32
    %c0_i32_0 = arith.constant 0 : i32
    return %arg0, %c0_i32 : i32, i32
  }
  func.func @transform_1(%arg0: i32) -> (i32, i32) {
    %c0_i32 = arith.constant 0 : i32
    %c0_i32_0 = arith.constant 0 : i32
    %c0_i32_1 = arith.constant 0 : i32
    return %c0_i32, %c0_i32_0 : i32, i32
  }
  func.func @transform_2(%arg0: i32) -> (i32, i32) {
    %c0_i32 = arith.constant 0 : i32
    %c0_i32_0 = arith.constant 0 : i32
    %c0_i32_1 = arith.constant 0 : i32
    return %c0_i32, %c0_i32_0 : i32, i32
  }
  func.func @transform_3(%arg0: i32) -> i32 {
    %c0_i32 = arith.constant 0 : i32
    %c0_i32_0 = arith.constant 0 : i32
    return %c0_i32 : i32
  }
  func.func @transform_4(%arg0: i32) -> (i32, i32, i32, i32) {
    %c0_i32 = arith.constant 0 : i32
    %c0_i32_0 = arith.constant 0 : i32
    %c0_i32_1 = arith.constant 0 : i32
    %c0_i32_2 = arith.constant 0 : i32
    %c0_i32_3 = arith.constant 0 : i32
    return %c0_i32, %c0_i32_0, %c0_i32_1, %c0_i32_2 : i32, i32, i32, i32
  }
  func.func @transform_5(%arg0: i32) -> (i32, i32) {
    %c0_i32 = arith.constant 0 : i32
    %c0_i32_0 = arith.constant 0 : i32
    %c0_i32_1 = arith.constant 0 : i32
    return %c0_i32, %c0_i32_0 : i32, i32
  }
  func.func @transform_6(%arg0: i32) -> (i32, i32) {
    %c0_i32 = arith.constant 0 : i32
    %c0_i32_0 = arith.constant 0 : i32
    %c0_i32_1 = arith.constant 0 : i32
    return %c0_i32, %c0_i32_0 : i32, i32
  }
  func.func @transform_7(%arg0: i32) -> (i32, i32) {
    %c0_i32 = arith.constant 0 : i32
    %c0_i32_0 = arith.constant 0 : i32
    return %arg0, %c0_i32 : i32, i32
  }
}

</mosaic_0001>

<bundles_post_ra>
// kernel: tpu_custom_call.1
= control target key start
LH: loop header
LB: loop body
LE: loop exit
PB: predicated region body
PF: predicated region fallthrough
CT: control target
= control target key end

     0   :  { %12 = vsyncpa [#allocation4], 0  ;;  %s5931_s24 = smov 0   ;;  %s7109_s0 = inlined_call_operand.vmem [shape: f32[128,32], index: 0, kind: input, shape index: {}]   ;;  %s7110_s1 = inlined_call_operand.vmem [shape: f32[32,96], index: 1, kind: input, shape index: {}]   ;;  %s7111_s2 = inlined_call_operand.vmem [shape: f32[1,96], index: 2, kind: input, shape index: {}]   ;;  %s7112_s3 = inlined_call_operand.vmem [shape: f32[4], index: 3, kind: input, shape index: {}]   ;;  %s7113_s4 = inlined_call_operand.vmem [shape: f32[1,4,16,16], index: 4, kind: input, shape index: {}]   ;;  %s7114_s5 = inlined_call_operand.vmem [shape: f32[32,32], index: 5, kind: input, shape index: {}]   ;;  %s7115_s6 = inlined_call_operand.vmem [shape: f32[1,32], index: 6, kind: input, shape index: {}]   ;;  %s7116_s7 = inlined_call_operand.vmem [shape: f32[128,32], index: 7, kind: output, shape index: {}]  }
   0x1 LB: > { %s4674_s25 = sadd.s32 4294967295, %s5874_s24   ;;  %p4676_p0 = scmp.ge.s32.totalorder %s5874_s24, 1  ;;  %s5874_s24 = sphi %s5931_s24, %s18_s24  }
   0x2   : > { %p201_p1 = scmp.lt.s32.totalorder %s5874_s24, 3  ;;  %s220_s28 = sshll.u32 %s7112_s3, 4  ;;  %s221_s28 = int_to_ptr.vmem [resolvable:$true] %s220_s28 }
   0x3   : > { %p5946_p3 = scmp.eq.s32.totalorder %s4674_s25, 0  ;;  %s5849_s8 = scalar_lea.vmem %s221_s28, 16 }
   0x4   : > { %p5942_p2 = pnand %p4676_p0, %p201_p1  ;;  %p5850_p6 = scmp.ne.s32.totalorder %s221_s28, %s5849_s8 }
   0x5   : > { %p5857_p10 = scmp.lt.s32.totalorder %s221_s28, %s221_s28  ;;  %p5858_p11 = scmp.lt.s32.totalorder %s5849_s8, %s5849_s8 }
   0x6   : > { %p5404_p4 = pneg %p5942_p2 }
   0x7   : > { %p5859_p12 = por %p5858_p11, %p5857_p10 }
   0x8   : > { %p5405_p5 = pnand %p5946_p3, %p5404_p4 }
   0xa   : > { %p5851_p7 = pneg %p5405_p5 }
   0xc   : > { %p5852_p8 = pnand %p5851_p7, %p5850_p6 }
   0xe   : > { %p5853_p9 = pneg %p5852_p8 }
  0x10   : > { %p5860_p13 = pnand %p5859_p12, %p5853_p9 }
  0x12   : > { %5863 = shalt.err (!%p5860_p13)
}
  0x13   : > { %s5876_s9 = smov [#allocation3]   ;;  %251 = sbr.rel (%p5942_p2) target bundleno = 3713 (0xe81), region = 48 }
  0x14   : > { %5407 = dma.vmem_to_smem (!%p5405_p5), %s221_s28, 16, %s5876_s9, [#allocation4]  }
  0x1a   : > { %5869 = dma.done.wait (%p5946_p3), [#allocation4], 16  }
  0x1b   : > { %5871 = vsyncadd (%p5946_p3), [#allocation4], 4294967280 }
  0x1c   : > { %257 = sfence }
  0x1d   : > { %v304_v0 = vld [vmem:[%s7110_s1] sm:$0xff]  ;;  %v305_v1 = vld [vmem:[%s7110_s1 + $0x8] sm:$0xff]  ;;  %v306_v2 = vld [vmem:[%s7110_s1 + $0x10] sm:$0xff]  ;;  %s4681_s16 = sshll.u32 %s4674_s25, 3  ;;  %vm315_vm0 = vcmask 261120   ;;  %s5877_s26 = smov 96  }
  0x1e   : > { %v5220_v3 = vpack.c.bf16 %v305_v1, %v304_v0  ;;  %v307_v4 = vld [vmem:[%s7110_s1 + $0x18] sm:$0xff]  ;;  %p285_p0 = scmp.lt.s32.totalorder %s4681_s16, 15  ;;  %v4685_v14 = vld [vmem:[%s7111_s2] ss:$0 sm:$0xff]  ;;  %vm461_vm1 = vcmask 64512   ;;  %s590_s27 = sld [smem:[#allocation3]] }
  0x1f   : > { %v5224_v5 = vpack.c.bf16 %v307_v4, %v306_v2  ;;  %s5878_s28 = smov 88   ;;  %s5879_s29 = smov 120   ;;  %vm6133_vm2 = vmpackc.low %vm461_vm1, %vm461_vm1  ;;  %vm964_vm3 = vcmask 130048   ;;  %vm2419_vm4 = vcmask 130112   ;;  %vm3430_vm5 = vcmask 195712  }
  0x20   : > { %5221 = vmatprep.subr.bf16.mxu0 %v5220_v3  ;;  %s7122_s16 = smov (!%p285_p0, %s4681_s16), 15  ;;  %5396 = vmatprep.subr.bf16.mxu1 %v5220_v3  ;;  %s5880_s30 = smov 64   ;;  %vm4441_vm6 = vcmask 261312  }
  0x21   : > { %5223 = vmatpush3.bf16.msra.mxu0 %v5220_v3  ;;  %5398 = vmatpush3.bf16.msra.mxu1 %v5220_v3  ;;  %s4682_s19 = sshll.u32 %s7122_s16, 3  ;;  %s4718_s12 = sld [smem:[#allocation3 + $0x1]] }
  0x22   : > { %5225 = vmatprep.subr.bf16.mxu0 %v5224_v5  ;;  %5397 = vmatprep.subr.bf16.mxu1 %v5224_v5  ;;  %s288_s22 = scalar_lea.vmem %s7109_s0, %s4682_s19  ;;  %s5881_s13 = smov 80  }
  0x23   : > { %v296_v6 = vld [vmem:[%s288_s22] sm:$0xff]  ;;  %v297_v7 = vld [vmem:[%s288_s22 + $0x8] sm:$0xff]  ;;  %v298_v9 = vld [vmem:[%s288_s22 + $0x10] sm:$0xff]  ;;  %s5882_s14 = smov 112   ;;  %s5883_s21 = smov 56  }
  0x24   : > { %4964 = vmatprep.mubr.msk.f32.mxu0 %vm315_vm0, %v296_v6  ;;  %v300_v8 = vld [vmem:[%s288_s22 + $0x20] sm:$0xff]  ;;  %v301_v10 = vld [vmem:[%s288_s22 + $0x28] sm:$0xff]  ;;  %v302_v11 = vld [vmem:[%s288_s22 + $0x30] sm:$0xff]  ;;  %s5884_s23 = smov 72   ;;  %s5885_s25 = smov 104  }
  0x25   : > { %5227 = vmatpush3.bf16.msra.mxu0 %v5224_v5  ;;  %5399 = vmatpush3.bf16.msra.mxu1 %v5224_v5  ;;  %v299_v12 = vld [vmem:[%s288_s22 + $0x18] sm:$0xff]  ;;  %s4768_s8 = sld [smem:[#allocation3 + $0x3]]  ;;  %s5889_s15 = smov 16  }
  0x26   : > { %4970 = vmatprep.mubr.msk.f32.mxu1 %vm315_vm0, %v300_v8  ;;  %v303_v13 = vld [vmem:[%s288_s22 + $0x38] sm:$0xff]  ;;  %s4743_s22 = sld [smem:[#allocation3 + $0x2]]  ;;  %s294_s9 = scalar_lea.vmem %s7116_s7, %s4682_s19 }
  0x28   : > { %4965 = vmatmul.mubr.msk.f32.vlgmr.msra.gmra.mrb[0].mxu0 %vm315_vm0, %v297_v7  ;;  %4971 = vmatmul.mubr.msk.f32.vlgmr.msra.gmra.mrb[0].mxu1 %vm315_vm0, %v301_v10 }
  0x29   : > { %4967 = vmatprep.mubr.msk.f32.mxu0 %vm315_vm0, %v298_v9  ;;  %4973 = vmatprep.mubr.msk.f32.mxu1 %vm315_vm0, %v302_v11 }
  0x2c   : > { %4968 = vmatmul.mubr.msk.f32.gmra.mrb[2].mxu0 %vm315_vm0, %v299_v12  ;;  %4974 = vmatmul.mubr.msk.f32.gmra.mrb[2].mxu1 %vm315_vm0, %v303_v13 }
  0xfb   : > { %v4966_v15 = vpop.f32.mrb[0].mxu0  ;;  %v4972_v17 = vpop.f32.mrb[0].mxu1 }
  0xfc   : > { %v406_v16 = vpop.f32.mrb[1].mxu0  ;;  %v426_v19 = vpop.f32.mrb[1].mxu1  ;;  %v5993_v20 = vadd.f32 %v4966_v15, %v4685_v14  ;;  %v6015_v31 = vadd.f32 %v4972_v17, %v4685_v14 }
  0xfd   : > { %v5991_v18 = vadd.f32 %v4685_v14, %v406_v16  ;;  %v6003_v26 = vadd.f32 %v4685_v14, %v426_v19 }
  0xfe   : > { %v6013_v30 = vmul.f32 %v5993_v20, %v5993_v20  ;;  %v6039_v36 = vmul.f32 %v6015_v31, %v6015_v31 }
  0xff   : > { %v4969_v21 = vpop.f32.mrb[2].mxu0  ;;  %v5997_v22 = vmul.f32 %v5991_v18, %v5991_v18  ;;  %v4975_v24 = vpop.f32.mrb[2].mxu1  ;;  %v6025_v33 = vmul.f32 %v6003_v26, %v6003_v26 }
 0x100   : > { %v416_v23 = vpop.f32.mrb[3].mxu0  ;;  %v436_v27 = vpop.f32.mrb[3].mxu1  ;;  %v6005_v28 = vadd.f32 %v4969_v21, %v4685_v14  ;;  %v6031_v35 = vadd.f32 %v4975_v24, %v4685_v14  ;;  %v465_v56 = vsel %vm461_vm1, %v6013_v30, 0.0  ;;  %v477_v60 = vsel %vm461_vm1, %v6039_v36, 0.0 }
 0x101   : > { %v5999_v25 = vadd.f32 %v4685_v14, %v416_v23  ;;  %518 = vrot.lane.b32.xlu0 %v5997_v22, %s5877_s26  ;;  %v6021_v32 = vadd.f32 %v4685_v14, %v436_v27  ;;  %v462_v55 = vsel %vm461_vm1, %v5997_v22, 0.0  ;;  %v474_v59 = vsel %vm461_vm1, %v6025_v33, 0.0 }
 0x102   : > { %v6029_v34 = vmul.f32 %v6005_v28, %v6005_v28  ;;  %v6051_v38 = vmul.f32 %v6031_v35, %v6031_v35 }
 0x103   : > { %v6009_v29 = vmul.f32 %v5999_v25, %v5999_v25  ;;  %v6043_v37 = vmul.f32 %v6021_v32, %v6021_v32 }
 0x104   : > { %v471_v58 = vsel %vm461_vm1, %v6029_v34, 0.0  ;;  %v483_v62 = vsel %vm461_vm1, %v6051_v38, 0.0 }
 0x105   : > { %522 = vrot.lane.b32.xlu1 %v6009_v29, %s5877_s26  ;;  %520 = vrot.lane.b32.xlu0 %v6013_v30, %s5877_s26  ;;  %v468_v57 = vsel %vm461_vm1, %v6009_v29, 0.0  ;;  %v480_v61 = vsel %vm461_vm1, %v6043_v37, 0.0 }
 0x109   : > { %524 = vrot.lane.b32.xlu1 %v6029_v34, %s5877_s26  ;;  %526 = vrot.lane.b32.xlu0 %v6025_v33, %s5877_s26 }
 0x10d   : > { %528 = vrot.lane.b32.xlu1 %v6039_v36, %s5877_s26  ;;  %530 = vrot.lane.b32.xlu0 %v6043_v37, %s5877_s26 }
 0x111   : > { %532 = vrot.lane.b32.xlu1 %v6051_v38, %s5877_s26 }
 0x173   : > { %v519_v39 = vpop.permute.xlu0 %518 }
 0x174   : > { %v542_v40 = vsel %vm461_vm1, %v519_v39, 0.0 }
 0x175   : > { %543 = vadd.xlane.f32.xlu0 %v542_v40 }
 0x177   : > { %v523_v41 = vpop.permute.xlu1 %522  ;;  %v521_v42 = vpop.permute.xlu0 %520 }
 0x178   : > { %v548_v43 = vsel %vm461_vm1, %v523_v41, 0.0  ;;  %v545_v44 = vsel %vm461_vm1, %v521_v42, 0.0 }
 0x179   : > { %549 = vadd.xlane.f32.xlu0 %v548_v43  ;;  %546 = vadd.xlane.f32.xlu1 %v545_v44 }
 0x17b   : > { %v525_v45 = vpop.permute.xlu1 %524  ;;  %v527_v46 = vpop.permute.xlu0 %526 }
 0x17c   : > { %v551_v47 = vsel %vm461_vm1, %v525_v45, 0.0  ;;  %v554_v48 = vsel %vm461_vm1, %v527_v46, 0.0 }
 0x17d   : > { %552 = vadd.xlane.f32.xlu0 %v551_v47  ;;  %555 = vadd.xlane.f32.xlu1 %v554_v48 }
 0x17f   : > { %v529_v49 = vpop.permute.xlu1 %528  ;;  %v531_v50 = vpop.permute.xlu0 %530 }
 0x180   : > { %v557_v51 = vsel %vm461_vm1, %v529_v49, 0.0  ;;  %v560_v52 = vsel %vm461_vm1, %v531_v50, 0.0 }
 0x181   : > { %558 = vadd.xlane.f32.xlu0 %v557_v51  ;;  %561 = vadd.xlane.f32.xlu1 %v560_v52 }
 0x183   : > { %v533_v53 = vpop.permute.xlu1 %532 }
 0x184   : > { %v563_v54 = vsel %vm461_vm1, %v533_v53, 0.0 }
 0x185   : > { %564 = vadd.xlane.f32.xlu0 %v563_v54  ;;  %463 = vadd.xlane.f32.xlu1 %v462_v55  ;;  %v6087_v54 = vstv %s590_s27  ;;  %s5890_s27 = smov 24  }
 0x189   : > { %466 = vadd.xlane.f32.xlu0 %v465_v56  ;;  %469 = vadd.xlane.f32.xlu1 %v468_v57 }
 0x18d   : > { %472 = vadd.xlane.f32.xlu0 %v471_v58  ;;  %475 = vadd.xlane.f32.xlu1 %v474_v59 }
 0x191   : > { %478 = vadd.xlane.f32.xlu0 %v477_v60  ;;  %481 = vadd.xlane.f32.xlu1 %v480_v61 }
 0x195   : > { %484 = vadd.xlane.f32.xlu0 %v483_v62 }
 0x202   : > { %v544_v63 = vpop.xlane.xlu0 %543 }
 0x203   : > { %v566_v0 = vmax.f32 %v544_v63, 1e-24 }
 0x205   : > { %5593 = vrsqrt.f32 %v566_v0 }
 0x206   : > { %v547_v1 = vpop.xlane.xlu1 %546  ;;  %v550_v2 = vpop.xlane.xlu0 %549 }
 0x207   : > { %v567_v3 = vmax.f32 %v547_v1, 1e-24  ;;  %v568_v4 = vmax.f32 %v550_v2, 1e-24 }
 0x209   : > { %5595 = vrsqrt.f32 %v567_v3 }
 0x20a   : > { %v556_v5 = vpop.xlane.xlu1 %555  ;;  %v553_v6 = vpop.xlane.xlu0 %552  ;;  %5597 = vrsqrt.f32 %v568_v4 }
 0x20b   : > { %v569_v7 = vmax.f32 %v553_v6, 1e-24  ;;  %v570_v8 = vmax.f32 %v556_v5, 1e-24 }
 0x20d   : > { %5599 = vrsqrt.f32 %v569_v7 }
 0x20e   : > { %v562_v9 = vpop.xlane.xlu1 %561  ;;  %v559_v10 = vpop.xlane.xlu0 %558  ;;  %5601 = vrsqrt.f32 %v570_v8 }
 0x20f   : > { %v572_v11 = vmax.f32 %v562_v9, 1e-24  ;;  %v571_v12 = vmax.f32 %v559_v10, 1e-24  ;;  %v5594_v13 = vpop.eup %5593 }
 0x210   : > { %v582_v21 = vmul.f32 %v5594_v13, %v5991_v18 }
 0x211   : > { %5603 = vrsqrt.f32 %v571_v12  ;;  %v452_v12 = vld [vmem:[%s7113_s4 + $0x38] sm:$0xff] }
 0x212   : > { %v565_v14 = vpop.xlane.xlu0 %564  ;;  %v464_v15 = vpop.xlane.xlu1 %463  ;;  %5605 = vrsqrt.f32 %v572_v11 }
 0x213   : > { %v5596_v16 = vpop.eup %5595  ;;  %v573_v17 = vmax.f32 %v565_v14, 1e-24  ;;  %v486_v19 = vmax.f32 %v464_v15, 1e-24 }
 0x214   : > { %v583_v23 = vmul.f32 %v5596_v16, %v5993_v20  ;;  %v5598_v24 = vpop.eup %5597 }
 0x215   : > { %5607 = vrsqrt.f32 %v573_v17  ;;  %v584_v41 = vmul.f32 %v5598_v24, %v5999_v25 }
 0x216   : > { %5609 = vrsqrt.f32 %v486_v19  ;;  %v470_v27 = vpop.xlane.xlu1 %469  ;;  %v5433_v39 = vpack.i.bf16 %v583_v23, %v582_v21  ;;  %v467_v63 = vpop.xlane.xlu0 %466 }
 0x217   : > { %v5600_v40 = vpop.eup %5599  ;;  %v487_v1 = vmax.f32 %v467_v63, 1e-24  ;;  %v488_v2 = vmax.f32 %v470_v27, 1e-24 }
 0x218   : > { %5434 = vrot.lane.b32.xlu1 %v5433_v39, %s5877_s26  ;;  %v585_v42 = vmul.f32 %v5600_v40, %v6005_v28  ;;  %v5602_v43 = vpop.eup %5601 }
 0x219   : > { %v586_v49 = vmul.f32 %v5602_v43, %v6003_v26 }
 0x21a   : > { %v476_v44 = vpop.xlane.xlu1 %475  ;;  %v5438_v46 = vpack.i.bf16 %v585_v42, %v584_v41  ;;  %v473_v0 = vpop.xlane.xlu0 %472 }
 0x21b   : > { %v490_v45 = vmax.f32 %v476_v44, 1e-24  ;;  %v5604_v47 = vpop.eup %5603  ;;  %v489_v5 = vmax.f32 %v473_v0, 1e-24 }
 0x21c   : > { %v5606_v48 = vpop.eup %5605  ;;  %5439 = vrot.lane.b32.xlu0 %v5438_v46, %s5877_s26  ;;  %v587_v50 = vmul.f32 %v5604_v47, %v6015_v31 }
 0x21d   : > { %5611 = vrsqrt.f32 %v490_v45  ;;  %v588_v55 = vmul.f32 %v5606_v48, %v6021_v32 }
 0x21e   : > { %v5443_v52 = vpack.i.bf16 %v587_v50, %v586_v49  ;;  %5613 = vrsqrt.f32 %v487_v1  ;;  %v479_v3 = vpop.xlane.xlu0 %478  ;;  %v482_v4 = vpop.xlane.xlu1 %481 }
 0x21f   : > { %v5608_v51 = vpop.eup %5607  ;;  %5615 = vrsqrt.f32 %v488_v2  ;;  %v492_v6 = vmax.f32 %v482_v4, 1e-24  ;;  %v491_v7 = vmax.f32 %v479_v3, 1e-24 }
 0x220   : > { %v5610_v53 = vpop.eup %5609  ;;  %v589_v56 = vmul.f32 %v5608_v51, %v6031_v35  ;;  %1489 = vrot.lane.b32.xlu0 %v5997_v22, %s5878_s28  ;;  %5444 = vrot.lane.b32.xlu1 %v5443_v52, %s5877_s26  ;;  %5617 = vrsqrt.f32 %v489_v5 }
 0x221   : > { %v502_v57 = vmul.f32 %v5610_v53, %v5991_v18  ;;  %5619 = vrsqrt.f32 %v492_v6 }
 0x222   : > { %v5448_v58 = vpack.i.bf16 %v589_v56, %v588_v55  ;;  %v485_v9 = vpop.xlane.xlu0 %484  ;;  %5621 = vrsqrt.f32 %v491_v7 }
 0x223   : > { %v592_v59 = vmul.f32 %v6087_v54, %v502_v57  ;;  %v493_v17 = vmax.f32 %v485_v9, 1e-24 }
 0x224   : > { %1493 = vrot.lane.b32.xlu0 %v6009_v29, %s5878_s28  ;;  %5449 = vrot.lane.b32.xlu1 %v5448_v58, %s5877_s26 }
 0x225   : > { %4980 = vmatprep.mubr.msk.f32.mxu1 %vm461_vm1, %v592_v59  ;;  %5623 = vrsqrt.f32 %v493_v17 }
 0x227   : > { %v5612_v60 = vpop.eup %5611 }
 0x228   : > { %1417 = vrot.lane.b32.xlu0 %v5997_v22, %s5879_s29  ;;  %1491 = vrot.lane.b32.xlu1 %v6013_v30, %s5878_s28  ;;  %v506_v61 = vmul.f32 %v5612_v60, %v6003_v26  ;;  %v5614_v14 = vpop.eup %5613 }
 0x229   : > { %v5616_v16 = vpop.eup %5615  ;;  %v503_v23 = vmul.f32 %v5614_v14, %v5993_v20 }
 0x22a   : > { %v596_v62 = vmul.f32 %v6087_v54, %v506_v61  ;;  %v504_v40 = vmul.f32 %v5616_v16, %v5999_v25  ;;  %v5618_v45 = vpop.eup %5617 }
 0x22b   : > { %v593_v44 = vmul.f32 %v6087_v54, %v503_v23  ;;  %v5620_v47 = vpop.eup %5619  ;;  %v505_v56 = vmul.f32 %v5618_v45, %v6005_v28 }
 0x22c   : > { %1497 = vrot.lane.b32.xlu0 %v6025_v33, %s5878_s28  ;;  %1495 = vrot.lane.b32.xlu1 %v6029_v34, %s5878_s28  ;;  %v594_v50 = vmul.f32 %v6087_v54, %v504_v40  ;;  %v5622_v51 = vpop.eup %5621  ;;  %v508_v58 = vmul.f32 %v5620_v47, %v6021_v32  ;;  %v6194_v47 = vpack.i.bf16 %v6015_v31, %v6003_v26 }
 0x22d   : > { %4994 = vmatprep.mubr.msk.f32.mxu0 %vm461_vm1, %v596_v62  ;;  %v507_v59 = vmul.f32 %v5622_v51, %v6015_v31  ;;  %v595_v0 = vmul.f32 %v6087_v54, %v505_v56 }
 0x22e   : > { %v598_v2 = vmul.f32 %v6087_v54, %v508_v58 }
 0x22f   : > { %v5624_v1 = vpop.eup %5623  ;;  %v597_v3 = vmul.f32 %v6087_v54, %v507_v59 }
 0x230   : > { %1421 = vrot.lane.b32.xlu0 %v6009_v29, %s5879_s29  ;;  %1419 = vrot.lane.b32.xlu1 %v6013_v30, %s5879_s29 }
 0x234   : > { %1501 = vrot.lane.b32.xlu0 %v6043_v37, %s5878_s28  ;;  %1499 = vrot.lane.b32.xlu1 %v6039_v36, %s5878_s28 }
 0x238   : > { %1425 = vrot.lane.b32.xlu0 %v6025_v33, %s5879_s29  ;;  %1423 = vrot.lane.b32.xlu1 %v6029_v34, %s5879_s29 }
 0x23c   : > { %1429 = vrot.lane.b32.xlu0 %v6043_v37, %s5879_s29  ;;  %1503 = vrot.lane.b32.xlu1 %v6051_v38, %s5878_s28 }
 0x240   : > { %1427 = vrot.lane.b32.xlu1 %v6039_v36, %s5879_s29 }
 0x244   : > { %1431 = vrot.lane.b32.xlu1 %v6051_v38, %s5879_s29 }
 0x28a   : > { %v5435_v8 = vpop.permute.xlu1 %5434 }
 0x28b   : > { %v5437_v10 = vunpack.i.h.bf16 %v5435_v8  ;;  %v5436_v11 = vunpack.i.l.bf16 %v5435_v8  ;;  %v509_v8 = vmul.f32 %v5624_v1, %v6031_v35 }
 0x28d   : > { %v5228_v13 = vpack.c.bf16 %v5437_v10, %v5436_v11  ;;  %v599_v14 = vmul.f32 %v6087_v54, %v509_v8 }
 0x28e   : > { %v5440_v15 = vpop.permute.xlu0 %5439 }
 0x28f   : > { %5230 = vmatprep.subr.msk.bf16.mxu1 %vm6133_vm2, %v5228_v13  ;;  %v5442_v19 = vunpack.i.h.bf16 %v5440_v15  ;;  %v5441_v21 = vunpack.i.l.bf16 %v5440_v15 }
 0x290   : > { %5233 = vmatpush3.bf16.xpose.msk.msra.mxu1 %vm6133_vm2, %v5228_v13 }
 0x291   : > { %v5234_v24 = vpack.c.bf16 %v5442_v19, %v5441_v21 }
 0x292   : > { %v1490_v27 = vpop.permute.xlu0 %1489  ;;  %v5445_v39 = vpop.permute.xlu1 %5444 }
 0x293   : > { %v5447_v41 = vunpack.i.h.bf16 %v5445_v39  ;;  %v5446_v42 = vunpack.i.l.bf16 %v5445_v39  ;;  %5236 = vmatprep.subr.msk.bf16.mxu1 %vm6133_vm2, %v5234_v24  ;;  %v1513_v43 = vsel %vm461_vm1, %v1490_v27, 0.0 }
 0x294   : > { %1514 = vadd.xlane.f32.xlu1 %v1513_v43 }
 0x295   : > { %v5240_v46 = vpack.c.bf16 %v5447_v41, %v5446_v42 }
 0x296   : > { %v1494_v48 = vpop.permute.xlu0 %1493  ;;  %v5450_v49 = vpop.permute.xlu1 %5449 }
 0x297   : > { %4981 = vmatmul.mubr.msk.f32.vlgmr.msra.gmra.mrb[4].mxu1 %vm461_vm1, %v593_v44  ;;  %v5452_v52 = vunpack.i.h.bf16 %v5450_v49  ;;  %v5451_v53 = vunpack.i.l.bf16 %v5450_v49  ;;  %5242 = vmatprep.subr.msk.bf16.mxu0 %vm6133_vm2, %v5240_v46  ;;  %v1519_v55 = vsel %vm461_vm1, %v1494_v48, 0.0  ;;  %v6199_v48 = vpack.i.bf16 %v6031_v35, %v6021_v32 }
 0x298   : > { %5239 = vmatpush3.bf16.xpose.msk.msra.mxu1 %vm6133_vm2, %v5234_v24  ;;  %1520 = vadd.xlane.f32.xlu1 %v1519_v55  ;;  %v6204_v49 = vpack.i.bf16 %v6005_v28, %v5999_v25 }
 0x299   : > { %4987 = vmatprep.mubr.msk.f32.mxu1 %vm461_vm1, %v594_v50  ;;  %v5246_v57 = vpack.c.bf16 %v5452_v52, %v5451_v53  ;;  %5245 = vmatpush3.bf16.xpose.msk.msra.mxu0 %vm6133_vm2, %v5240_v46  ;;  %v6189_v46 = vpack.i.bf16 %v5993_v20, %v5991_v18 }
 0x29a   : > { %v1418_v60 = vpop.permute.xlu0 %1417  ;;  %v1492_v61 = vpop.permute.xlu1 %1491 }
 0x29b   : > { %5248 = vmatprep.subr.msk.bf16.mxu1 %vm6133_vm2, %v5246_v57  ;;  %v1441_v62 = vsel %vm461_vm1, %v1418_v60, 0.0  ;;  %v1516_v63 = vsel %vm461_vm1, %v1492_v61, 0.0 }
 0x29c   : > { %1442 = vadd.xlane.f32.xlu1 %v1441_v62  ;;  %1517 = vadd.xlane.f32.xlu0 %v1516_v63 }
 0x29e   : > { %v1498_v4 = vpop.permute.xlu0 %1497  ;;  %v1496_v5 = vpop.permute.xlu1 %1495 }
 0x29f   : > { %4988 = vmatmul.mubr.msk.f32.vlgmr.msra.gmra.mrb[6].mxu1 %vm461_vm1, %v595_v0  ;;  %v1525_v6 = vsel %vm461_vm1, %v1498_v4, 0.0  ;;  %v1522_v7 = vsel %vm461_vm1, %v1496_v5, 0.0 }
 0x2a0   : > { %5251 = vmatpush3.bf16.xpose.msk.msra.mxu1 %vm6133_vm2, %v5246_v57  ;;  %5001 = vmatprep.mubr.msk.f32.mxu1 %vm461_vm1, %v598_v2 }
 0x2a1   : > { %4995 = vmatmul.mubr.msk.f32.vlgmr.msra.gmra.mrb[4].mxu0 %vm461_vm1, %v597_v3  ;;  %1526 = vadd.xlane.f32.xlu1 %v1525_v6 }
 0x2a2   : > { %1523 = vadd.xlane.f32.xlu0 %v1522_v7  ;;  %v1422_v9 = vpop.permute.xlu0 %1421  ;;  %v1420_v10 = vpop.permute.xlu1 %1419 }
 0x2a3   : > { %v1447_v11 = vsel %vm461_vm1, %v1422_v9, 0.0  ;;  %v1444_v13 = vsel %vm461_vm1, %v1420_v10, 0.0 }
 0x2a5   : > { %1448 = vadd.xlane.f32.xlu1 %v1447_v11 }
 0x2a6   : > { %1445 = vadd.xlane.f32.xlu0 %v1444_v13  ;;  %v1502_v15 = vpop.permute.xlu0 %1501  ;;  %v1500_v16 = vpop.permute.xlu1 %1499 }
 0x2a7   : > { %5002 = vmatmul.mubr.msk.f32.vlgmr.msra.gmra.mrb[8].mxu1 %vm461_vm1, %v599_v14  ;;  %v1531_v17 = vsel %vm461_vm1, %v1502_v15, 0.0  ;;  %v1528_v19 = vsel %vm461_vm1, %v1500_v16, 0.0 }
 0x2a9   : > { %1532 = vadd.xlane.f32.xlu1 %v1531_v17 }
 0x2aa   : > { %1529 = vadd.xlane.f32.xlu0 %v1528_v19  ;;  %v1426_v21 = vpop.permute.xlu0 %1425  ;;  %v1424_v23 = vpop.permute.xlu1 %1423 }
 0x2ab   : > { %v1453_v24 = vsel %vm461_vm1, %v1426_v21, 0.0  ;;  %v1450_v27 = vsel %vm461_vm1, %v1424_v23, 0.0  ;;  %v446_v23 = vld [vmem:[%s7113_s4 + $0x8] sm:$0xff] }
 0x2ad   : > { %1454 = vadd.xlane.f32.xlu1 %v1453_v24 }
 0x2ae   : > { %1451 = vadd.xlane.f32.xlu0 %v1450_v27  ;;  %v1430_v54 = vpop.permute.xlu0 %1429  ;;  %v1504_v39 = vpop.permute.xlu1 %1503 }
 0x2af   : > { %v1459_v40 = vsel %vm461_vm1, %v1430_v54, 0.0  ;;  %v1534_v41 = vsel %vm461_vm1, %v1504_v39, 0.0 }
 0x2b1   : > { %1460 = vadd.xlane.f32.xlu1 %v1459_v40 }
 0x2b2   : > { %1535 = vadd.xlane.f32.xlu0 %v1534_v41  ;;  %v1428_v42 = vpop.permute.xlu1 %1427 }
 0x2b3   : > { %v1456_v43 = vsel %vm461_vm1, %v1428_v42, 0.0 }
 0x2b6   : > { %1457 = vadd.xlane.f32.xlu0 %v1456_v43  ;;  %v1432_v44 = vpop.permute.xlu1 %1431  ;;  %v445_v43 = vld [vmem:[%s7113_s4] sm:$0xff] }
 0x2b7   : > { %v1462_v45 = vsel %vm461_vm1, %v1432_v44, 0.0 }
 0x2ba   : > { %1463 = vadd.xlane.f32.xlu0 %v1462_v45 }
 0x2c2   : > { %5454 = vrot.lane.b32.xlu1 %v6189_v46, %s5880_s30 }
 0x2c6   : > { %5464 = vrot.lane.b32.xlu1 %v6194_v47, %s5880_s30 }
 0x2ca   : > { %5469 = vrot.lane.b32.xlu1 %v6199_v48, %s5880_s30 }
 0x2d0   : > { %5459 = vrot.lane.b32.xlu0 %v6204_v49, %s5880_s30  ;;  %s5886_s30 = smov 48  }
 0x321   : > { %v6207_v50 = vpop.xlane.xlu1 %1514 }
 0x325   : > { %v1521_v51 = vpop.xlane.xlu1 %1520 }
 0x326   : > { %v1539_v45 = vmax.f32 %v1521_v51, 1e-24 }
 0x329   : > { %v6209_v52 = vpop.xlane.xlu0 %1517  ;;  %v6211_v53 = vpop.xlane.xlu1 %1442 }
 0x32e   : > { %v6213_v55 = vpop.xlane.xlu1 %1526 }
 0x32f   : > { %v1524_v56 = vpop.xlane.xlu0 %1523 }
 0x330   : > { %v1540_v41 = vmax.f32 %v1524_v56, 1e-24 }
 0x332   : > { %v6215_v57 = vpop.xlane.xlu1 %1448  ;;  %5625 = vrsqrt.f32 %v1540_v41 }
 0x333   : > { %v6217_v58 = vpop.xlane.xlu0 %1445  ;;  %5627 = vrsqrt.f32 %v1539_v45 }
 0x336   : > { %v6219_v59 = vpop.xlane.xlu1 %1532 }
 0x337   : > { %v6221_v60 = vpop.xlane.xlu0 %1529 }
 0x33a   : > { %v6223_v61 = vpop.xlane.xlu1 %1454 }
 0x33b   : > { %v6225_v62 = vpop.xlane.xlu0 %1451 }
 0x33e   : > { %v6227_v63 = vpop.xlane.xlu1 %1460 }
 0x33f   : > { %v6229_v0 = vpop.xlane.xlu0 %1535 }
 0x342   : > { %v5455_v1 = vpop.permute.xlu1 %5454 }
 0x343   : > { %v6231_v2 = vpop.xlane.xlu0 %1457  ;;  %v5457_v3 = vunpack.i.h.bf16 %v5455_v1  ;;  %v5456_v4 = vunpack.i.l.bf16 %v5455_v1 }
 0x345   : > { %v5252_v5 = vpack.c.bf16 %v5457_v3, %v5456_v4 }
 0x346   : > { %v5465_v6 = vpop.permute.xlu1 %5464 }
 0x347   : > { %v6233_v7 = vpop.xlane.xlu0 %1463  ;;  %v5467_v8 = vunpack.i.h.bf16 %v5465_v6  ;;  %v5466_v9 = vunpack.i.l.bf16 %v5465_v6  ;;  %5253 = vmatprep.subr.bf16.mxu0 %v5252_v5 }
 0x348   : > { %5255 = vmatpush3.bf16.msra.mxu0 %v5252_v5 }
 0x349   : > { %v6235_v10 = vpack.c.bf16 %v5467_v8, %v5466_v9 }
 0x34a   : > { %v5470_v11 = vpop.permute.xlu1 %5469 }
 0x34b   : > { %v5460_v13 = vpop.permute.xlu0 %5459  ;;  %5261 = vmatprep.subr.bf16.mxu0 %v6235_v10  ;;  %v5472_v16 = vunpack.i.h.bf16 %v5470_v11  ;;  %v5471_v17 = vunpack.i.l.bf16 %v5470_v11 }
 0x34c   : > { %v5462_v14 = vunpack.i.h.bf16 %v5460_v13  ;;  %v5461_v15 = vunpack.i.l.bf16 %v5460_v13 }
 0x34d   : > { %v6238_v21 = vpack.c.bf16 %v5472_v16, %v5471_v17 }
 0x34e   : > { %v5256_v19 = vpack.c.bf16 %v5462_v14, %v5461_v15  ;;  %v5626_v15 = vpop.eup %5625 }
 0x34f   : > { %v5628_v16 = vpop.eup %5627 }
 0x350   : > { %5257 = vmatprep.subr.bf16.mxu1 %v5256_v19 }
 0x351   : > { %5259 = vmatpush3.bf16.msra.mxu1 %v5256_v19 }
 0x352   : > { %5265 = vmatprep.subr.bf16.mxu1 %v6238_v21 }
 0x36a   : > { %v4982_v24 = vpop.f32.mrb[4].mxu1 }
 0x36b   : > { %v688_v27 = vadd.f32 %v4982_v24, %v446_v23  ;;  %v682_v54 = vpop.f32.mrb[5].mxu1  ;;  %v1556_v24 = vmul.f32 %v5626_v15, %v6005_v28 }
 0x36c   : > { %v683_v5 = vadd.f32 %v682_v54, %v445_v43  ;;  %v1555_v54 = vmul.f32 %v5628_v16, %v5999_v25 }
 0x36d   : > { %v968_v39 = vsel %vm964_vm3, %v688_v27, -inf }
 0x36e   : > { %969 = vmax.xlane.f32.xlu1 %v968_v39  ;;  %v965_v11 = vsel %vm964_vm3, %v683_v5, -inf  ;;  %v1538_v39 = vmax.f32 %v6209_v52, 1e-24  ;;  %v5478_v41 = vpack.i.bf16 %v1556_v24, %v1555_v54 }
 0x370   : > { %5629 = vrsqrt.f32 %v1538_v39 }
 0x372   : > { %v4989_v40 = vpop.f32.mrb[6].mxu1 }
 0x373   : > { %v773_v42 = vpop.f32.mrb[7].mxu1  ;;  %v779_v9 = vadd.f32 %v4989_v40, %v446_v23 }
 0x374   : > { %v4996_v44 = vpop.f32.mrb[4].mxu0  ;;  %v6251_v14 = vadd.f32 %v773_v42, %v445_v43  ;;  %v1537_v42 = vmax.f32 %v6207_v50, 1e-24 }
 0x375   : > { %v870_v1 = vadd.f32 %v4996_v44, %v446_v23  ;;  %v864_v3 = vpop.f32.mrb[5].mxu0  ;;  %v974_v51 = vsel %vm964_vm3, %v779_v9, -inf }
 0x376   : > { %v865_v4 = vadd.f32 %v864_v3, %v445_v43  ;;  %v971_v19 = vsel %vm964_vm3, %v6251_v14, -inf  ;;  %5631 = vrsqrt.f32 %v1537_v42 }
 0x377   : > { %v980_v6 = vsel %vm964_vm3, %v870_v1, -inf }
 0x378   : > { %981 = vmax.xlane.f32.xlu0 %v980_v6  ;;  %v977_v8 = vsel %vm964_vm3, %v865_v4, -inf }
 0x379   : > { %978 = vmax.xlane.f32.xlu1 %v977_v8 }
 0x37a   : > { %v5003_v56 = vpop.f32.mrb[8].mxu1 }
 0x37b   : > { %v955_v13 = vpop.f32.mrb[9].mxu1  ;;  %v6254_v17 = vadd.f32 %v5003_v56, %v446_v23  ;;  %v5630_v23 = vpop.eup %5629 }
 0x37c   : > { %966 = vmax.xlane.f32.xlu0 %v965_v11  ;;  %v1554_v45 = vmul.f32 %v5630_v23, %v5993_v20  ;;  %v6268_v52 = vadd.f32 %v955_v13, %v445_v43 }
 0x37d   : > { %v986_v40 = vsel %vm964_vm3, %v6254_v17, -inf }
 0x37e   : > { %v983_v8 = vsel %vm964_vm3, %v6268_v52, -inf }
 0x380   : > { %975 = vmax.xlane.f32.xlu0 %v974_v51  ;;  %v5632_v44 = vpop.eup %5631 }
 0x381   : > { %v1553_v3 = vmul.f32 %v5632_v44, %v5991_v18 }
 0x383   : > { %v5473_v6 = vpack.i.bf16 %v1554_v45, %v1553_v3 }
 0x384   : > { %972 = vmax.xlane.f32.xlu0 %v971_v19 }
 0x388   : > { %987 = vmax.xlane.f32.xlu0 %v986_v40 }
 0x38a   : > { %5479 = vrot.lane.b32.xlu1 %v5478_v41, %s5878_s28 }
 0x39e   : > { %5474 = vrot.lane.b32.xlu0 %v5473_v6, %s5878_s28 }
 0x3ae   : > { %984 = vmax.xlane.f32.xlu1 %v983_v8  ;;  %v1465_v8 = vmax.f32 %v6211_v53, 1e-24 }
 0x3fb   : > { %v970_v50 = vpop.xlane.xlu1 %969 }
 0x3fc   : > { %v990_v56 = vsub.f32 %v688_v27, %v970_v50 }
 0x3fe   : > { %v999_v11 = vmul.f32 1.442695, %v990_v56 }
 0x400   : > { %5633 = vpow2.f32 %v999_v11 }
 0x405   : > { %v982_v51 = vpop.xlane.xlu0 %981 }
 0x406   : > { %v994_v15 = vsub.f32 %v870_v1, %v982_v51  ;;  %v979_v16 = vpop.xlane.xlu1 %978 }
 0x407   : > { %v993_v24 = vsub.f32 %v865_v4, %v979_v16 }
 0x408   : > { %v1007_v19 = vmul.f32 1.442695, %v994_v15 }
 0x409   : > { %v967_v54 = vpop.xlane.xlu0 %966  ;;  %v1005_v13 = vmul.f32 1.442695, %v993_v24 }
 0x40a   : > { %v6272_v39 = vpop.eup %5633  ;;  %5635 = vpow2.f32 %v1007_v19  ;;  %v989_v40 = vsub.f32 %v683_v5, %v967_v54  ;;  %v1542_v5 = vmax.f32 %v6221_v60, 1e-24  ;;  %v6299_v19 = vstv %s4718_s12 }
 0x40b   : > { %v1016_v43 = vsel %vm964_vm3, %v6272_v39, 0.0 }
 0x40c   : > { %v997_v41 = vmul.f32 1.442695, %v989_v40  ;;  %1017 = vadd.xlane.f32.xlu0 %v1016_v43 }
 0x40d   : > { %v976_v42 = vpop.xlane.xlu0 %975 }
 0x40e   : > { %5637 = vpow2.f32 %v997_v41  ;;  %v992_v27 = vsub.f32 %v779_v9, %v976_v42  ;;  %v1541_v9 = vmax.f32 %v6213_v55, 1e-24 }
 0x40f   : > { %5639 = vpow2.f32 %v1005_v13 }
 0x410   : > { %v1003_v23 = vmul.f32 1.442695, %v992_v27  ;;  %v1467_v27 = vmax.f32 %v6215_v57, 1e-24  ;;  %v1543_v57 = vmax.f32 %v6219_v59, 1e-24 }
 0x411   : > { %v973_v54 = vpop.xlane.xlu0 %972 }
 0x412   : > { %5641 = vpow2.f32 %v1003_v23  ;;  %v991_v43 = vsub.f32 %v6251_v14, %v973_v54 }
 0x413   : > { %5643 = vrsqrt.f32 %v1542_v5  ;;  %v1466_v5 = vmax.f32 %v6217_v58, 1e-24  ;;  %v1471_v58 = vmax.f32 %v6227_v63, 1e-24 }
 0x414   : > { %v6276_v1 = vpop.eup %5635  ;;  %5645 = vrsqrt.f32 %v1541_v9  ;;  %v1001_v41 = vmul.f32 1.442695, %v991_v43  ;;  %v1469_v9 = vmax.f32 %v6223_v61, 1e-24 }
 0x415   : > { %v1028_v4 = vsel %vm964_vm3, %v6276_v1, 0.0  ;;  %5647 = vrsqrt.f32 %v1465_v8  ;;  %v988_v40 = vpop.xlane.xlu0 %987 }
 0x416   : > { %1029 = vadd.xlane.f32.xlu0 %v1028_v4  ;;  %v996_v13 = vsub.f32 %v6254_v17, %v988_v40  ;;  %5649 = vpow2.f32 %v1001_v41  ;;  %v1544_v17 = vmax.f32 %v6229_v0, 1e-24 }
 0x418   : > { %v6280_v44 = vpop.eup %5637  ;;  %v1011_v42 = vmul.f32 1.442695, %v996_v13 }
 0x419   : > { %v1013_v45 = vsel %vm964_vm3, %v6280_v44, 0.0  ;;  %v6285_v3 = vpop.eup %5639 }
 0x41a   : > { %1014 = vadd.xlane.f32.xlu1 %v1013_v45  ;;  %v1025_v50 = vsel %vm964_vm3, %v6285_v3, 0.0  ;;  %5651 = vpow2.f32 %v1011_v42 }
 0x41b   : > { %5653 = vrsqrt.f32 %v1467_v27  ;;  %v1468_v27 = vmax.f32 %v6225_v62, 1e-24 }
 0x41c   : > { %v6288_v6 = vpop.eup %5641  ;;  %5655 = vrsqrt.f32 %v1466_v5  ;;  %v1470_v5 = vmax.f32 %v6231_v2, 1e-24 }
 0x41d   : > { %v1022_v56 = vsel %vm964_vm3, %v6288_v6, 0.0  ;;  %v5644_v60 = vpop.eup %5643  ;;  %5657 = vrsqrt.f32 %v1544_v17 }
 0x41e   : > { %1026 = vadd.xlane.f32.xlu1 %v1025_v50  ;;  %1023 = vadd.xlane.f32.xlu0 %v1022_v56  ;;  %v5646_v11 = vpop.eup %5645  ;;  %v1558_v55 = vmul.f32 %v5644_v60, %v6015_v31  ;;  %5659 = vrsqrt.f32 %v1543_v57 }
 0x41f   : > { %v5648_v51 = vpop.eup %5647  ;;  %v1557_v15 = vmul.f32 %v5646_v11, %v6003_v26  ;;  %5661 = vrsqrt.f32 %v1469_v9 }
 0x420   : > { %v1481_v53 = vmul.f32 %v5648_v51, %v5991_v18  ;;  %v6306_v23 = vpop.eup %5649  ;;  %5663 = vrsqrt.f32 %v1471_v58 }
 0x421   : > { %v5483_v16 = vpack.i.bf16 %v1558_v55, %v1557_v15  ;;  %v1019_v45 = vsel %vm964_vm3, %v6306_v23, 0.0  ;;  %v6327_v15 = vpop.permute.xlu1 %5479 }
 0x422   : > { %v1563_v24 = vmul.f32 %v6299_v19, %v1481_v53 }
 0x424   : > { %v6308_v4 = vpop.eup %5651 }
 0x425   : > { %v1034_v14 = vsel %vm964_vm3, %v6308_v4, 0.0  ;;  %v5654_v8 = vpop.eup %5653 }
 0x426   : > { %v1483_v50 = vmul.f32 %v5654_v8, %v5999_v25  ;;  %v5656_v56 = vpop.eup %5655 }
 0x427   : > { %v1482_v11 = vmul.f32 %v5656_v56, %v5993_v20  ;;  %v5658_v55 = vpop.eup %5657  ;;  %v5475_v56 = vpop.permute.xlu0 %5474 }
 0x428   : > { %v1565_v60 = vmul.f32 %v6299_v19, %v1483_v50  ;;  %v5660_v59 = vpop.eup %5659  ;;  %v1560_v0 = vmul.f32 %v5658_v55, %v6031_v35 }
 0x429   : > { %v1564_v61 = vmul.f32 %v6299_v19, %v1482_v11  ;;  %v5662_v51 = vpop.eup %5661  ;;  %v1559_v63 = vmul.f32 %v5660_v59, %v6021_v32 }
 0x42a   : > { %v1485_v53 = vmul.f32 %v5662_v51, %v6003_v26  ;;  %v5476_v51 = vunpack.i.l.bf16 %v5475_v56 }
 0x42c   : > { %v1567_v40 = vmul.f32 %v6299_v19, %v1485_v53 }
 0x42f   : > { %5484 = vrot.lane.b32.xlu1 %v5483_v16, %s5878_s28  ;;  %v5488_v16 = vpack.i.bf16 %v1560_v0, %v1559_v63  ;;  %v5477_v0 = vunpack.i.h.bf16 %v5475_v56 }
 0x434   : > { %1573 = vrot.lane.b32.xlu0 %v1563_v24, %s5879_s29  ;;  %v5664_v24 = vpop.eup %5663 }
 0x435   : > { %v1487_v43 = vmul.f32 %v5664_v24, %v6021_v32 }
 0x437   : > { %v1569_v41 = vmul.f32 %v6299_v19, %v1487_v43 }
 0x43b   : > { %v985_v54 = vpop.xlane.xlu1 %984 }
 0x43c   : > { %v995_v13 = vsub.f32 %v6268_v52, %v985_v54 }
 0x43e   : > { %v1009_v42 = vmul.f32 1.442695, %v995_v13 }
 0x440   : > { %5665 = vpow2.f32 %v1009_v42 }
 0x441   : > { %5667 = vrsqrt.f32 %v1468_v27 }
 0x442   : > { %5669 = vrsqrt.f32 %v1470_v5 }
 0x44a   : > { %v6344_v52 = vpop.eup %5665 }
 0x44b   : > { %v5668_v62 = vpop.eup %5667 }
 0x44c   : > { %v1484_v2 = vmul.f32 %v5668_v62, %v6005_v28  ;;  %v5670_v17 = vpop.eup %5669  ;;  %v5482_v62 = vunpack.i.h.bf16 %v6327_v15 }
 0x44d   : > { %v1486_v9 = vmul.f32 %v5670_v17, %v6015_v31 }
 0x44e   : > { %v1566_v57 = vmul.f32 %v6299_v19, %v1484_v2  ;;  %v5481_v2 = vunpack.i.l.bf16 %v6327_v15 }
 0x453   : > { %1020 = vadd.xlane.f32.xlu1 %v1019_v45  ;;  %1035 = vadd.xlane.f32.xlu0 %v1034_v14  ;;  %v1031_v45 = vsel %vm964_vm3, %v6344_v52, 0.0  ;;  %v1472_v14 = vmax.f32 %v6233_v7, 1e-24  ;;  %v1568_v7 = vmul.f32 %v6299_v19, %v1486_v9 }
 0x455   : > { %5671 = vrsqrt.f32 %v1472_v14 }
 0x45f   : > { %v5672_v8 = vpop.eup %5671 }
 0x460   : > { %v1488_v58 = vmul.f32 %v5672_v8, %v6031_v35  ;;  %v5274_v8 = vpack.c.bf16 %v5482_v62, %v5481_v2 }
 0x462   : > { %v1570_v50 = vmul.f32 %v6299_v19, %v1488_v58 }
 0x464   : > { %1668 = vrot.lane.b32.xlu1 %v1565_v60, %s5879_s29 }
 0x469   : > { %1575 = vrot.lane.b32.xlu0 %v1564_v61, %s5879_s29 }
 0x46d   : > { %5489 = vrot.lane.b32.xlu0 %v5488_v16, %s5878_s28 }
 0x471   : > { %1763 = vrot.lane.b32.xlu0 %v1567_v40, %s5879_s29  ;;  %v5268_v40 = vpack.c.bf16 %v5477_v0, %v5476_v51 }
 0x475   : > { %1858 = vrot.lane.b32.xlu0 %v1569_v41, %s5879_s29 }
 0x479   : > { %2500 = vrot.lane.b32.xlu0 %v5997_v22, %s5881_s13 }
 0x47d   : > { %2504 = vrot.lane.b32.xlu0 %v6009_v29, %s5881_s13 }
 0x481   : > { %2428 = vrot.lane.b32.xlu0 %v5997_v22, %s5882_s14 }
 0x485   : > { %2508 = vrot.lane.b32.xlu0 %v6025_v33, %s5881_s13 }
 0x488   : > { %1032 = vadd.xlane.f32.xlu1 %v1031_v45 }
 0x489   : > { %2432 = vrot.lane.b32.xlu0 %v6009_v29, %s5882_s14 }
 0x48d   : > { %2512 = vrot.lane.b32.xlu0 %v6043_v37, %s5881_s13 }
 0x491   : > { %2436 = vrot.lane.b32.xlu0 %v6025_v33, %s5882_s14 }
 0x495   : > { %2440 = vrot.lane.b32.xlu0 %v6043_v37, %s5882_s14 }
 0x499   : > { %1670 = vrot.lane.b32.xlu1 %v1566_v57, %s5879_s29  ;;  %v1018_v60 = vpop.xlane.xlu0 %1017 }
 0x49a   : > { %5673 = vrcp.f32 %v1018_v60 }
 0x49d   : > { %1765 = vrot.lane.b32.xlu1 %v1568_v7, %s5879_s29 }
 0x4a1   : > { %1860 = vrot.lane.b32.xlu1 %v1570_v50, %s5879_s29 }
 0x4a3   : > { %v1030_v55 = vpop.xlane.xlu0 %1029 }
 0x4a4   : > { %v5674_v19 = vpop.eup %5673 }
 0x4a5   : > { %2502 = vrot.lane.b32.xlu1 %v6013_v30, %s5881_s13  ;;  %v1046_v53 = vmul.f32 %v5674_v19, %v6272_v39 }
 0x4a7   : > { %v1015_v11 = vpop.xlane.xlu1 %1014 }
 0x4a8   : > { %5675 = vrcp.f32 %v1015_v11 }
 0x4a9   : > { %2506 = vrot.lane.b32.xlu1 %v6029_v34, %s5881_s13  ;;  %5677 = vrcp.f32 %v1030_v55 }
 0x4ab   : > { %v1027_v59 = vpop.xlane.xlu1 %1026  ;;  %v1024_v16 = vpop.xlane.xlu0 %1023 }
 0x4ac   : > { %5679 = vrcp.f32 %v1027_v59 }
 0x4ad   : > { %2430 = vrot.lane.b32.xlu1 %v6013_v30, %s5882_s14  ;;  %5681 = vrcp.f32 %v1024_v16 }
 0x4af   : > { %v5485_v13 = vpop.permute.xlu1 %5484 }
 0x4b0   : > { %v5487_v41 = vunpack.i.h.bf16 %v5485_v13  ;;  %v5486_v42 = vunpack.i.l.bf16 %v5485_v13 }
 0x4b1   : > { %2510 = vrot.lane.b32.xlu1 %v6039_v36, %s5881_s13 }
 0x4b2   : > { %v5676_v61 = vpop.eup %5675 }
 0x4b3   : > { %v1045_v63 = vmul.f32 %v5676_v61, %v6280_v44  ;;  %v5678_v24 = vpop.eup %5677  ;;  %v1574_v44 = vpop.permute.xlu0 %1573 }
 0x4b4   : > { %v1050_v39 = vmul.f32 %v5678_v24, %v6276_v1 }
 0x4b5   : > { %5008 = vmatprep.mubr.msk.f32.mxu0 %vm964_vm3, %v1045_v63  ;;  %2434 = vrot.lane.b32.xlu1 %v6029_v34, %s5882_s14 }
 0x4b6   : > { %v5680_v54 = vpop.eup %5679  ;;  %5009 = vmatmul.mubr.msk.f32.vlgmr.msra.gmra.mrb[6].mxu0 %vm964_vm3, %v1046_v53 }
 0x4b7   : > { %5263 = vmatpush3.bf16.msra.mxu0 %v6235_v10  ;;  %v1049_v43 = vmul.f32 %v5680_v54, %v6285_v3  ;;  %v5280_v10 = vpack.c.bf16 %v5487_v41, %v5486_v42  ;;  %v5682_v45 = vpop.eup %5681 }
 0x4b8   : > { %5270 = vmatprep.subr.msk.bf16.mxu0 %vm6133_vm2, %v5268_v40  ;;  %v1048_v9 = vmul.f32 %v5682_v45, %v6288_v6 }
 0x4b9   : > { %2514 = vrot.lane.b32.xlu1 %v6051_v38, %s5881_s13  ;;  %5022 = vmatprep.mubr.msk.f32.mxu0 %vm964_vm3, %v1049_v43 }
 0x4ba   : > { %5023 = vmatmul.mubr.msk.f32.vlgmr.msra.gmra.mrb[8].mxu0 %vm964_vm3, %v1050_v39 }
 0x4bb   : > { %5036 = vmatprep.mubr.msk.f32.mxu0 %vm461_vm1, %v1574_v44 }
 0x4bd   : > { %2438 = vrot.lane.b32.xlu1 %v6039_v36, %s5882_s14 }
 0x4c0   : > { %5273 = vmatpush3.bf16.xpose.msk.msra.mxu0 %vm6133_vm2, %v5268_v40 }
 0x4c1   : > { %5282 = vmatprep.subr.msk.bf16.mxu0 %vm6133_vm2, %v5280_v10  ;;  %2442 = vrot.lane.b32.xlu1 %v6051_v38, %s5882_s14 }
 0x4e0   : > { %v1021_v1 = vpop.xlane.xlu1 %1020  ;;  %v1036_v3 = vpop.xlane.xlu0 %1035 }
 0x4e1   : > { %5683 = vrcp.f32 %v1021_v1  ;;  %v448_v1 = vld [vmem:[%s7113_s4 + $0x18] sm:$0xff] }
 0x4e2   : > { %5685 = vrcp.f32 %v1036_v3  ;;  %v6446_v3 = vld [vmem:[%s7113_s4 + $0x10] sm:$0xff] }
 0x4e4   : > { %v1576_v27 = vpop.permute.xlu0 %1575 }
 0x4e5   : > { %5037 = vmatmul.mubr.msk.f32.vlgmr.msra.gmra.mrb[10].mxu0 %vm461_vm1, %v1576_v27 }
 0x4e6   : > { %5285 = vmatpush3.bf16.xpose.msk.msra.mxu0 %vm6133_vm2, %v5280_v10 }
 0x4e8   : > { %v5490_v5 = vpop.permute.xlu0 %5489 }
 0x4e9   : > { %v5492_v51 = vunpack.i.h.bf16 %v5490_v5  ;;  %v5491_v63 = vunpack.i.l.bf16 %v5490_v5 }
 0x4eb   : > { %v5684_v14 = vpop.eup %5683  ;;  %v5286_v54 = vpack.c.bf16 %v5492_v51, %v5491_v63 }
 0x4ec   : > { %v1764_v17 = vpop.permute.xlu0 %1763  ;;  %v1047_v57 = vmul.f32 %v5684_v14, %v6306_v23  ;;  %v5686_v61 = vpop.eup %5685 }
 0x4ed   : > { %5050 = vmatprep.mubr.msk.f32.mxu0 %vm461_vm1, %v1764_v17  ;;  %v1052_v24 = vmul.f32 %v5686_v61, %v6308_v4 }
 0x4ee   : > { %5015 = vmatprep.mubr.msk.f32.mxu1 %vm964_vm3, %v1047_v57 }
 0x4ef   : > { %5016 = vmatmul.mubr.msk.f32.vlgmr.msra.gmra.mrb[10].mxu1 %vm964_vm3, %v1048_v9 }
 0x4f0   : > { %5267 = vmatpush3.bf16.msra.mxu1 %v6238_v21  ;;  %v1859_v7 = vpop.permute.xlu0 %1858  ;;  %v1669_v21 = vpop.permute.xlu1 %1668 }
 0x4f1   : > { %5276 = vmatprep.subr.msk.bf16.mxu1 %vm6133_vm2, %v5274_v8 }
 0x4f4   : > { %v2501_v58 = vpop.permute.xlu0 %2500 }
 0x4f5   : > { %v2524_v15 = vsel %vm461_vm1, %v2501_v58, 0.0 }
 0x4f6   : > { %2525 = vadd.xlane.f32.xlu1 %v2524_v15 }
 0x4f8   : > { %v2505_v23 = vpop.permute.xlu0 %2504 }
 0x4f9   : > { %v2530_v50 = vsel %vm461_vm1, %v2505_v23, 0.0 }
 0x4fa   : > { %2531 = vadd.xlane.f32.xlu1 %v2530_v50 }
 0x4fc   : > { %v2429_v6 = vpop.permute.xlu0 %2428 }
 0x4fd   : > { %v2452_v56 = vsel %vm461_vm1, %v2429_v6, 0.0 }
 0x4fe   : > { %2453 = vadd.xlane.f32.xlu1 %v2452_v56 }
 0x500   : > { %v2509_v60 = vpop.permute.xlu0 %2508 }
 0x501   : > { %v2536_v11 = vsel %vm461_vm1, %v2509_v60, 0.0 }
 0x502   : > { %2537 = vadd.xlane.f32.xlu1 %v2536_v11 }
 0x504   : > { %v2433_v2 = vpop.permute.xlu0 %2432 }
 0x505   : > { %v2458_v57 = vsel %vm461_vm1, %v2433_v2, 0.0 }
 0x508   : > { %v2513_v15 = vpop.permute.xlu0 %2512 }
 0x50c   : > { %v2437_v60 = vpop.permute.xlu0 %2436 }
 0x50d   : > { %v2464_v51 = vsel %vm461_vm1, %v2437_v60, 0.0 }
 0x510   : > { %v2441_v61 = vpop.permute.xlu0 %2440 }
 0x515   : > { %v1033_v55 = vpop.xlane.xlu1 %1032 }
 0x516   : > { %5687 = vrcp.f32 %v1033_v55 }
 0x519   : > { %v1671_v59 = vpop.permute.xlu1 %1670 }
 0x51d   : > { %v1766_v19 = vpop.permute.xlu1 %1765 }
 0x51e   : > { %5051 = vmatmul.mubr.msk.f32.vlgmr.msra.gmra.mrb[12].mxu0 %vm461_vm1, %v1766_v19  ;;  %v2542_v19 = vsel %vm461_vm1, %v2513_v15, 0.0 }
 0x520   : > { %v5688_v0 = vpop.eup %5687 }
 0x521   : > { %v1861_v16 = vpop.permute.xlu1 %1860  ;;  %v1051_v53 = vmul.f32 %v5688_v0, %v6344_v52 }
 0x523   : > { %5029 = vmatprep.mubr.msk.f32.mxu1 %vm964_vm3, %v1051_v53 }
 0x524   : > { %5030 = vmatmul.mubr.msk.f32.vlgmr.msra.gmra.mrb[12].mxu1 %vm964_vm3, %v1052_v24 }
 0x525   : > { %5279 = vmatpush3.bf16.xpose.msk.msra.mxu1 %vm6133_vm2, %v5274_v8  ;;  %v2503_v40 = vpop.permute.xlu1 %2502  ;;  %5043 = vmatprep.mubr.msk.f32.mxu1 %vm461_vm1, %v1669_v21 }
 0x526   : > { %5288 = vmatprep.subr.msk.bf16.mxu1 %vm6133_vm2, %v5286_v54  ;;  %v2527_v43 = vsel %vm461_vm1, %v2503_v40, 0.0  ;;  %v2470_v40 = vsel %vm461_vm1, %v2441_v61, 0.0 }
 0x527   : > { %2528 = vadd.xlane.f32.xlu0 %v2527_v43 }
 0x529   : > { %v2507_v52 = vpop.permute.xlu1 %2506 }
 0x52a   : > { %v2533_v4 = vsel %vm461_vm1, %v2507_v52, 0.0 }
 0x52b   : > { %2534 = vadd.xlane.f32.xlu0 %v2533_v4 }
 0x52c   : > { %5044 = vmatmul.mubr.msk.f32.vlgmr.msra.gmra.mrb[14].mxu1 %vm461_vm1, %v1671_v59 }
 0x52d   : > { %5291 = vmatpush3.bf16.xpose.msk.msra.mxu1 %vm6133_vm2, %v5286_v54  ;;  %5057 = vmatprep.mubr.msk.f32.mxu1 %vm461_vm1, %v1859_v7  ;;  %v2431_v13 = vpop.permute.xlu1 %2430 }
 0x52e   : > { %v2455_v39 = vsel %vm461_vm1, %v2431_v13, 0.0 }
 0x52f   : > { %2456 = vadd.xlane.f32.xlu0 %v2455_v39 }
 0x531   : > { %v2511_v7 = vpop.permute.xlu1 %2510 }
 0x532   : > { %v2539_v2 = vsel %vm461_vm1, %v2511_v7, 0.0 }
 0x534   : > { %5058 = vmatmul.mubr.msk.f32.vlgmr.msra.gmra.mrb[16].mxu1 %vm461_vm1, %v1861_v16 }
 0x535   : > { %v2435_v58 = vpop.permute.xlu1 %2434 }
 0x539   : > { %v2515_v23 = vpop.permute.xlu1 %2514 }
 0x53a   : > { %v2545_v15 = vsel %vm461_vm1, %v2515_v23, 0.0 }
 0x53d   : > { %v2439_v21 = vpop.permute.xlu1 %2438 }
 0x541   : > { %v2443_v0 = vpop.permute.xlu1 %2442 }
 0x583   : > { %v2526_v54 = vpop.xlane.xlu1 %2525 }
 0x589   : > { %v5010_v44 = vpop.f32.mrb[6].mxu0 }
 0x58a   : > { %1410 = vst.msk [vmem:[#allocation2 + $0x8] sm:$0xff] %vm461_vm1, %v5010_v44  ;;  %v1133_v41 = vpop.f32.mrb[7].mxu0  ;;  %v2532_v44 = vpop.xlane.xlu1 %2531 }
 0x58b   : > { %1409 = vst.msk [vmem:[#allocation2] sm:$0xff] %vm461_vm1, %v1133_v41 }
 0x58d   : > { %v5024_v42 = vpop.f32.mrb[8].mxu0 }
 0x58e   : > { %1414 = vst.msk [vmem:[#allocation2 + $0x28] sm:$0xff] %vm461_vm1, %v5024_v42  ;;  %v1311_v10 = vpop.f32.mrb[9].mxu0 }
 0x58f   : > { %1413 = vst.msk [vmem:[#allocation2 + $0x20] sm:$0xff] %vm461_vm1, %v1311_v10 }
 0x5b4   : > { %v2529_v63 = vpop.xlane.xlu0 %2528 }
 0x5b5   : > { %v2549_v60 = vmax.f32 %v2529_v63, 1e-24  ;;  %v6502_v63 = vstv %s4743_s22 }
 0x5b8   : > { %v5038_v27 = vpop.f32.mrb[10].mxu0  ;;  %v2535_v4 = vpop.xlane.xlu0 %2534 }
 0x5b9   : > { %v6448_v5 = vadd.f32 %v5038_v27, %v448_v1  ;;  %v1657_v45 = vpop.f32.mrb[11].mxu0  ;;  %v2551_v42 = vmax.f32 %v2535_v4, 1e-24  ;;  %v2550_v27 = vmax.f32 %v2532_v44, 1e-24 }
 0x5ba   : > { %v6451_v14 = vadd.f32 %v1657_v45, %v6446_v3 }
 0x5bb   : > { %v1954_v62 = vsel %vm964_vm3, %v6448_v5, -inf  ;;  %5689 = vrsqrt.f32 %v2551_v42 }
 0x5bc   : > { %1955 = vmax.xlane.f32.xlu1 %v1954_v62  ;;  %v1951_v17 = vsel %vm964_vm3, %v6451_v14, -inf  ;;  %5691 = vrsqrt.f32 %v2550_v27 }
 0x5bd   : > { %1952 = vmax.xlane.f32.xlu0 %v1951_v17  ;;  %5693 = vrsqrt.f32 %v2549_v60 }
 0x5c0   : > { %2459 = vadd.xlane.f32.xlu1 %v2458_v57 }
 0x5c2   : > { %v5017_v9 = vpop.f32.mrb[10].mxu1 }
 0x5c3   : > { %1412 = vst.msk [vmem:[#allocation2 + $0x18] sm:$0xff] %vm461_vm1, %v5017_v9  ;;  %v1222_v8 = vpop.f32.mrb[11].mxu1  ;;  %v2461_v9 = vsel %vm461_vm1, %v2435_v58, 0.0  ;;  %v2473_v58 = vsel %vm461_vm1, %v2443_v0, 0.0 }
 0x5c4   : > { %1411 = vst.msk [vmem:[#allocation2 + $0x10] sm:$0xff] %vm461_vm1, %v1222_v8 }
 0x5c5   : > { %v5690_v57 = vpop.eup %5689 }
 0x5c6   : > { %v5692_v8 = vpop.eup %5691 }
 0x5c7   : > { %v2566_v7 = vmul.f32 %v5692_v8, %v5999_v25  ;;  %v5694_v23 = vpop.eup %5693 }
 0x5c8   : > { %v2565_v61 = vmul.f32 %v5694_v23, %v5993_v20 }
 0x5f1   : > { %v5052_v50 = vpop.f32.mrb[12].mxu0 }
 0x5f2   : > { %v1847_v6 = vpop.f32.mrb[13].mxu0  ;;  %v6472_v43 = vadd.f32 %v5052_v50, %v448_v1 }
 0x5f3   : > { %v6461_v56 = vadd.f32 %v1847_v6, %v6446_v3  ;;  %v2467_v6 = vsel %vm461_vm1, %v2439_v21, 0.0 }
 0x5f4   : > { %v1966_v39 = vsel %vm964_vm3, %v6472_v43, -inf }
 0x5f5   : > { %v1963_v11 = vsel %vm964_vm3, %v6461_v56, -inf }
 0x5f6   : > { %1964 = vmax.xlane.f32.xlu1 %v1963_v11  ;;  %v2454_v11 = vpop.xlane.xlu1 %2453 }
 0x5f7   : > { %v5031_v55 = vpop.f32.mrb[12].mxu1 }
 0x5f8   : > { %1416 = vst.msk [vmem:[#allocation2 + $0x38] sm:$0xff] %vm461_vm1, %v5031_v55  ;;  %v1400_v59 = vpop.f32.mrb[13].mxu1  ;;  %v2548_v55 = vmax.f32 %v2526_v54, 1e-24 }
 0x5f9   : > { %1415 = vst.msk [vmem:[#allocation2 + $0x30] sm:$0xff] %vm461_vm1, %v1400_v59  ;;  %v2476_v59 = vmax.f32 %v2454_v11, 1e-24 }
 0x5fa   : > { %2543 = vadd.xlane.f32.xlu1 %v2542_v19  ;;  %5695 = vrsqrt.f32 %v2548_v55 }
 0x5fb   : > { %5697 = vrsqrt.f32 %v2476_v59 }
 0x5fe   : > { %2465 = vadd.xlane.f32.xlu1 %v2464_v51 }
 0x5ff   : > { %v5045_v16 = vpop.f32.mrb[14].mxu1 }
 0x600   : > { %v6469_v53 = vadd.f32 %v5045_v16, %v448_v1  ;;  %v1752_v24 = vpop.f32.mrb[15].mxu1 }
 0x601   : > { %v6477_v13 = vadd.f32 %v1752_v24, %v6446_v3 }
 0x602   : > { %2471 = vadd.xlane.f32.xlu1 %v2470_v40  ;;  %v1960_v52 = vsel %vm964_vm3, %v6469_v53, -inf }
 0x603   : > { %1961 = vmax.xlane.f32.xlu0 %v1960_v52  ;;  %v1957_v45 = vsel %vm964_vm3, %v6477_v13, -inf  ;;  %v2538_v52 = vpop.xlane.xlu1 %2537 }
 0x604   : > { %v5696_v19 = vpop.eup %5695 }
 0x605   : > { %v5698_v51 = vpop.eup %5697  ;;  %v2564_v21 = vmul.f32 %v5696_v19, %v5991_v18  ;;  %v2552_v19 = vmax.f32 %v2538_v52, 1e-24 }
 0x606   : > { %v2492_v0 = vmul.f32 %v5698_v51, %v5991_v18 }
 0x607   : > { %v5059_v41 = vpop.f32.mrb[16].mxu1  ;;  %1967 = vmax.xlane.f32.xlu0 %v1966_v39  ;;  %v5513_v16 = vpack.i.bf16 %v2565_v61, %v2564_v21 }
 0x608   : > { %v1942_v10 = vpop.f32.mrb[17].mxu1  ;;  %v6483_v62 = vadd.f32 %v5059_v41, %v448_v1  ;;  %v2567_v1 = vmul.f32 %v5690_v57, %v6005_v28  ;;  %v2574_v54 = vmul.f32 %v6502_v63, %v2492_v0 }
 0x609   : > { %v6506_v24 = vadd.f32 %v1942_v10, %v6446_v3 }
 0x60a   : > { %v1972_v17 = vsel %vm964_vm3, %v6483_v62, -inf  ;;  %v5518_v50 = vpack.i.bf16 %v2567_v1, %v2566_v7 }
 0x60b   : > { %1958 = vmax.xlane.f32.xlu0 %v1957_v45  ;;  %v1969_v40 = vsel %vm964_vm3, %v6506_v24, -inf  ;;  %v2457_v45 = vpop.xlane.xlu0 %2456 }
 0x60f   : > { %2540 = vadd.xlane.f32.xlu0 %v2539_v2 }
 0x613   : > { %1973 = vmax.xlane.f32.xlu0 %v1972_v17  ;;  %5494 = vrot.lane.b32.xlu1 %v6189_v46, %s5883_s21 }
 0x617   : > { %2462 = vadd.xlane.f32.xlu0 %v2461_v9  ;;  %5504 = vrot.lane.b32.xlu1 %v6194_v47, %s5883_s21 }
 0x61b   : > { %2546 = vadd.xlane.f32.xlu0 %v2545_v15  ;;  %5509 = vrot.lane.b32.xlu1 %v6199_v48, %s5883_s21 }
 0x61f   : > { %2468 = vadd.xlane.f32.xlu0 %v2467_v6  ;;  %5519 = vrot.lane.b32.xlu1 %v5518_v50, %s5881_s13 }
 0x623   : > { %2474 = vadd.xlane.f32.xlu0 %v2473_v58 }
 0x639   : > { %5499 = vrot.lane.b32.xlu0 %v6204_v49, %s5883_s21 }
 0x63d   : > { %5514 = vrot.lane.b32.xlu0 %v5513_v16, %s5881_s13 }
 0x641   : > { %2584 = vrot.lane.b32.xlu0 %v2574_v54, %s5882_s14 }
 0x643   : > { %1970 = vmax.xlane.f32.xlu1 %v1969_v40 }
 0x649   : > { %v1956_v4 = vpop.xlane.xlu1 %1955 }
 0x64a   : > { %v1976_v39 = vsub.f32 %v6448_v5, %v1956_v4  ;;  %v6525_v17 = vpop.xlane.xlu0 %1952 }
 0x64c   : > { %v1985_v44 = vmul.f32 1.442695, %v1976_v39 }
 0x64d   : > { %v6517_v42 = vpop.xlane.xlu1 %2459 }
 0x64e   : > { %5699 = vpow2.f32 %v1985_v44 }
 0x658   : > { %v6513_v41 = vpop.eup %5699 }
 0x659   : > { %v2002_v3 = vsel %vm964_vm3, %v6513_v41, 0.0 }
 0x660   : > { %2003 = vadd.xlane.f32.xlu0 %v2002_v3 }
 0x683   : > { %v6519_v10 = vpop.xlane.xlu1 %1964 }
 0x687   : > { %v6521_v27 = vpop.xlane.xlu1 %2543 }
 0x68b   : > { %v6523_v2 = vpop.xlane.xlu1 %2465 }
 0x68f   : > { %v6527_v5 = vpop.xlane.xlu1 %2471 }
 0x690   : > { %v1962_v57 = vpop.xlane.xlu0 %1961 }
 0x691   : > { %v1978_v9 = vsub.f32 %v6469_v53, %v1962_v57 }
 0x693   : > { %v1989_v8 = vmul.f32 1.442695, %v1978_v9  ;;  %v5495_v1 = vpop.permute.xlu1 %5494 }
 0x694   : > { %v5497_v15 = vunpack.i.h.bf16 %v5495_v1  ;;  %v5496_v7 = vunpack.i.l.bf16 %v5495_v1  ;;  %v1968_v50 = vpop.xlane.xlu0 %1967 }
 0x695   : > { %5701 = vpow2.f32 %v1989_v8  ;;  %v1980_v6 = vsub.f32 %v6472_v43, %v1968_v50 }
 0x696   : > { %v5292_v58 = vpack.c.bf16 %v5497_v15, %v5496_v7  ;;  %v2477_v15 = vmax.f32 %v2457_v45, 1e-24 }
 0x697   : > { %v1993_v60 = vmul.f32 1.442695, %v1980_v6  ;;  %v5505_v11 = vpop.permute.xlu1 %5504 }
 0x698   : > { %v5507_v55 = vunpack.i.h.bf16 %v5505_v11  ;;  %v5506_v59 = vunpack.i.l.bf16 %v5505_v11  ;;  %v6531_v23 = vpop.xlane.xlu0 %1958  ;;  %5293 = vmatprep.subr.bf16.mxu0 %v5292_v58 }
 0x699   : > { %5703 = vpow2.f32 %v1993_v60  ;;  %5295 = vmatpush3.bf16.msra.mxu0 %v5292_v58 }
 0x69a   : > { %v6533_v53 = vpack.c.bf16 %v5507_v55, %v5506_v59  ;;  %5705 = vrsqrt.f32 %v2552_v19 }
 0x69b   : > { %v5510_v6 = vpop.permute.xlu1 %5509 }
 0x69c   : > { %v2541_v61 = vpop.xlane.xlu0 %2540  ;;  %5301 = vmatprep.subr.bf16.mxu0 %v6533_v53  ;;  %v5512_v11 = vunpack.i.h.bf16 %v5510_v6  ;;  %v5511_v55 = vunpack.i.l.bf16 %v5510_v6 }
 0x69d   : > { %v2553_v51 = vmax.f32 %v2541_v61, 1e-24  ;;  %v2554_v61 = vmax.f32 %v6521_v27, 1e-24  ;;  %v1977_v27 = vsub.f32 %v6477_v13, %v6531_v23 }
 0x69e   : > { %v6560_v45 = vpack.c.bf16 %v5512_v11, %v5511_v55  ;;  %v2478_v11 = vmax.f32 %v6517_v42, 1e-24 }
 0x69f   : > { %v6536_v21 = vpop.eup %5701  ;;  %5707 = vrsqrt.f32 %v2553_v51 }
 0x6a0   : > { %v1974_v43 = vpop.xlane.xlu0 %1973  ;;  %v2008_v16 = vsel %vm964_vm3, %v6536_v21, 0.0 }
 0x6a1   : > { %v1982_v0 = vsub.f32 %v6483_v62, %v1974_v43  ;;  %2009 = vadd.xlane.f32.xlu0 %v2008_v16  ;;  %v2480_v43 = vmax.f32 %v6523_v2, 1e-24  ;;  %v1975_v16 = vsub.f32 %v6451_v14, %v6525_v17 }
 0x6a3   : > { %v6541_v54 = vpop.eup %5703  ;;  %v1997_v40 = vmul.f32 1.442695, %v1982_v0  ;;  %v2482_v0 = vmax.f32 %v6527_v5, 1e-24 }
 0x6a4   : > { %v6543_v52 = vpop.xlane.xlu0 %2462  ;;  %v2014_v4 = vsel %vm964_vm3, %v6541_v54, 0.0  ;;  %v5706_v39 = vpop.eup %5705 }
 0x6a5   : > { %5709 = vpow2.f32 %v1997_v40  ;;  %2015 = vadd.xlane.f32.xlu0 %v2014_v4  ;;  %v2568_v57 = vmul.f32 %v5706_v39, %v6003_v26  ;;  %v1983_v4 = vmul.f32 1.442695, %v1975_v16 }
 0x6a6   : > { %5711 = vrsqrt.f32 %v2477_v15 }
 0x6a8   : > { %v2547_v44 = vpop.xlane.xlu0 %2546 }
 0x6a9   : > { %v5708_v3 = vpop.eup %5707  ;;  %v2555_v58 = vmax.f32 %v2547_v44, 1e-24 }
 0x6aa   : > { %v2569_v9 = vmul.f32 %v5708_v3, %v6015_v31  ;;  %v1979_v3 = vsub.f32 %v6461_v56, %v6519_v10 }
 0x6ab   : > { %5713 = vrsqrt.f32 %v2555_v58 }
 0x6ac   : > { %v6549_v8 = vpop.xlane.xlu0 %2468  ;;  %v5523_v62 = vpack.i.bf16 %v2569_v9, %v2568_v57  ;;  %5715 = vrsqrt.f32 %v2554_v61  ;;  %v1987_v57 = vmul.f32 1.442695, %v1977_v27 }
 0x6ad   : > { %5717 = vrsqrt.f32 %v2480_v43 }
 0x6ae   : > { %5524 = vrot.lane.b32.xlu1 %v5523_v62, %s5881_s13  ;;  %5719 = vrsqrt.f32 %v2482_v0  ;;  %v1991_v62 = vmul.f32 1.442695, %v1979_v3 }
 0x6af   : > { %v6552_v1 = vpop.eup %5709  ;;  %5721 = vpow2.f32 %v1983_v4  ;;  %v2481_v4 = vmax.f32 %v6549_v8, 1e-24 }
 0x6b0   : > { %v6554_v7 = vpop.xlane.xlu0 %2474  ;;  %v2020_v50 = vsel %vm964_vm3, %v6552_v1, 0.0  ;;  %v5712_v40 = vpop.eup %5711  ;;  %5723 = vpow2.f32 %v1987_v57 }
 0x6b1   : > { %2021 = vadd.xlane.f32.xlu0 %v2020_v50  ;;  %v2493_v2 = vmul.f32 %v5712_v40, %v5993_v20  ;;  %5725 = vpow2.f32 %v1991_v62  ;;  %v2483_v27 = vmax.f32 %v6554_v7, 1e-24 }
 0x6b2   : > { %5727 = vrsqrt.f32 %v2478_v11 }
 0x6b3   : > { %v2575_v14 = vmul.f32 %v6502_v63, %v2493_v2 }
 0x6b4   : > { %v5500_v60 = vpop.permute.xlu0 %5499 }
 0x6b5   : > { %v5502_v59 = vunpack.i.h.bf16 %v5500_v60  ;;  %v5501_v19 = vunpack.i.l.bf16 %v5500_v60  ;;  %v5714_v39 = vpop.eup %5713 }
 0x6b6   : > { %v5716_v44 = vpop.eup %5715  ;;  %v2571_v17 = vmul.f32 %v5714_v39, %v6031_v35 }
 0x6b7   : > { %v5296_v51 = vpack.c.bf16 %v5502_v59, %v5501_v19  ;;  %v5718_v5 = vpop.eup %5717  ;;  %v2570_v9 = vmul.f32 %v5716_v44, %v6021_v32 }
 0x6b8   : > { %v2496_v23 = vmul.f32 %v5718_v5, %v6003_v26  ;;  %v5720_v15 = vpop.eup %5719  ;;  %v5515_v57 = vpop.permute.xlu0 %5514 }
 0x6b9   : > { %5297 = vmatprep.subr.bf16.mxu1 %v5296_v51  ;;  %v5528_v13 = vpack.i.bf16 %v2571_v17, %v2570_v9  ;;  %v2498_v10 = vmul.f32 %v5720_v15, %v6021_v32  ;;  %v6579_v50 = vpop.eup %5721  ;;  %v5517_v11 = vunpack.i.h.bf16 %v5515_v57 }
 0x6ba   : > { %5299 = vmatpush3.bf16.msra.mxu1 %v5296_v51  ;;  %v2578_v56 = vmul.f32 %v6502_v63, %v2496_v23  ;;  %v1999_v6 = vsel %vm964_vm3, %v6579_v50, 0.0  ;;  %v6585_v60 = vpop.eup %5723 }
 0x6bb   : > { %5305 = vmatprep.subr.bf16.mxu1 %v6560_v45  ;;  %v2580_v58 = vmul.f32 %v6502_v63, %v2498_v10  ;;  %v2005_v55 = vsel %vm964_vm3, %v6585_v60, 0.0  ;;  %v6591_v59 = vpop.eup %5725 }
 0x6bc   : > { %v2011_v19 = vsel %vm964_vm3, %v6591_v59, 0.0  ;;  %v5728_v42 = vpop.eup %5727 }
 0x6bd   : > { %v2494_v61 = vmul.f32 %v5728_v42, %v5999_v25 }
 0x6bf   : > { %v2576_v51 = vmul.f32 %v6502_v63, %v2494_v61 }
 0x6c7   : > { %2586 = vrot.lane.b32.xlu0 %v2575_v14, %s5882_s14  ;;  %v6637_v14 = vpop.permute.xlu0 %2584 }
 0x6cb   : > { %5529 = vrot.lane.b32.xlu0 %v5528_v13, %s5881_s13  ;;  %s5887_s13 = smov 40  }
 0x6cf   : > { %2774 = vrot.lane.b32.xlu0 %v2578_v56, %s5882_s14 }
 0x6d2   : > { %2000 = vadd.xlane.f32.xlu1 %v1999_v6 }
 0x6d3   : > { %2869 = vrot.lane.b32.xlu0 %v2580_v58, %s5882_s14 }
 0x6d6   : > { %2006 = vadd.xlane.f32.xlu1 %v2005_v55  ;;  %v5516_v55 = vunpack.i.l.bf16 %v5515_v57 }
 0x6d7   : > { %3511 = vrot.lane.b32.xlu0 %v5997_v22, %s5884_s23 }
 0x6da   : > { %2012 = vadd.xlane.f32.xlu1 %v2011_v19 }
 0x6db   : > { %3515 = vrot.lane.b32.xlu0 %v6009_v29, %s5884_s23 }
 0x6df   : > { %3439 = vrot.lane.b32.xlu0 %v5997_v22, %s5885_s25  ;;  %v6612_v22 = vpop.permute.xlu1 %5519 }
 0x6e3   : > { %3519 = vrot.lane.b32.xlu0 %v6025_v33, %s5884_s23  ;;  %v1971_v43 = vpop.xlane.xlu1 %1970 }
 0x6e4   : > { %v1981_v16 = vsub.f32 %v6506_v24, %v1971_v43 }
 0x6e6   : > { %v1995_v0 = vmul.f32 1.442695, %v1981_v16  ;;  %v5522_v16 = vunpack.i.h.bf16 %v6612_v22 }
 0x6e7   : > { %3443 = vrot.lane.b32.xlu0 %v6009_v29, %s5885_s25  ;;  %v2479_v29 = vmax.f32 %v6543_v52, 1e-24 }
 0x6e8   : > { %5729 = vpow2.f32 %v1995_v0  ;;  %v5521_v0 = vunpack.i.l.bf16 %v6612_v22 }
 0x6e9   : > { %5731 = vrsqrt.f32 %v2479_v29  ;;  %v5308_v29 = vpack.c.bf16 %v5517_v11, %v5516_v55 }
 0x6ea   : > { %5733 = vrsqrt.f32 %v2481_v4 }
 0x6eb   : > { %2679 = vrot.lane.b32.xlu1 %v2576_v51, %s5882_s14  ;;  %3523 = vrot.lane.b32.xlu0 %v6043_v37, %s5884_s23  ;;  %5735 = vrsqrt.f32 %v2483_v27 }
 0x6ed   : > { %v2004_v17 = vpop.xlane.xlu0 %2003 }
 0x6ee   : > { %5737 = vrcp.f32 %v2004_v17 }
 0x6ef   : > { %3447 = vrot.lane.b32.xlu0 %v6025_v33, %s5885_s25 }
 0x6f2   : > { %v6618_v40 = vpop.eup %5729 }
 0x6f3   : > { %3451 = vrot.lane.b32.xlu0 %v6043_v37, %s5885_s25  ;;  %v2017_v33 = vsel %vm964_vm3, %v6618_v40, 0.0  ;;  %v5732_v37 = vpop.eup %5731 }
 0x6f4   : > { %v2495_v24 = vmul.f32 %v5732_v37, %v6005_v28  ;;  %v5734_v2 = vpop.eup %5733  ;;  %v5314_v37 = vpack.c.bf16 %v5522_v16, %v5521_v0 }
 0x6f5   : > { %v2497_v52 = vmul.f32 %v5734_v2, %v6015_v31  ;;  %v5736_v44 = vpop.eup %5735 }
 0x6f6   : > { %v2577_v39 = vmul.f32 %v6502_v63, %v2495_v24  ;;  %v2499_v3 = vmul.f32 %v5736_v44, %v6031_v35 }
 0x6f7   : > { %v2579_v8 = vmul.f32 %v6502_v63, %v2497_v52 }
 0x6f8   : > { %v2581_v7 = vmul.f32 %v6502_v63, %v2499_v3  ;;  %v5738_v58 = vpop.eup %5737 }
 0x6f9   : > { %v2032_v61 = vmul.f32 %v5738_v58, %v6513_v41 }
 0x70f   : > { %2018 = vadd.xlane.f32.xlu1 %v2017_v33 }
 0x720   : > { %2681 = vrot.lane.b32.xlu1 %v2577_v39, %s5882_s14  ;;  %v5525_v23 = vpop.permute.xlu1 %5524 }
 0x721   : > { %v5527_v24 = vunpack.i.h.bf16 %v5525_v23  ;;  %v5526_v2 = vunpack.i.l.bf16 %v5525_v23 }
 0x723   : > { %v5320_v52 = vpack.c.bf16 %v5527_v24, %v5526_v2 }
 0x724   : > { %2776 = vrot.lane.b32.xlu1 %v2579_v8, %s5882_s14 }
 0x728   : > { %2871 = vrot.lane.b32.xlu1 %v2581_v7, %s5882_s14  ;;  %s5888_s14 = smov 8  }
 0x72c   : > { %3513 = vrot.lane.b32.xlu1 %v6013_v30, %s5884_s23 }
 0x72e   : > { %v2010_v5 = vpop.xlane.xlu0 %2009 }
 0x730   : > { %3517 = vrot.lane.b32.xlu1 %v6029_v34, %s5884_s23 }
 0x732   : > { %v2016_v63 = vpop.xlane.xlu0 %2015 }
 0x734   : > { %3441 = vrot.lane.b32.xlu1 %v6013_v30, %s5885_s25 }
 0x738   : > { %3521 = vrot.lane.b32.xlu1 %v6039_v36, %s5884_s23 }
 0x73c   : > { %3445 = vrot.lane.b32.xlu1 %v6029_v34, %s5885_s25 }
 0x73e   : > { %v6647_v9 = vpop.xlane.xlu0 %2021 }
 0x740   : > { %3525 = vrot.lane.b32.xlu1 %v6051_v38, %s5884_s23 }
 0x742   : > { %v2587_v30 = vpop.permute.xlu0 %2586 }
 0x744   : > { %3449 = vrot.lane.b32.xlu1 %v6039_v36, %s5885_s25 }
 0x746   : > { %v6653_v62 = vpop.permute.xlu0 %5529 }
 0x747   : > { %v5532_v57 = vunpack.i.h.bf16 %v6653_v62 }
 0x748   : > { %3453 = vrot.lane.b32.xlu1 %v6051_v38, %s5885_s25 }
 0x74a   : > { %v2775_v13 = vpop.permute.xlu0 %2774 }
 0x74e   : > { %v6655_v15 = vpop.permute.xlu0 %2869 }
 0x752   : > { %v3512_v56 = vpop.permute.xlu0 %3511 }
 0x753   : > { %v3535_v19 = vsel %vm461_vm1, %v3512_v56, 0.0 }
 0x756   : > { %v3516_v36 = vpop.permute.xlu0 %3515 }
 0x757   : > { %v3541_v33 = vsel %vm461_vm1, %v3516_v36, 0.0 }
 0x75a   : > { %v3440_v4 = vpop.permute.xlu0 %3439 }
 0x75e   : > { %v3520_v39 = vpop.permute.xlu0 %3519 }
 0x75f   : > { %v2001_v34 = vpop.xlane.xlu1 %2000 }
 0x760   : > { %5739 = vrcp.f32 %v2001_v34 }
 0x761   : > { %5741 = vrcp.f32 %v2010_v5 }
 0x763   : > { %v2007_v10 = vpop.xlane.xlu1 %2006 }
 0x764   : > { %5743 = vrcp.f32 %v2007_v10 }
 0x765   : > { %5745 = vrcp.f32 %v2016_v63 }
 0x767   : > { %v2013_v6 = vpop.xlane.xlu1 %2012 }
 0x768   : > { %5747 = vrcp.f32 %v2013_v6 }
 0x769   : > { %5749 = vrcp.f32 %v6647_v9 }
 0x76a   : > { %v5740_v38 = vpop.eup %5739 }
 0x76b   : > { %v2031_v42 = vmul.f32 %v5740_v38, %v6579_v50  ;;  %v5742_v51 = vpop.eup %5741  ;;  %v449_v38 = vld [vmem:[%s7113_s4 + $0x20] sm:$0xff] }
 0x76c   : > { %3536 = vadd.xlane.f32.xlu1 %v3535_v19  ;;  %v2034_v41 = vmul.f32 %v5742_v51, %v6536_v21  ;;  %v3444_v51 = vpop.permute.xlu0 %3443 }
 0x76d   : > { %5064 = vmatprep.mubr.msk.f32.mxu0 %vm964_vm3, %v2031_v42  ;;  %v3469_v16 = vsel %vm461_vm1, %v3444_v51, 0.0 }
 0x76e   : > { %v5744_v43 = vpop.eup %5743  ;;  %5065 = vmatmul.mubr.msk.f32.vlgmr.msra.gmra.mrb[14].mxu0 %vm964_vm3, %v2032_v61 }
 0x76f   : > { %5303 = vmatpush3.bf16.msra.mxu0 %v6533_v53  ;;  %v2033_v50 = vmul.f32 %v5744_v43, %v6585_v60  ;;  %v5746_v27 = vpop.eup %5745  ;;  %v3463_v53 = vsel %vm461_vm1, %v3440_v4, 0.0 }
 0x770   : > { %5310 = vmatprep.subr.msk.bf16.mxu0 %vm6133_vm2, %v5308_v29  ;;  %3542 = vadd.xlane.f32.xlu1 %v3541_v33  ;;  %v2036_v21 = vmul.f32 %v5746_v27, %v6541_v54  ;;  %v2680_v54 = vpop.permute.xlu1 %2679  ;;  %v3524_v4 = vpop.permute.xlu0 %3523 }
 0x771   : > { %5071 = vmatprep.mubr.msk.f32.mxu1 %vm964_vm3, %v2033_v50 }
 0x772   : > { %v5748_v22 = vpop.eup %5747  ;;  %5072 = vmatmul.mubr.msk.f32.vlgmr.msra.gmra.mrb[18].mxu1 %vm964_vm3, %v2034_v41 }
 0x773   : > { %5307 = vmatpush3.bf16.msra.mxu1 %v6560_v45  ;;  %v2035_v60 = vmul.f32 %v5748_v22, %v6591_v59  ;;  %v3547_v45 = vsel %vm461_vm1, %v3520_v39, 0.0  ;;  %v5750_v3 = vpop.eup %5749 }
 0x774   : > { %5316 = vmatprep.subr.msk.bf16.mxu1 %vm6133_vm2, %v5314_v37  ;;  %3464 = vadd.xlane.f32.xlu1 %v3463_v53  ;;  %v2038_v63 = vmul.f32 %v5750_v3, %v6552_v1  ;;  %v3448_v22 = vpop.permute.xlu0 %3447 }
 0x775   : > { %5078 = vmatprep.mubr.msk.f32.mxu0 %vm964_vm3, %v2035_v60  ;;  %v3553_v60 = vsel %vm461_vm1, %v3524_v4, 0.0 }
 0x776   : > { %5079 = vmatmul.mubr.msk.f32.vlgmr.msra.gmra.mrb[16].mxu0 %vm964_vm3, %v2036_v21  ;;  %v3475_v21 = vsel %vm461_vm1, %v3448_v22, 0.0 }
 0x777   : > { %5092 = vmatprep.mubr.msk.f32.mxu0 %vm461_vm1, %v6637_v14  ;;  %v5531_v14 = vunpack.i.l.bf16 %v6653_v62 }
 0x778   : > { %5313 = vmatpush3.bf16.xpose.msk.msra.mxu0 %vm6133_vm2, %v5308_v29  ;;  %3548 = vadd.xlane.f32.xlu1 %v3547_v45  ;;  %v3452_v39 = vpop.permute.xlu0 %3451 }
 0x779   : > { %5322 = vmatprep.subr.msk.bf16.mxu0 %vm6133_vm2, %v5320_v52  ;;  %v5326_v9 = vpack.c.bf16 %v5532_v57, %v5531_v14 }
 0x77f   : > { %5093 = vmatmul.mubr.msk.f32.vlgmr.msra.gmra.mrb[18].mxu0 %vm461_vm1, %v2587_v30 }
 0x780   : > { %5325 = vmatpush3.bf16.xpose.msk.msra.mxu0 %vm6133_vm2, %v5320_v52  ;;  %5106 = vmatprep.mubr.msk.f32.mxu0 %vm461_vm1, %v2775_v13 }
 0x79c   : > { %v2019_v59 = vpop.xlane.xlu1 %2018 }
 0x79d   : > { %5751 = vrcp.f32 %v2019_v59 }
 0x7a0   : > { %v2682_v44 = vpop.permute.xlu1 %2681 }
 0x7a4   : > { %v2777_v8 = vpop.permute.xlu1 %2776 }
 0x7a5   : > { %5107 = vmatmul.mubr.msk.f32.vlgmr.msra.gmra.mrb[20].mxu0 %vm461_vm1, %v2777_v8  ;;  %v3481_v8 = vsel %vm461_vm1, %v3452_v39, 0.0 }
 0x7a7   : > { %v5752_v7 = vpop.eup %5751 }
 0x7a8   : > { %v2872_v17 = vpop.permute.xlu1 %2871  ;;  %v2037_v5 = vmul.f32 %v5752_v7, %v6618_v40 }
 0x7aa   : > { %5085 = vmatprep.mubr.msk.f32.mxu1 %vm964_vm3, %v2037_v5 }
 0x7ab   : > { %5086 = vmatmul.mubr.msk.f32.vlgmr.msra.gmra.mrb[20].mxu1 %vm964_vm3, %v2038_v63 }
 0x7ac   : > { %5319 = vmatpush3.bf16.xpose.msk.msra.mxu1 %vm6133_vm2, %v5314_v37  ;;  %v3514_v30 = vpop.permute.xlu1 %3513  ;;  %5099 = vmatprep.mubr.msk.f32.mxu1 %vm461_vm1, %v2680_v54 }
 0x7ad   : > { %5328 = vmatprep.subr.msk.bf16.mxu1 %vm6133_vm2, %v5326_v9  ;;  %v3538_v62 = vsel %vm461_vm1, %v3514_v30, 0.0 }
 0x7ae   : > { %3539 = vadd.xlane.f32.xlu0 %v3538_v62 }
 0x7b0   : > { %v3518_v40 = vpop.permute.xlu1 %3517 }
 0x7b1   : > { %v3544_v1 = vsel %vm461_vm1, %v3518_v40, 0.0 }
 0x7b2   : > { %3545 = vadd.xlane.f32.xlu0 %v3544_v1 }
 0x7b3   : > { %5100 = vmatmul.mubr.msk.f32.vlgmr.msra.gmra.mrb[22].mxu1 %vm461_vm1, %v2682_v44 }
 0x7b4   : > { %5331 = vmatpush3.bf16.xpose.msk.msra.mxu1 %vm6133_vm2, %v5326_v9  ;;  %5113 = vmatprep.mubr.msk.f32.mxu1 %vm461_vm1, %v6655_v15  ;;  %v3442_v13 = vpop.permute.xlu1 %3441  ;;  %v450_v15 = vld [vmem:[%s7113_s4 + $0x28] sm:$0xff] }
 0x7b5   : > { %v3466_v23 = vsel %vm461_vm1, %v3442_v13, 0.0 }
 0x7b6   : > { %3467 = vadd.xlane.f32.xlu0 %v3466_v23 }
 0x7b8   : > { %v3522_v0 = vpop.permute.xlu1 %3521 }
 0x7bb   : > { %5114 = vmatmul.mubr.msk.f32.vlgmr.msra.gmra.mrb[24].mxu1 %vm461_vm1, %v2872_v17 }
 0x7bc   : > { %v3446_v29 = vpop.permute.xlu1 %3445 }
 0x7c0   : > { %v3526_v33 = vpop.permute.xlu1 %3525 }
 0x7c4   : > { %v3450_v24 = vpop.permute.xlu1 %3449 }
 0x7c5   : > { %v3478_v4 = vsel %vm461_vm1, %v3450_v24, 0.0 }
 0x7c8   : > { %v3454_v52 = vpop.permute.xlu1 %3453 }
 0x7f9   : > { %v3537_v3 = vpop.xlane.xlu1 %3536 }
 0x7fd   : > { %v3543_v63 = vpop.xlane.xlu1 %3542 }
 0x7fe   : > { %v3561_v13 = vmax.f32 %v3543_v63, 1e-24 }
 0x801   : > { %v3465_v39 = vpop.xlane.xlu1 %3464 }
 0x83b   : > { %v3540_v45 = vpop.xlane.xlu0 %3539 }
 0x83f   : > { %v3546_v14 = vpop.xlane.xlu0 %3545 }
 0x840   : > { %v3562_v30 = vmax.f32 %v3546_v14, 1e-24 }
 0x841   : > { %v6713_v34 = vpop.f32.mrb[14].mxu0 }
 0x842   : > { %v6715_v56 = vpop.f32.mrb[15].mxu0  ;;  %5753 = vrsqrt.f32 %v3562_v30 }
 0x843   : > { %5755 = vrsqrt.f32 %v3561_v13 }
 0x845   : > { %v6717_v10 = vpop.f32.mrb[18].mxu1 }
 0x846   : > { %v6719_v6 = vpop.f32.mrb[19].mxu1 }
 0x849   : > { %v6721_v36 = vpop.f32.mrb[16].mxu0 }
 0x84a   : > { %v6723_v58 = vpop.f32.mrb[17].mxu0 }
 0x852   : > { %v5094_v11 = vpop.f32.mrb[18].mxu0 }
 0x853   : > { %v6731_v55 = vadd.f32 %v5094_v11, %v450_v15  ;;  %v2668_v19 = vpop.f32.mrb[19].mxu0  ;;  %v3550_v11 = vsel %vm461_vm1, %v3522_v0, 0.0 }
 0x854   : > { %v6733_v42 = vadd.f32 %v2668_v19, %v449_v38 }
 0x855   : > { %v2965_v61 = vsel %vm964_vm3, %v6731_v55, -inf }
 0x856   : > { %2966 = vmax.xlane.f32.xlu1 %v2965_v61  ;;  %v2962_v43 = vsel %vm964_vm3, %v6733_v42, -inf }
 0x857   : > { %2963 = vmax.xlane.f32.xlu0 %v2962_v43  ;;  %v3556_v43 = vsel %vm461_vm1, %v3526_v33, 0.0 }
 0x85a   : > { %3470 = vadd.xlane.f32.xlu1 %v3469_v16 }
 0x878   : > { %v5108_v50 = vpop.f32.mrb[20].mxu0 }
 0x879   : > { %v2858_v41 = vpop.f32.mrb[21].mxu0  ;;  %v6753_v7 = vadd.f32 %v5108_v50, %v450_v15  ;;  %v3560_v50 = vmax.f32 %v3540_v45, 1e-24 }
 0x87a   : > { %v6740_v27 = vadd.f32 %v2858_v41, %v449_v38  ;;  %v3559_v41 = vmax.f32 %v3537_v3, 1e-24  ;;  %v6791_v3 = vpop.xlane.xlu0 %3467 }
 0x87b   : > { %v2977_v5 = vsel %vm964_vm3, %v6753_v7, -inf  ;;  %5757 = vrsqrt.f32 %v3560_v50 }
 0x87c   : > { %v2974_v37 = vsel %vm964_vm3, %v6740_v27, -inf  ;;  %5759 = vrsqrt.f32 %v3559_v41 }
 0x87d   : > { %2975 = vmax.xlane.f32.xlu1 %v2974_v37 }
 0x87e   : > { %v6744_v2 = vpop.f32.mrb[20].mxu1 }
 0x87f   : > { %v6746_v53 = vpop.f32.mrb[21].mxu1 }
 0x881   : > { %3554 = vadd.xlane.f32.xlu1 %v3553_v60 }
 0x885   : > { %3476 = vadd.xlane.f32.xlu1 %v3475_v21  ;;  %v3487_v21 = vmax.f32 %v3465_v39, 1e-24 }
 0x886   : > { %v5101_v54 = vpop.f32.mrb[22].mxu1 }
 0x887   : > { %v6750_v59 = vadd.f32 %v5101_v54, %v450_v15  ;;  %v2763_v44 = vpop.f32.mrb[23].mxu1  ;;  %5761 = vrsqrt.f32 %v3487_v21 }
 0x888   : > { %v6757_v17 = vadd.f32 %v2763_v44, %v449_v38  ;;  %v6787_v44 = vstv %s4768_s8 }
 0x889   : > { %3482 = vadd.xlane.f32.xlu1 %v3481_v8  ;;  %v2971_v57 = vsel %vm964_vm3, %v6750_v59, -inf }
 0x88a   : > { %2972 = vmax.xlane.f32.xlu0 %v2971_v57  ;;  %v2968_v23 = vsel %vm964_vm3, %v6757_v17, -inf }
 0x88e   : > { %2978 = vmax.xlane.f32.xlu0 %v2977_v5  ;;  %v5115_v9 = vpop.f32.mrb[24].mxu1 }
 0x88f   : > { %v6761_v62 = vadd.f32 %v5115_v9, %v450_v15  ;;  %v2953_v40 = vpop.f32.mrb[25].mxu1  ;;  %v5754_v15 = vpop.eup %5753 }
 0x890   : > { %v6763_v1 = vadd.f32 %v2953_v40, %v449_v38  ;;  %v3472_v38 = vsel %vm461_vm1, %v3446_v29, 0.0  ;;  %v5756_v61 = vpop.eup %5755  ;;  %v3578_v51 = vmul.f32 %v5754_v15, %v6005_v28  ;;  %v3484_v29 = vsel %vm461_vm1, %v3454_v52, 0.0  ;;  %v3549_v9 = vpop.xlane.xlu1 %3548 }
 0x891   : > { %v2983_v19 = vsel %vm964_vm3, %v6761_v62, -inf  ;;  %v3577_v16 = vmul.f32 %v5756_v61, %v5999_v25  ;;  %v5758_v22 = vpop.eup %5757 }
 0x892   : > { %2969 = vmax.xlane.f32.xlu0 %v2968_v23  ;;  %v5760_v33 = vpop.eup %5759  ;;  %v3576_v37 = vmul.f32 %v5758_v22, %v5993_v20  ;;  %v2980_v52 = vsel %vm964_vm3, %v6763_v1, -inf }
 0x893   : > { %v5558_v0 = vpack.i.bf16 %v3578_v51, %v3577_v16  ;;  %v3575_v60 = vmul.f32 %v5760_v33, %v5991_v18  ;;  %v5762_v45 = vpop.eup %5761 }
 0x894   : > { %v3503_v54 = vmul.f32 %v5762_v45, %v5991_v18 }
 0x895   : > { %v5553_v24 = vpack.i.bf16 %v3576_v37, %v3575_v60 }
 0x896   : > { %3551 = vadd.xlane.f32.xlu0 %v3550_v11  ;;  %v3585_v8 = vmul.f32 %v6787_v44, %v3503_v54 }
 0x89a   : > { %2984 = vmax.xlane.f32.xlu0 %v2983_v19  ;;  %5534 = vrot.lane.b32.xlu1 %v6189_v46, %s5886_s30 }
 0x89e   : > { %3473 = vadd.xlane.f32.xlu0 %v3472_v38  ;;  %5544 = vrot.lane.b32.xlu1 %v6194_v47, %s5886_s30 }
 0x8a2   : > { %3557 = vadd.xlane.f32.xlu0 %v3556_v43  ;;  %5549 = vrot.lane.b32.xlu1 %v6199_v48, %s5886_s30 }
 0x8a6   : > { %3479 = vadd.xlane.f32.xlu0 %v3478_v4  ;;  %5559 = vrot.lane.b32.xlu1 %v5558_v0, %s5884_s23  ;;  %v3563_v4 = vmax.f32 %v3549_v9, 1e-24 }
 0x8aa   : > { %3485 = vadd.xlane.f32.xlu0 %v3484_v29 }
 0x8c0   : > { %5539 = vrot.lane.b32.xlu0 %v6204_v49, %s5886_s30 }
 0x8c4   : > { %5554 = vrot.lane.b32.xlu0 %v5553_v24, %s5884_s23 }
 0x8ca   : > { %2981 = vmax.xlane.f32.xlu1 %v2980_v52 }
 0x8db   : > { %3595 = vrot.lane.b32.xlu1 %v3585_v8, %s5885_s25 }
 0x8e3   : > { %v6798_v18 = vpop.xlane.xlu1 %2966 }
 0x8e4   : > { %v2964_v57 = vpop.xlane.xlu0 %2963 }
 0x8e5   : > { %v2986_v14 = vsub.f32 %v6733_v42, %v2964_v57 }
 0x8e7   : > { %v2994_v5 = vmul.f32 1.442695, %v2986_v14  ;;  %v6800_v40 = vpop.xlane.xlu1 %3470 }
 0x8e9   : > { %5763 = vpow2.f32 %v2994_v5 }
 0x8ea   : > { %5765 = vrsqrt.f32 %v3563_v4 }
 0x8f3   : > { %v6794_v63 = vpop.eup %5763 }
 0x8f4   : > { %v3010_v30 = vsel %vm964_vm3, %v6794_v63, 0.0  ;;  %v5766_v52 = vpop.eup %5765 }
 0x8f5   : > { %v3579_v9 = vmul.f32 %v5766_v52, %v6003_v26 }
 0x8ff   : > { %3011 = vadd.xlane.f32.xlu1 %v3010_v30 }
 0x90a   : > { %v2976_v13 = vpop.xlane.xlu1 %2975 }
 0x90b   : > { %v2990_v43 = vsub.f32 %v6740_v27, %v2976_v13 }
 0x90d   : > { %v3002_v33 = vmul.f32 1.442695, %v2990_v43 }
 0x90e   : > { %v3555_v23 = vpop.xlane.xlu1 %3554 }
 0x90f   : > { %v3565_v14 = vmax.f32 %v3555_v23, 1e-24 }
 0x912   : > { %v6802_v11 = vpop.xlane.xlu1 %3476 }
 0x916   : > { %v6804_v19 = vpop.xlane.xlu1 %3482 }
 0x917   : > { %v6806_v42 = vpop.xlane.xlu0 %2972 }
 0x91a   : > { %v5535_v15 = vpop.permute.xlu1 %5534 }
 0x91b   : > { %v5537_v38 = vunpack.i.h.bf16 %v5535_v15  ;;  %v5536_v61 = vunpack.i.l.bf16 %v5535_v15  ;;  %v6808_v51 = vpop.xlane.xlu0 %2978 }
 0x91d   : > { %v5332_v16 = vpack.c.bf16 %v5537_v38, %v5536_v61 }
 0x91e   : > { %v5545_v0 = vpop.permute.xlu1 %5544 }
 0x91f   : > { %v5547_v29 = vunpack.i.h.bf16 %v5545_v0  ;;  %v5546_v50 = vunpack.i.l.bf16 %v5545_v0  ;;  %v2970_v41 = vpop.xlane.xlu0 %2969  ;;  %5333 = vmatprep.subr.bf16.mxu0 %v5332_v16 }
 0x920   : > { %v2988_v22 = vsub.f32 %v6757_v17, %v2970_v41  ;;  %5335 = vmatpush3.bf16.msra.mxu0 %v5332_v16 }
 0x921   : > { %v6812_v37 = vpack.c.bf16 %v5547_v29, %v5546_v50 }
 0x922   : > { %v2998_v60 = vmul.f32 1.442695, %v2988_v22  ;;  %v5550_v23 = vpop.permute.xlu1 %5549  ;;  %v2987_v22 = vsub.f32 %v6731_v55, %v6798_v18  ;;  %v2991_v18 = vsub.f32 %v6753_v7, %v6808_v51 }
 0x923   : > { %v3552_v39 = vpop.xlane.xlu0 %3551  ;;  %5341 = vmatprep.subr.bf16.mxu0 %v6812_v37  ;;  %v5552_v0 = vunpack.i.h.bf16 %v5550_v23  ;;  %v5551_v4 = vunpack.i.l.bf16 %v5550_v23 }
 0x924   : > { %5767 = vpow2.f32 %v2998_v60  ;;  %v3564_v27 = vmax.f32 %v3552_v39, 1e-24  ;;  %v2996_v52 = vmul.f32 1.442695, %v2987_v22 }
 0x925   : > { %5769 = vpow2.f32 %v3002_v33  ;;  %v6835_v39 = vpack.c.bf16 %v5552_v0, %v5551_v4  ;;  %v3489_v0 = vmax.f32 %v6800_v40, 1e-24 }
 0x926   : > { %5771 = vrsqrt.f32 %v3564_v27 }
 0x927   : > { %v2985_v24 = vpop.xlane.xlu0 %2984 }
 0x92b   : > { %v6815_v21 = vpop.xlane.xlu0 %3473 }
 0x92e   : > { %v6817_v45 = vpop.eup %5767 }
 0x92f   : > { %v6819_v17 = vpop.eup %5769  ;;  %v3558_v54 = vpop.xlane.xlu0 %3557  ;;  %v3016_v8 = vsel %vm964_vm3, %v6817_v45, 0.0 }
 0x930   : > { %v5772_v57 = vpop.eup %5771  ;;  %v3566_v5 = vmax.f32 %v3558_v54, 1e-24  ;;  %3017 = vadd.xlane.f32.xlu1 %v3016_v8  ;;  %v3022_v15 = vsel %vm964_vm3, %v6819_v17, 0.0  ;;  %v2989_v54 = vsub.f32 %v6750_v59, %v6806_v42  ;;  %v6847_v59 = vpop.permute.xlu1 %5559 }
 0x931   : > { %v3580_v30 = vmul.f32 %v5772_v57, %v6015_v31  ;;  %v3004_v57 = vmul.f32 1.442695, %v2991_v18 }
 0x932   : > { %5773 = vrsqrt.f32 %v3566_v5  ;;  %v3000_v55 = vmul.f32 1.442695, %v2989_v54 }
 0x933   : > { %v6825_v13 = vpop.xlane.xlu0 %3479  ;;  %v5563_v38 = vpack.i.bf16 %v3580_v30, %v3579_v9  ;;  %5775 = vrsqrt.f32 %v3565_v14  ;;  %v2993_v14 = vsub.f32 %v6761_v62, %v2985_v24 }
 0x934   : > { %3023 = vadd.xlane.f32.xlu1 %v3022_v15  ;;  %5777 = vpow2.f32 %v2996_v52 }
 0x935   : > { %5564 = vrot.lane.b32.xlu0 %v5563_v38, %s5884_s23  ;;  %5779 = vpow2.f32 %v3000_v55  ;;  %v3008_v5 = vmul.f32 1.442695, %v2993_v14 }
 0x936   : > { %5781 = vpow2.f32 %v3004_v57 }
 0x937   : > { %v6830_v61 = vpop.xlane.xlu0 %3485  ;;  %5783 = vpow2.f32 %v3008_v5 }
 0x938   : > { %v3494_v40 = vmax.f32 %v6830_v61, 1e-24 }
 0x93b   : > { %v5540_v43 = vpop.permute.xlu0 %5539 }
 0x93c   : > { %v5774_v16 = vpop.eup %5773  ;;  %v5542_v29 = vunpack.i.h.bf16 %v5540_v43  ;;  %v5541_v50 = vunpack.i.l.bf16 %v5540_v43  ;;  %v3488_v43 = vmax.f32 %v6791_v3, 1e-24 }
 0x93d   : > { %v5776_v41 = vpop.eup %5775  ;;  %v3582_v60 = vmul.f32 %v5774_v16, %v6031_v35 }
 0x93e   : > { %v5336_v33 = vpack.c.bf16 %v5542_v29, %v5541_v50  ;;  %v3581_v27 = vmul.f32 %v5776_v41, %v6021_v32  ;;  %v6845_v9 = vpop.eup %5777  ;;  %v3491_v29 = vmax.f32 %v6802_v11, 1e-24  ;;  %v3492_v50 = vmax.f32 %v6825_v13, 1e-24 }
 0x93f   : > { %v3013_v42 = vsel %vm964_vm3, %v6845_v9, 0.0  ;;  %v6851_v30 = vpop.eup %5779  ;;  %v3493_v41 = vmax.f32 %v6804_v19, 1e-24 }
 0x940   : > { %5337 = vmatprep.subr.bf16.mxu1 %v5336_v33  ;;  %v5568_v8 = vpack.i.bf16 %v3582_v60, %v3581_v27  ;;  %v3019_v7 = vsel %vm964_vm3, %v6851_v30, 0.0  ;;  %v6855_v51 = vpop.eup %5781 }
 0x941   : > { %5339 = vmatpush3.bf16.msra.mxu1 %v5336_v33  ;;  %v3025_v38 = vsel %vm964_vm3, %v6855_v51, 0.0  ;;  %v6860_v23 = vpop.eup %5783 }
 0x942   : > { %5345 = vmatprep.subr.bf16.mxu1 %v6835_v39  ;;  %v3031_v16 = vsel %vm964_vm3, %v6860_v23, 0.0 }
 0x945   : > { %5569 = vrot.lane.b32.xlu1 %v5568_v8, %s5884_s23 }
 0x954   : > { %3014 = vadd.xlane.f32.xlu0 %v3013_v42 }
 0x957   : > { %v2982_v15 = vpop.xlane.xlu1 %2981 }
 0x958   : > { %v2992_v62 = vsub.f32 %v6763_v1, %v2982_v15  ;;  %3020 = vadd.xlane.f32.xlu0 %v3019_v7  ;;  %v3490_v1 = vmax.f32 %v6815_v21, 1e-24 }
 0x95a   : > { %v3006_v24 = vmul.f32 1.442695, %v2992_v62 }
 0x95b   : > { %v3596_v5 = vpop.permute.xlu1 %3595 }
 0x95c   : > { %5785 = vpow2.f32 %v3006_v24  ;;  %3026 = vadd.xlane.f32.xlu0 %v3025_v38 }
 0x95d   : > { %5787 = vrsqrt.f32 %v3488_v43 }
 0x95e   : > { %5789 = vrsqrt.f32 %v3489_v0 }
 0x95f   : > { %5791 = vrsqrt.f32 %v3490_v1 }
 0x960   : > { %3032 = vadd.xlane.f32.xlu0 %v3031_v16  ;;  %5793 = vrsqrt.f32 %v3491_v29 }
 0x961   : > { %5795 = vrsqrt.f32 %v3492_v50 }
 0x962   : > { %5797 = vrsqrt.f32 %v3493_v41 }
 0x963   : > { %5799 = vrsqrt.f32 %v3494_v40  ;;  %v5562_v40 = vunpack.i.h.bf16 %v6847_v59 }
 0x966   : > { %v6867_v4 = vpop.eup %5785 }
 0x967   : > { %v3028_v3 = vsel %vm964_vm3, %v6867_v4, 0.0  ;;  %v5788_v22 = vpop.eup %5787 }
 0x968   : > { %v5790_v21 = vpop.eup %5789  ;;  %v3504_v33 = vmul.f32 %v5788_v22, %v5993_v20  ;;  %v5561_v22 = vunpack.i.l.bf16 %v6847_v59 }
 0x969   : > { %3029 = vadd.xlane.f32.xlu1 %v3028_v3  ;;  %v5792_v11 = vpop.eup %5791  ;;  %v3505_v27 = vmul.f32 %v5790_v21, %v5999_v25 }
 0x96a   : > { %v5794_v60 = vpop.eup %5793  ;;  %v3586_v13 = vmul.f32 %v6787_v44, %v3504_v33  ;;  %v3506_v52 = vmul.f32 %v5792_v11, %v6005_v28 }
 0x96b   : > { %v5796_v54 = vpop.eup %5795  ;;  %v3587_v61 = vmul.f32 %v6787_v44, %v3505_v27  ;;  %v3507_v55 = vmul.f32 %v5794_v60, %v6003_v26  ;;  %v5354_v60 = vpack.c.bf16 %v5562_v40, %v5561_v22 }
 0x96c   : > { %v5798_v19 = vpop.eup %5797  ;;  %v3588_v8 = vmul.f32 %v6787_v44, %v3506_v52  ;;  %v3508_v20 = vmul.f32 %v5796_v54, %v6015_v31 }
 0x96d   : > { %v5800_v18 = vpop.eup %5799  ;;  %v3589_v25 = vmul.f32 %v6787_v44, %v3507_v55  ;;  %v3509_v57 = vmul.f32 %v5798_v19, %v6021_v32 }
 0x96e   : > { %v3590_v28 = vmul.f32 %v6787_v44, %v3508_v20  ;;  %v3510_v14 = vmul.f32 %v5800_v18, %v6031_v35 }
 0x96f   : > { %v3591_v26 = vmul.f32 %v6787_v44, %v3509_v57 }
 0x970   : > { %v3592_v31 = vmul.f32 %v6787_v44, %v3510_v14  ;;  %v5555_v44 = vpop.permute.xlu0 %5554 }
 0x971   : > { %v5557_v1 = vunpack.i.h.bf16 %v5555_v44  ;;  %v5556_v29 = vunpack.i.l.bf16 %v5555_v44 }
 0x973   : > { %v5348_v21 = vpack.c.bf16 %v5557_v1, %v5556_v29 }
 0x976   : > { %3597 = vrot.lane.b32.xlu0 %v3586_v13, %s5885_s25 }
 0x97a   : > { %3690 = vrot.lane.b32.xlu0 %v3587_v61, %s5885_s25  ;;  %3692 = vrot.lane.b32.xlu1 %v3588_v8, %s5885_s25 }
 0x97e   : > { %3785 = vrot.lane.b32.xlu0 %v3589_v25, %s5885_s25  ;;  %3787 = vrot.lane.b32.xlu1 %v3590_v28, %s5885_s25 }
 0x982   : > { %3880 = vrot.lane.b32.xlu0 %v3591_v26, %s5885_s25  ;;  %3882 = vrot.lane.b32.xlu1 %v3592_v31, %s5885_s25 }
 0x98c   : > { %v3012_v42 = vpop.xlane.xlu1 %3011 }
 0x98d   : > { %5801 = vrcp.f32 %v3012_v42 }
 0x997   : > { %v5802_v15 = vpop.eup %5801 }
 0x998   : > { %v3042_v32 = vmul.f32 %v5802_v15, %v6794_v63  ;;  %v451_v15 = vld [vmem:[%s7113_s4 + $0x30] sm:$0xff] }
 0x99a   : > { %5120 = vmatprep.mubr.msk.f32.mxu0 %vm964_vm3, %v3042_v32 }
 0x9a7   : > { %v5565_v24 = vpop.permute.xlu0 %5564 }
 0x9a8   : > { %v5567_v13 = vunpack.i.h.bf16 %v5565_v24  ;;  %v5566_v59 = vunpack.i.l.bf16 %v5565_v24 }
 0x9bd   : > { %v3018_v35 = vpop.xlane.xlu1 %3017 }
 0x9be   : > { %5803 = vrcp.f32 %v3018_v35 }
 0x9c1   : > { %v3024_v38 = vpop.xlane.xlu1 %3023 }
 0x9c2   : > { %5805 = vrcp.f32 %v3024_v38 }
 0x9c8   : > { %v5804_v7 = vpop.eup %5803 }
 0x9c9   : > { %v3044_v62 = vmul.f32 %v5804_v7, %v6817_v45 }
 0x9cb   : > { %5127 = vmatprep.mubr.msk.f32.mxu1 %vm964_vm3, %v3044_v62 }
 0x9cc   : > { %v5806_v63 = vpop.eup %5805 }
 0x9cd   : > { %v3046_v45 = vmul.f32 %v5806_v63, %v6819_v17 }
 0x9e1   : > { %v3015_v43 = vpop.xlane.xlu0 %3014 }
 0x9e2   : > { %5807 = vrcp.f32 %v3015_v43 }
 0x9e5   : > { %v3021_v16 = vpop.xlane.xlu0 %3020 }
 0x9e6   : > { %5809 = vrcp.f32 %v3021_v16 }
 0x9e9   : > { %v3027_v0 = vpop.xlane.xlu0 %3026 }
 0x9ea   : > { %5811 = vrcp.f32 %v3027_v0 }
 0x9ec   : > { %v5808_v50 = vpop.eup %5807 }
 0x9ed   : > { %v3043_v3 = vmul.f32 %v5808_v50, %v6845_v9  ;;  %v3033_v41 = vpop.xlane.xlu0 %3032  ;;  %v5570_v9 = vpop.permute.xlu1 %5569 }
 0x9ee   : > { %5813 = vrcp.f32 %v3033_v41  ;;  %v5572_v61 = vunpack.i.h.bf16 %v5570_v9  ;;  %v5571_v8 = vunpack.i.l.bf16 %v5570_v9 }
 0x9ef   : > { %5121 = vmatmul.mubr.msk.f32.vlgmr.msra.gmra.mrb[22].mxu0 %vm964_vm3, %v3043_v3 }
 0x9f0   : > { %v5810_v33 = vpop.eup %5809  ;;  %5343 = vmatpush3.bf16.msra.mxu0 %v6812_v37  ;;  %5134 = vmatprep.mubr.msk.f32.mxu0 %vm964_vm3, %v3046_v45  ;;  %v5366_v25 = vpack.c.bf16 %v5572_v61, %v5571_v8 }
 0x9f1   : > { %v3045_v11 = vmul.f32 %v5810_v33, %v6851_v30  ;;  %5350 = vmatprep.subr.msk.bf16.mxu0 %vm6133_vm2, %v5348_v21  ;;  %v3598_v27 = vpop.permute.xlu0 %3597  ;;  %v5360_v30 = vpack.c.bf16 %v5567_v13, %v5566_v59 }
 0x9f3   : > { %5128 = vmatmul.mubr.msk.f32.vlgmr.msra.gmra.mrb[26].mxu1 %vm964_vm3, %v3045_v11 }
 0x9f4   : > { %v5812_v17 = vpop.eup %5811  ;;  %5347 = vmatpush3.bf16.msra.mxu1 %v6835_v39 }
 0x9f5   : > { %v3047_v52 = vmul.f32 %v5812_v17, %v6855_v51  ;;  %5356 = vmatprep.subr.msk.bf16.mxu1 %vm6133_vm2, %v5354_v60  ;;  %v3691_v54 = vpop.permute.xlu0 %3690 }
 0x9f6   : > { %v3030_v37 = vpop.xlane.xlu1 %3029 }
 0x9f7   : > { %5815 = vrcp.f32 %v3030_v37  ;;  %5135 = vmatmul.mubr.msk.f32.vlgmr.msra.gmra.mrb[24].mxu0 %vm964_vm3, %v3047_v52 }
 0x9f8   : > { %5148 = vmatprep.mubr.msk.f32.mxu0 %vm461_vm1, %v3596_v5  ;;  %v5814_v39 = vpop.eup %5813 }
 0x9f9   : > { %5353 = vmatpush3.bf16.xpose.msk.msra.mxu0 %vm6133_vm2, %v5348_v21  ;;  %v3786_v51 = vpop.permute.xlu0 %3785  ;;  %v3049_v18 = vmul.f32 %v5814_v39, %v6860_v23 }
 0x9fa   : > { %5362 = vmatprep.subr.msk.bf16.mxu0 %vm6133_vm2, %v5360_v30  ;;  %v3693_v55 = vpop.permute.xlu1 %3692 }
 0x9fd   : > { %v3881_v57 = vpop.permute.xlu0 %3880 }
 0x9fe   : > { %v3788_v28 = vpop.permute.xlu1 %3787 }
 0xa00   : > { %5149 = vmatmul.mubr.msk.f32.vlgmr.msra.gmra.mrb[26].mxu0 %vm461_vm1, %v3598_v27 }
 0xa01   : > { %v5816_v19 = vpop.eup %5815  ;;  %5365 = vmatpush3.bf16.xpose.msk.msra.mxu0 %vm6133_vm2, %v5360_v30  ;;  %5162 = vmatprep.mubr.msk.f32.mxu0 %vm461_vm1, %v3786_v51 }
 0xa02   : > { %v3048_v20 = vmul.f32 %v5816_v19, %v6867_v4  ;;  %v3883_v23 = vpop.permute.xlu1 %3882 }
 0xa04   : > { %5141 = vmatprep.mubr.msk.f32.mxu1 %vm964_vm3, %v3048_v20 }
 0xa05   : > { %5142 = vmatmul.mubr.msk.f32.vlgmr.msra.gmra.mrb[28].mxu1 %vm964_vm3, %v3049_v18 }
 0xa06   : > { %5359 = vmatpush3.bf16.xpose.msk.msra.mxu1 %vm6133_vm2, %v5354_v60  ;;  %5155 = vmatprep.mubr.msk.f32.mxu1 %vm461_vm1, %v3691_v54 }
 0xa07   : > { %5368 = vmatprep.subr.msk.bf16.mxu1 %vm6133_vm2, %v5366_v25 }
 0xa08   : > { %5163 = vmatmul.mubr.msk.f32.vlgmr.msra.gmra.mrb[28].mxu0 %vm461_vm1, %v3788_v28 }
 0xa0d   : > { %5156 = vmatmul.mubr.msk.f32.vlgmr.msra.gmra.mrb[30].mxu1 %vm461_vm1, %v3693_v55 }
 0xa0e   : > { %5371 = vmatpush3.bf16.xpose.msk.msra.mxu1 %vm6133_vm2, %v5366_v25  ;;  %5169 = vmatprep.mubr.msk.f32.mxu1 %vm461_vm1, %v3881_v57 }
 0xa15   : > { %5170 = vmatmul.mubr.msk.f32.vlgmr.msra.gmra.mrb[32].mxu1 %vm461_vm1, %v3883_v23 }
 0xac2   : > { %v6940_v4 = vpop.f32.mrb[22].mxu0 }
 0xac3   : > { %v6942_v14 = vpop.f32.mrb[23].mxu0 }
 0xac6   : > { %v6944_v26 = vpop.f32.mrb[26].mxu1 }
 0xac7   : > { %v6946_v31 = vpop.f32.mrb[27].mxu1 }
 0xaca   : > { %v6948_v5 = vpop.f32.mrb[24].mxu0 }
 0xacb   : > { %v6950_v42 = vpop.f32.mrb[25].mxu0 }
 0xad3   : > { %v5150_v32 = vpop.f32.mrb[26].mxu0 }
 0xad4   : > { %v3685_v35 = vadd.f32 %v5150_v32, %v452_v12  ;;  %v3679_v7 = vpop.f32.mrb[27].mxu0 }
 0xad5   : > { %v3680_v62 = vadd.f32 %v3679_v7, %v451_v15 }
 0xad6   : > { %v3976_v44 = vsel %vm964_vm3, %v3685_v35, -inf }
 0xad7   : > { %3977 = vmax.xlane.f32.xlu1 %v3976_v44  ;;  %v3973_v24 = vsel %vm964_vm3, %v3680_v62, -inf }
 0xad8   : > { %3974 = vmax.xlane.f32.xlu0 %v3973_v24  ;;  %v6960_v38 = vpop.f32.mrb[28].mxu1 }
 0xad9   : > { %v6962_v43 = vpop.f32.mrb[29].mxu1 }
 0xadb   : > { %v5164_v16 = vpop.f32.mrb[28].mxu0 }
 0xadc   : > { %v3869_v0 = vpop.f32.mrb[29].mxu0  ;;  %v3875_v40 = vadd.f32 %v5164_v16, %v452_v12 }
 0xadd   : > { %v3870_v63 = vadd.f32 %v3869_v0, %v451_v15 }
 0xade   : > { %v3988_v17 = vsel %vm964_vm3, %v3875_v40, -inf }
 0xadf   : > { %v3985_v1 = vsel %vm964_vm3, %v3870_v63, -inf }
 0xae0   : > { %3986 = vmax.xlane.f32.xlu1 %v3985_v1  ;;  %v5157_v29 = vpop.f32.mrb[30].mxu1 }
 0xae1   : > { %v3774_v50 = vpop.f32.mrb[31].mxu1  ;;  %v3780_v41 = vadd.f32 %v5157_v29, %v452_v12 }
 0xae2   : > { %v3775_v3 = vadd.f32 %v3774_v50, %v451_v15 }
 0xae3   : > { %v3982_v21 = vsel %vm964_vm3, %v3780_v41, -inf }
 0xae4   : > { %v3979_v45 = vsel %vm964_vm3, %v3775_v3, -inf }
 0xae5   : > { %3980 = vmax.xlane.f32.xlu0 %v3979_v45 }
 0xae8   : > { %v5171_v22 = vpop.f32.mrb[32].mxu1 }
 0xae9   : > { %v3964_v33 = vpop.f32.mrb[33].mxu1  ;;  %3983 = vmax.xlane.f32.xlu0 %v3982_v21  ;;  %v3970_v9 = vadd.f32 %v5171_v22, %v452_v12 }
 0xaea   : > { %v6967_v11 = vadd.f32 %v3964_v33, %v451_v15 }
 0xaeb   : > { %v3994_v13 = vsel %vm964_vm3, %v3970_v9, -inf }
 0xaec   : > { %v3991_v60 = vsel %vm964_vm3, %v6967_v11, -inf }
 0xaed   : > { %3992 = vmax.xlane.f32.xlu1 %v3991_v60  ;;  %3989 = vmax.xlane.f32.xlu0 %v3988_v17 }
 0xaf1   : > { %3995 = vmax.xlane.f32.xlu0 %v3994_v13 }
 0xafe   : > { %5574 = vrot.lane.b32.xlu1 %v6189_v46, %s5887_s13 }
 0xb64   : > { %v3978_v59 = vpop.xlane.xlu1 %3977 }
 0xb65   : > { %v3998_v27 = vsub.f32 %v3685_v35, %v3978_v59  ;;  %v3975_v52 = vpop.xlane.xlu0 %3974 }
 0xb66   : > { %v3997_v37 = vsub.f32 %v3680_v62, %v3975_v52 }
 0xb67   : > { %v4007_v30 = vmul.f32 1.442695, %v3998_v27 }
 0xb68   : > { %v4005_v54 = vmul.f32 1.442695, %v3997_v37 }
 0xb69   : > { %5817 = vpow2.f32 %v4007_v30 }
 0xb6a   : > { %5819 = vpow2.f32 %v4005_v54 }
 0xb6d   : > { %v3987_v39 = vpop.xlane.xlu1 %3986 }
 0xb6e   : > { %v4001_v51 = vsub.f32 %v3870_v63, %v3987_v39 }
 0xb70   : > { %v4013_v46 = vmul.f32 1.442695, %v4001_v51 }
 0xb72   : > { %v3981_v19 = vpop.xlane.xlu0 %3980 }
 0xb73   : > { %v6975_v61 = vpop.eup %5817  ;;  %v3999_v8 = vsub.f32 %v3775_v3, %v3981_v19 }
 0xb74   : > { %v6977_v55 = vpop.eup %5819  ;;  %v4024_v20 = vsel %vm964_vm3, %v6975_v61, 0.0 }
 0xb75   : > { %v4009_v18 = vmul.f32 1.442695, %v3999_v8  ;;  %4025 = vadd.xlane.f32.xlu0 %v4024_v20  ;;  %v4021_v25 = vsel %vm964_vm3, %v6977_v55, 0.0 }
 0xb76   : > { %4022 = vadd.xlane.f32.xlu1 %v4021_v25  ;;  %v3984_v28 = vpop.xlane.xlu0 %3983 }
 0xb77   : > { %5821 = vpow2.f32 %v4009_v18  ;;  %v4000_v57 = vsub.f32 %v3780_v41, %v3984_v28 }
 0xb78   : > { %5823 = vpow2.f32 %v4013_v46 }
 0xb79   : > { %v4011_v23 = vmul.f32 1.442695, %v4000_v57 }
 0xb7a   : > { %v3993_v12 = vpop.xlane.xlu1 %3992  ;;  %v3990_v15 = vpop.xlane.xlu0 %3989 }
 0xb7b   : > { %5825 = vpow2.f32 %v4011_v23  ;;  %v4002_v32 = vsub.f32 %v3875_v40, %v3990_v15 }
 0xb7d   : > { %v4015_v35 = vmul.f32 1.442695, %v4002_v32 }
 0xb7e   : > { %v5575_v7 = vpop.permute.xlu1 %5574  ;;  %v3996_v62 = vpop.xlane.xlu0 %3995 }
 0xb7f   : > { %v5577_v44 = vunpack.i.h.bf16 %v5575_v7  ;;  %v5576_v24 = vunpack.i.l.bf16 %v5575_v7  ;;  %v4004_v16 = vsub.f32 %v3970_v9, %v3996_v62  ;;  %5827 = vpow2.f32 %v4015_v35 }
 0xb80   : > { %v4003_v9 = vsub.f32 %v6967_v11, %v3993_v12 }
 0xb81   : > { %v6983_v0 = vpop.eup %5821  ;;  %v5372_v63 = vpack.c.bf16 %v5577_v44, %v5576_v24  ;;  %v4019_v1 = vmul.f32 1.442695, %v4004_v16 }
 0xb82   : > { %v4027_v29 = vsel %vm964_vm3, %v6983_v0, 0.0  ;;  %v6987_v50 = vpop.eup %5823  ;;  %v4017_v60 = vmul.f32 1.442695, %v4003_v9 }
 0xb83   : > { %5829 = vpow2.f32 %v4019_v1  ;;  %5373 = vmatprep.subr.bf16.mxu0 %v5372_v63  ;;  %4028 = vadd.xlane.f32.xlu1 %v4027_v29  ;;  %v4033_v41 = vsel %vm964_vm3, %v6987_v50, 0.0 }
 0xb84   : > { %5375 = vmatpush3.bf16.msra.mxu0 %v5372_v63  ;;  %5831 = vpow2.f32 %v4017_v60 }
 0xb85   : > { %v6989_v3 = vpop.eup %5825 }
 0xb86   : > { %v4030_v45 = vsel %vm964_vm3, %v6989_v3, 0.0 }
 0xb87   : > { %4034 = vadd.xlane.f32.xlu1 %v4033_v41  ;;  %4031 = vadd.xlane.f32.xlu0 %v4030_v45  ;;  %v4460_v41 = vld [vmem:[%s7114_s5 + $0x10] sm:$0xff] }
 0xb89   : > { %v6995_v40 = vpop.eup %5827 }
 0xb8a   : > { %v4036_v22 = vsel %vm964_vm3, %v6995_v40, 0.0 }
 0xb8b   : > { %4037 = vadd.xlane.f32.xlu0 %v4036_v22 }
 0xb8d   : > { %v6999_v21 = vpop.eup %5829 }
 0xb8e   : > { %v4042_v33 = vsel %vm964_vm3, %v6999_v21, 0.0  ;;  %v7012_v17 = vpop.eup %5831 }
 0xb8f   : > { %4043 = vadd.xlane.f32.xlu0 %v4042_v33 }
 0xb98   : > { %5584 = vrot.lane.b32.xlu1 %v6194_v47, %s5887_s13  ;;  %v4039_v47 = vsel %vm964_vm3, %v7012_v17, 0.0 }
 0xba5   : > { %5579 = vrot.lane.b32.xlu0 %v6204_v49, %s5887_s13 }
 0xba9   : > { %2395 = vrot.lane.b32.xlu0 %v6715_v56, %s5888_s14 }
 0xbad   : > { %3406 = vrot.lane.b32.xlu0 %v6942_v14, %s5889_s15 }
 0xbb1   : > { %2399 = vrot.lane.b32.xlu0 %v6719_v6, %s5888_s14 }
 0xbb5   : > { %3410 = vrot.lane.b32.xlu0 %v6946_v31, %s5889_s15 }
 0xbb9   : > { %2403 = vrot.lane.b32.xlu0 %v6723_v58, %s5888_s14 }
 0xbbc   : > { %4040 = vadd.xlane.f32.xlu1 %v4039_v47 }
 0xbbd   : > { %3414 = vrot.lane.b32.xlu0 %v6950_v42, %s5889_s15 }
 0xbc1   : > { %2407 = vrot.lane.b32.xlu0 %v6746_v53, %s5888_s14 }
 0xbc5   : > { %3418 = vrot.lane.b32.xlu0 %v6962_v43, %s5889_s15 }
 0xbcd   : > { %5589 = vrot.lane.b32.xlu1 %v6199_v48, %s5887_s13 }
 0xbd1   : > { %2397 = vrot.lane.b32.xlu1 %v6713_v34, %s5888_s14 }
 0xbd5   : > { %3408 = vrot.lane.b32.xlu1 %v6940_v4, %s5889_s15 }
 0xbd9   : > { %2401 = vrot.lane.b32.xlu1 %v6717_v10, %s5888_s14 }
 0xbdd   : > { %3412 = vrot.lane.b32.xlu1 %v6944_v26, %s5889_s15 }
 0xbe1   : > { %2405 = vrot.lane.b32.xlu1 %v6721_v36, %s5888_s14 }
 0xbe5   : > { %3416 = vrot.lane.b32.xlu1 %v6948_v5, %s5889_s15 }
 0xbe9   : > { %2409 = vrot.lane.b32.xlu1 %v6744_v2, %s5888_s14 }
 0xbed   : > { %3420 = vrot.lane.b32.xlu1 %v6960_v38, %s5889_s15 }
 0xc02   : > { %v4026_v49 = vpop.xlane.xlu0 %4025 }
 0xc03   : > { %5833 = vrcp.f32 %v4026_v49  ;;  %v4023_v56 = vpop.xlane.xlu1 %4022 }
 0xc04   : > { %5835 = vrcp.f32 %v4023_v56 }
 0xc0d   : > { %v5834_v48 = vpop.eup %5833 }
 0xc0e   : > { %v5836_v34 = vpop.eup %5835  ;;  %v4054_v10 = vmul.f32 %v5834_v48, %v6975_v61 }
 0xc0f   : > { %v4053_v6 = vmul.f32 %v5836_v34, %v6977_v55 }
 0xc10   : > { %v4029_v58 = vpop.xlane.xlu1 %4028 }
 0xc11   : > { %5837 = vrcp.f32 %v4029_v58  ;;  %5176 = vmatprep.mubr.msk.f32.mxu0 %vm964_vm3, %v4053_v6 }
 0xc12   : > { %5177 = vmatmul.mubr.msk.f32.vlgmr.msra.gmra.mrb[30].mxu0 %vm964_vm3, %v4054_v10 }
 0xc14   : > { %v4035_v36 = vpop.xlane.xlu1 %4034  ;;  %v4032_v2 = vpop.xlane.xlu0 %4031 }
 0xc15   : > { %5839 = vrcp.f32 %v4035_v36 }
 0xc18   : > { %v5585_v53 = vpop.permute.xlu1 %5584  ;;  %v4038_v26 = vpop.xlane.xlu0 %4037 }
 0xc19   : > { %v5587_v4 = vunpack.i.h.bf16 %v5585_v53  ;;  %v5586_v14 = vunpack.i.l.bf16 %v5585_v53  ;;  %5841 = vrcp.f32 %v4038_v26 }
 0xc1a   : > { %5843 = vrcp.f32 %v4032_v2 }
 0xc1b   : > { %v5838_v31 = vpop.eup %5837  ;;  %v5380_v5 = vpack.c.bf16 %v5587_v4, %v5586_v14 }
 0xc1c   : > { %v4055_v42 = vmul.f32 %v5838_v31, %v6983_v0  ;;  %v4044_v38 = vpop.xlane.xlu0 %4043 }
 0xc1d   : > { %5381 = vmatprep.subr.bf16.mxu0 %v5380_v5  ;;  %5845 = vrcp.f32 %v4044_v38 }
 0xc1e   : > { %5183 = vmatprep.mubr.msk.f32.mxu1 %vm964_vm3, %v4055_v42  ;;  %5383 = vmatpush3.bf16.msra.mxu0 %v5380_v5 }
 0xc1f   : > { %v5840_v43 = vpop.eup %5839 }
 0xc20   : > { %v4057_v11 = vmul.f32 %v5840_v43, %v6987_v50  ;;  %v5580_v13 = vpop.permute.xlu0 %5579  ;;  %v4458_v50 = vld [vmem:[%s7114_s5] sm:$0xff] }
 0xc21   : > { %v5582_v59 = vunpack.i.h.bf16 %v5580_v13  ;;  %v5581_v27 = vunpack.i.l.bf16 %v5580_v13 }
 0xc22   : > { %5190 = vmatprep.mubr.msk.f32.mxu0 %vm964_vm3, %v4057_v11  ;;  %v4793_v11 = vld [vmem:[%s7115_s6] ss:$0 sm:$0xff] }
 0xc23   : > { %v5842_v52 = vpop.eup %5841  ;;  %v5376_v37 = vpack.c.bf16 %v5582_v59, %v5581_v27 }
 0xc24   : > { %v5844_v30 = vpop.eup %5843  ;;  %v4058_v54 = vmul.f32 %v5842_v52, %v6995_v40  ;;  %v2396_v39 = vpop.permute.xlu0 %2395  ;;  %v4461_v40 = vld [vmem:[%s7114_s5 + $0x18] sm:$0xff] }
 0xc25   : > { %2420 = vst.msk [vmem:[#allocation2] sm:$0xff] %vm2419_vm4, %v2396_v39  ;;  %5377 = vmatprep.subr.bf16.mxu1 %v5376_v37  ;;  %v4056_v51 = vmul.f32 %v5844_v30, %v6989_v3  ;;  %v4459_v3 = vld [vmem:[%s7114_s5 + $0x8] sm:$0xff]  ;;  %v5392_v22 = vpack.c.bf16 %v4461_v40, %v4460_v41 }
 0xc26   : > { %5379 = vmatpush3.bf16.msra.mxu1 %v5376_v37  ;;  %5191 = vmatmul.mubr.msk.f32.vlgmr.msra.gmra.mrb[32].mxu0 %vm964_vm3, %v4058_v54  ;;  %v5388_v45 = vpack.c.bf16 %v4459_v3, %v4458_v50 }
 0xc27   : > { %v5846_v32 = vpop.eup %5845 }
 0xc28   : > { %v3407_v19 = vpop.permute.xlu0 %3406  ;;  %v4060_v44 = vmul.f32 %v5846_v32, %v6999_v21  ;;  %5389 = vmatprep.subr.bf16.mxu0 %v5388_v45 }
 0xc29   : > { %3431 = vst.msk [vmem:[#allocation2] sm:$0xff] %vm3430_vm5, %v3407_v19  ;;  %5184 = vmatmul.mubr.msk.f32.vlgmr.msra.gmra.mrb[34].mxu1 %vm964_vm3, %v4056_v51  ;;  %5391 = vmatpush3.bf16.msra.mxu0 %v5388_v45 }
 0xc2a   : > { %5393 = vmatprep.subr.bf16.mxu0 %v5392_v22 }
 0xc2c   : > { %v2400_v61 = vpop.permute.xlu0 %2399 }
 0xc2d   : > { %2422 = vst.msk [vmem:[#allocation2 + $0x10] sm:$0xff] %vm2419_vm4, %v2400_v61  ;;  %5395 = vmatpush3.bf16.msra.mxu0 %v5392_v22 }
 0xc30   : > { %v3411_v8 = vpop.permute.xlu0 %3410 }
 0xc31   : > { %3433 = vst.msk [vmem:[#allocation2 + $0x10] sm:$0xff] %vm3430_vm5, %v3411_v8 }
 0xc34   : > { %v2404_v55 = vpop.permute.xlu0 %2403 }
 0xc35   : > { %2424 = vst.msk [vmem:[#allocation2 + $0x20] sm:$0xff] %vm2419_vm4, %v2404_v55 }
 0xc38   : > { %v3415_v20 = vpop.permute.xlu0 %3414 }
 0xc39   : > { %3435 = vst.msk [vmem:[#allocation2 + $0x20] sm:$0xff] %vm3430_vm5, %v3415_v20 }
 0xc3c   : > { %v2408_v46 = vpop.permute.xlu0 %2407 }
 0xc3d   : > { %2426 = vst.msk [vmem:[#allocation2 + $0x30] sm:$0xff] %vm2419_vm4, %v2408_v46 }
 0xc40   : > { %v3419_v18 = vpop.permute.xlu0 %3418 }
 0xc41   : > { %3437 = vst.msk [vmem:[#allocation2 + $0x30] sm:$0xff] %vm3430_vm5, %v3419_v18 }
 0xc49   : > { %v4041_v25 = vpop.xlane.xlu1 %4040 }
 0xc4a   : > { %5847 = vrcp.f32 %v4041_v25 }
 0xc4d   : > { %v5590_v28 = vpop.permute.xlu1 %5589 }
 0xc4e   : > { %v5592_v57 = vunpack.i.h.bf16 %v5590_v28  ;;  %v5591_v23 = vunpack.i.l.bf16 %v5590_v28 }
 0xc50   : > { %v5384_v12 = vpack.c.bf16 %v5592_v57, %v5591_v23 }
 0xc51   : > { %v2398_v15 = vpop.permute.xlu1 %2397 }
 0xc52   : > { %2421 = vst.msk [vmem:[#allocation2 + $0x8] sm:$0xff] %vm2419_vm4, %v2398_v15  ;;  %5385 = vmatprep.subr.bf16.mxu1 %v5384_v12 }
 0xc53   : > { %5387 = vmatpush3.bf16.msra.mxu1 %v5384_v12 }
 0xc54   : > { %v5848_v35 = vpop.eup %5847 }
 0xc55   : > { %v3409_v7 = vpop.permute.xlu1 %3408  ;;  %v4059_v62 = vmul.f32 %v5848_v35, %v7012_v17 }
 0xc56   : > { %3432 = vst.msk [vmem:[#allocation2 + $0x8] sm:$0xff] %vm3430_vm5, %v3409_v7 }
 0xc57   : > { %5197 = vmatprep.mubr.msk.f32.mxu1 %vm964_vm3, %v4059_v62 }
 0xc58   : > { %5198 = vmatmul.mubr.msk.f32.vlgmr.msra.gmra.mrb[36].mxu1 %vm964_vm3, %v4060_v44 }
 0xc59   : > { %v2402_v24 = vpop.permute.xlu1 %2401 }
 0xc5a   : > { %2423 = vst.msk [vmem:[#allocation2 + $0x18] sm:$0xff] %vm2419_vm4, %v2402_v24 }
 0xc5d   : > { %v3413_v16 = vpop.permute.xlu1 %3412 }
 0xc5e   : > { %3434 = vst.msk [vmem:[#allocation2 + $0x18] sm:$0xff] %vm3430_vm5, %v3413_v16 }
 0xc61   : > { %v2406_v0 = vpop.permute.xlu1 %2405 }
 0xc62   : > { %2425 = vst.msk [vmem:[#allocation2 + $0x28] sm:$0xff] %vm2419_vm4, %v2406_v0 }
 0xc65   : > { %v3417_v63 = vpop.permute.xlu1 %3416 }
 0xc66   : > { %3436 = vst.msk [vmem:[#allocation2 + $0x28] sm:$0xff] %vm3430_vm5, %v3417_v63 }
 0xc69   : > { %v2410_v1 = vpop.permute.xlu1 %2409 }
 0xc6a   : > { %2427 = vst.msk [vmem:[#allocation2 + $0x38] sm:$0xff] %vm2419_vm4, %v2410_v1 }
 0xc6d   : > { %v3421_v29 = vpop.permute.xlu1 %3420 }
 0xc6e   : > { %3438 = vst.msk [vmem:[#allocation2 + $0x38] sm:$0xff] %vm3430_vm5, %v3421_v29 }
 0xce5   : > { %v5178_v21 = vpop.f32.mrb[30].mxu0 }
 0xce6   : > { %4419 = vrot.lane.b32.xlu1 %v5178_v21, %s5890_s27  ;;  %v4139_v33 = vpop.f32.mrb[31].mxu0 }
 0xce7   : > { %4417 = vrot.lane.b32.xlu0 %v4139_v33, %s5890_s27 }
 0xcf9   : > { %v5192_v9 = vpop.f32.mrb[32].mxu0 }
 0xcfa   : > { %v4313_v60 = vpop.f32.mrb[33].mxu0 }
 0xcfc   : > { %v5185_v17 = vpop.f32.mrb[34].mxu1 }
 0xcfd   : > { %4423 = vrot.lane.b32.xlu1 %v5185_v17, %s5890_s27  ;;  %v4226_v47 = vpop.f32.mrb[35].mxu1 }
 0xcfe   : > { %4421 = vrot.lane.b32.xlu0 %v4226_v47, %s5890_s27 }
 0xd01   : > { %4427 = vrot.lane.b32.xlu1 %v5192_v9, %s5890_s27 }
 0xd02   : > { %4425 = vrot.lane.b32.xlu0 %v4313_v60, %s5890_s27 }
 0xd2b   : > { %v5199_v49 = vpop.f32.mrb[36].mxu1 }
 0xd2c   : > { %4431 = vrot.lane.b32.xlu1 %v5199_v49, %s5890_s27  ;;  %v4400_v56 = vpop.f32.mrb[37].mxu1 }
 0xd2d   : > { %4429 = vrot.lane.b32.xlu0 %v4400_v56, %s5890_s27 }
 0xd58   : > { %v4420_v48 = vpop.permute.xlu1 %4419 }
 0xd59   : > { %4443 = vst.msk [vmem:[#allocation2 + $0x8] sm:$0xff] %vm4441_vm6, %v4420_v48  ;;  %v4418_v34 = vpop.permute.xlu0 %4417 }
 0xd5a   : > { %4442 = vst.msk [vmem:[#allocation2] sm:$0xff] %vm4441_vm6, %v4418_v34 }
 0xd60   : > { %v4451_v10 = vld [vmem:[#allocation2 + $0x8] sm:$0xff] }
 0xd61   : > { %v4450_v6 = vld [vmem:[#allocation2] sm:$0xff] }
 0xd62   : > { %5208 = vmatprep.mubr.msk.f32.mxu0 %vm315_vm0, %v4450_v6 }
 0xd63   : > { %5209 = vmatmul.mubr.msk.f32.vlgmr.msra.gmra.mrb[34].mxu0 %vm315_vm0, %v4451_v10 }
 0xd6f   : > { %v4424_v58 = vpop.permute.xlu1 %4423 }
 0xd70   : > { %4445 = vst.msk [vmem:[#allocation2 + $0x18] sm:$0xff] %vm4441_vm6, %v4424_v58  ;;  %v4422_v36 = vpop.permute.xlu0 %4421 }
 0xd71   : > { %4444 = vst.msk [vmem:[#allocation2 + $0x10] sm:$0xff] %vm4441_vm6, %v4422_v36 }
 0xd73   : > { %v4428_v2 = vpop.permute.xlu1 %4427 }
 0xd74   : > { %4447 = vst.msk [vmem:[#allocation2 + $0x28] sm:$0xff] %vm4441_vm6, %v4428_v2  ;;  %v4426_v53 = vpop.permute.xlu0 %4425 }
 0xd75   : > { %4446 = vst.msk [vmem:[#allocation2 + $0x20] sm:$0xff] %vm4441_vm6, %v4426_v53 }
 0xd77   : > { %v4453_v14 = vld [vmem:[#allocation2 + $0x18] sm:$0xff] }
 0xd78   : > { %v4452_v4 = vld [vmem:[#allocation2 + $0x10] sm:$0xff] }
 0xd79   : > { %5211 = vmatprep.mubr.msk.f32.mxu0 %vm315_vm0, %v4452_v4 }
 0xd7a   : > { %5212 = vmatmul.mubr.msk.f32.gmra.mrb[36].mxu0 %vm315_vm0, %v4453_v14 }
 0xd7b   : > { %v4455_v31 = vld [vmem:[#allocation2 + $0x28] sm:$0xff] }
 0xd7c   : > { %v4454_v26 = vld [vmem:[#allocation2 + $0x20] sm:$0xff] }
 0xd7d   : > { %5214 = vmatprep.mubr.msk.f32.mxu0 %vm315_vm0, %v4454_v26 }
 0xd7e   : > { %5215 = vmatmul.mubr.msk.f32.gmra.mrb[38].mxu0 %vm315_vm0, %v4455_v31 }
 0xd9e   : > { %v4432_v5 = vpop.permute.xlu1 %4431 }
 0xd9f   : > { %4449 = vst.msk [vmem:[#allocation2 + $0x38] sm:$0xff] %vm4441_vm6, %v4432_v5  ;;  %v4430_v42 = vpop.permute.xlu0 %4429 }
 0xda0   : > { %4448 = vst.msk [vmem:[#allocation2 + $0x30] sm:$0xff] %vm4441_vm6, %v4430_v42 }
 0xda6   : > { %v4457_v43 = vld [vmem:[#allocation2 + $0x38] sm:$0xff] }
 0xda7   : > { %v4456_v38 = vld [vmem:[#allocation2 + $0x30] sm:$0xff] }
 0xda8   : > { %5217 = vmatprep.mubr.msk.f32.mxu0 %vm315_vm0, %v4456_v38 }
 0xda9   : > { %5218 = vmatmul.mubr.msk.f32.gmra.mrb[40].mxu0 %vm315_vm0, %v4457_v43 }
 0xe36   : > { %v5210_v13 = vpop.f32.mrb[34].mxu0 }
 0xe37   : > { %v4565_v59 = vadd.f32 %v5210_v13, %v4793_v11  ;;  %v4559_v27 = vpop.f32.mrb[35].mxu0 }
 0xe38   : > { %v4560_v52 = vadd.f32 %v4793_v11, %v4559_v27 }
 0xe39   : > { %4599 = vst.msk [vmem:[%s294_s9 + $0x8] sm:$0xff] %vm315_vm0, %v4565_v59 }
 0xe3a   : > { %4598 = vst.msk [vmem:[%s294_s9] sm:$0xff] %vm315_vm0, %v4560_v52 }
 0xe4d   : > { %v5213_v37 = vpop.f32.mrb[36].mxu0 }
 0xe4e   : > { %v4575_v30 = vadd.f32 %v5213_v37, %v4793_v11  ;;  %v4569_v54 = vpop.f32.mrb[37].mxu0 }
 0xe4f   : > { %v4570_v39 = vadd.f32 %v4793_v11, %v4569_v54 }
 0xe50   : > { %4601 = vst.msk [vmem:[%s294_s9 + $0x18] sm:$0xff] %vm315_vm0, %v4575_v30 }
 0xe51   : > { %4600 = vst.msk [vmem:[%s294_s9 + $0x10] sm:$0xff] %vm315_vm0, %v4570_v39  ;;  %v5216_v51 = vpop.f32.mrb[38].mxu0 }
 0xe52   : > { %v4585_v19 = vadd.f32 %v5216_v51, %v4793_v11  ;;  %v4579_v61 = vpop.f32.mrb[39].mxu0 }
 0xe53   : > { %v4580_v8 = vadd.f32 %v4793_v11, %v4579_v61 }
 0xe54   : > { %4603 = vst.msk [vmem:[%s294_s9 + $0x28] sm:$0xff] %vm315_vm0, %v4585_v19 }
 0xe55   : > { %4602 = vst.msk [vmem:[%s294_s9 + $0x20] sm:$0xff] %vm315_vm0, %v4580_v8 }
 0xe7c   : > { %v5219_v55 = vpop.f32.mrb[40].mxu0 }
 0xe7d   : > { %v4595_v20 = vadd.f32 %v5219_v55, %v4793_v11  ;;  %v4589_v46 = vpop.f32.mrb[41].mxu0 }
 0xe7e   : > { %v4590_v18 = vadd.f32 %v4793_v11, %v4589_v46 }
 0xe7f   : > { %4605 = vst.msk [vmem:[%s294_s9 + $0x38] sm:$0xff] %vm315_vm0, %v4595_v20 }
 0xe80   : > { %4604 = vst.msk [vmem:[%s294_s9 + $0x30] sm:$0xff] %vm315_vm0, %v4590_v18 }
 0xe81 PF: > { %s18_s24 = sadd.s32 1, %s5874_s24  }
 0xe82   : > { %p15_p1 = scmp.ge.s32.totalorder %s18_s24, 4  }
 0xe84   :  { %17 = sbr.rel (!%p15_p1) target bundleno = 1 (0x1), region = 83 }
 0xe8b   :  { %4628 = vsyncpa [#allocation4], 1 }
 0xe8c   :  { %4630 = vsyncpa [#allocation4 + $0x1], 1 }

</bundles_post_ra>
